<compile_context>
chip_gen: v7x
topology: tpu7x:2x2x1
jax: 0.10.0
libtpu: 0.0.40
codegen_flags: <defaults>
</compile_context>

<pallas_src>
import functools

import jax
import jax.numpy as jnp
from jax.experimental import pallas as pl
from jax.experimental.pallas import tpu as pltpu

# ----------------------------------------------------------------------------
# hyper-params (small synthetic configuration consistent with the module)
# ----------------------------------------------------------------------------
NUM_USERS = 8
NUM_ITEMS = 8
EMBED_DIM = 32
NUM_HEADS = 4
FUSION_DIM = EMBED_DIM * NUM_HEADS          # 128 -> lane-dense on TPU
NUM_SIDE_TOKENS = 4
SIDE_TOKEN_DIM = 16
MASK_RATIO = 0.2
DROPOUT_RATE = 0.2
BATCH = 4
NUM_EDGE_PAIRS = 12                          # -> 24 directed edges


# ----------------------------------------------------------------------------
# the single fused kernel
# ----------------------------------------------------------------------------
def _gformer_fused_kernel(
    # inputs -------------------------------------------------------------
    adj_ref, user_idx_ref, wine_idx_ref, node_mask_ref,
    user_emb_ref, wine_emb_ref,
    user_proj_w_ref, user_proj_b_ref, wine_proj_w_ref, wine_proj_b_ref,
    side_flat_ref, sf_side_w_ref, sf_side_b_ref,
    sf_wq_ref, sf_bq_ref, sf_wk_ref, sf_bk_ref, sf_wv_ref, sf_bv_ref,
    sf_wo_ref, sf_bo_ref, sf_fcw_base_ref, sf_fcw_attn_ref, sf_fcb_ref,
    gcn_w_ref, gcn_b_ref,
    tr_wq_ref, tr_bq_ref, tr_wk_ref, tr_bk_ref, tr_wv_ref, tr_bv_ref,
    tr_ws_ref, tr_bs_ref, ae_b_ref,
    head_wu_ref, head_ww_ref, head_b_ref,
    # outputs ------------------------------------------------------------
    score_ref, recon_ref, edge_loss_ref,
    # scratch ------------------------------------------------------------
    nf_scratch,
    # static config ------------------------------------------------------
    *, num_users, num_items, num_heads, num_side_tokens, feat, batch):
  f32 = jnp.float32
  F = feat
  H = num_heads
  T = num_side_tokens
  NU = num_users
  NI = num_items
  N = NU + NI
  B = batch
  scale = 1.0 / (F ** 0.5)

  def mm(a, b):
    return jnp.dot(a, b, preferred_element_type=f32)

  def mm_t(a, b):
    # a @ b.T without materializing the transpose (contract dim 1 of both).
    return jax.lax.dot_general(a, b, (((1,), (1,)), ((), ())),
                               preferred_element_type=f32)

  adj = adj_ref[...]                                            # (N, N)

  # --- user / wine projections -----------------------------------------
  user_proj = mm(user_emb_ref[...], user_proj_w_ref[...]) + user_proj_b_ref[...]
  wine_proj = mm(wine_emb_ref[...], wine_proj_w_ref[...]) + wine_proj_b_ref[...]

  # --- WineSideFusion: single-head MHA, query = wine_proj, keys/vals = side tokens
  side_proj = mm(side_flat_ref[...], sf_side_w_ref[...]) + sf_side_b_ref[...]   # (NI*T, F)
  q = mm(wine_proj, sf_wq_ref[...]) + sf_bq_ref[...]                            # (NI, F)
  k = mm(side_proj, sf_wk_ref[...]) + sf_bk_ref[...]                            # (NI*T, F)
  v = mm(side_proj, sf_wv_ref[...]) + sf_bv_ref[...]                            # (NI*T, F)
  scores = mm_t(q, k) * scale                                                   # (NI, NI*T)
  # wine n may only attend to its own T side tokens (block-diagonal mask).
  row = jax.lax.broadcasted_iota(jnp.int32, (NI, NI * T), 0)
  col = jax.lax.broadcasted_iota(jnp.int32, (NI, NI * T), 1)
  own = (col >= row * T) & (col < (row + 1) * T)
  scores = jnp.where(own, scores, -1e30)
  scores = scores - jnp.max(scores, axis=-1, keepdims=True)
  p = jnp.exp(scores)
  attn = p * pl.reciprocal(jnp.sum(p, axis=-1, keepdims=True), approx=True)
  ctx = mm(attn, v)                                                             # (NI, F)
  attn_out = mm(ctx, sf_wo_ref[...]) + sf_bo_ref[...]
  # fc on cat([wine_proj, attn_out]) done as split-weight matmul adds.
  fused_wine = (mm(wine_proj, sf_fcw_base_ref[...])
                + mm(attn_out, sf_fcw_attn_ref[...]) + sf_fcb_ref[...])

  # --- node features: cat([user_proj, fused_wine], dim=0) via VMEM scratch
  # NU == 8 => both stores land on sublane-tile boundaries (unmasked vst).
  nf_scratch[0:NU, :] = user_proj
  nf_scratch[NU:N, :] = fused_wine
  x = nf_scratch[...]                                                           # (N, F)

  # --- GCNConv: D^-1/2 (A + I) D^-1/2 (X W) + b -------------------------
  rr = jax.lax.broadcasted_iota(jnp.int32, (N, N), 0)
  cc = jax.lax.broadcasted_iota(jnp.int32, (N, N), 1)
  eye = (rr == cc).astype(f32)
  a_hat = jnp.minimum(adj + eye, 1.0)
  deg = jnp.sum(a_hat, axis=1, keepdims=True)                                   # (N, 1)
  dinv = jax.lax.rsqrt(deg)
  h = mm(x, gcn_w_ref[...])
  x = dinv * mm(a_hat, dinv * h) + gcn_b_ref[...]

  # --- TransformerConv (heads=H, concat=False, root weight) -------------
  q = mm(x, tr_wq_ref[...]) + tr_bq_ref[...]                                    # (N, H*F)
  k = mm(x, tr_wk_ref[...]) + tr_bk_ref[...]
  v = mm(x, tr_wv_ref[...]) + tr_bv_ref[...]
  adj_pos = adj > 0
  acc = jnp.zeros((N, F), f32)
  for hh in range(H):          # static tiny H; slices are lane-tile aligned (F=128)
    lo, hi = hh * F, (hh + 1) * F
    s = mm_t(q[:, lo:hi], k[:, lo:hi]) * scale                                  # (N, N)
    s = jnp.where(adj_pos, s, -1e30)
    s = s - jnp.max(s, axis=-1, keepdims=True)
    pe = jnp.exp(s) * adj                    # exact zeros where no edge
    denom = jnp.sum(pe, axis=-1, keepdims=True)
    # nodes w/o incoming edges -> alpha row stays exactly 0 (matches PyG)
    alpha = pe * pl.reciprocal(jnp.maximum(denom, 1e-20), approx=True)
    acc = acc + mm(alpha, v[:, lo:hi])
  nf = acc * (1.0 / H) + mm(x, tr_ws_ref[...]) + tr_bs_ref[...]                 # (N, F)

  # --- masked node autoencoding loss: autoencoder(0) == ae bias ---------
  mask = node_mask_ref[...]                                                     # (N, 1)
  diff = ae_b_ref[...] - nf
  per_node = jnp.sum(diff * diff, axis=1, keepdims=True)                        # (N, 1)
  n_masked = jnp.sum(mask, axis=0, keepdims=True)                               # (1, 1)
  recon_ref[...] = (jnp.sum(mask * per_node, axis=0, keepdims=True)
                    / (jnp.maximum(n_masked, 1.0) * F))

  # --- node gathers as one-hot matmuls + fused prediction heads ---------
  node_ids = jax.lax.broadcasted_iota(jnp.int32, (B, N), 1)
  oh_u = (node_ids == user_idx_ref[...]).astype(f32)                            # (B, N)
  oh_w = (node_ids == (wine_idx_ref[...] + NU)).astype(f32)
  user_out = mm(oh_u, nf)                                                       # (B, F)
  wine_out = mm(oh_w, nf)
  # [fc | edge_predictor] heads share one (F, 2) matmul; cat([u, w]) split-weight.
  logits = (mm(user_out, head_wu_ref[...]) + mm(wine_out, head_ww_ref[...])
            + head_b_ref[...])                                                  # (B, 2)
  edge_scores = jax.nn.sigmoid(logits[:, 1:2])
  edge_loss_ref[...] = jnp.sum((edge_scores - 1.0) ** 2, axis=0, keepdims=True) / B
  score_ref[...] = jax.nn.sigmoid(logits[:, 0:1]) * 4.0 + 1.0


# ----------------------------------------------------------------------------
# parameter init (deterministic, synthetic)
# ----------------------------------------------------------------------------
def init_params(key):
  def nrm(k, shape, scale=0.1):
    return jax.random.normal(k, shape, jnp.float32) * scale

  keys = jax.random.split(key, 32)
  F = FUSION_DIM
  p = {
      'user_emb': nrm(keys[0], (NUM_USERS, EMBED_DIM)),
      'wine_emb': nrm(keys[1], (NUM_ITEMS, EMBED_DIM)),
      'user_proj_w': nrm(keys[2], (EMBED_DIM, F)), 'user_proj_b': nrm(keys[3], (F,), 0.01),
      'wine_proj_w': nrm(keys[4], (EMBED_DIM, F)), 'wine_proj_b': nrm(keys[5], (F,), 0.01),
      # WineSideFusion
      'sf_side_w': nrm(keys[6], (SIDE_TOKEN_DIM, F)), 'sf_side_b': nrm(keys[7], (F,), 0.01),
      'sf_wq': nrm(keys[8], (F, F)), 'sf_bq': nrm(keys[9], (F,), 0.01),
      'sf_wk': nrm(keys[10], (F, F)), 'sf_bk': nrm(keys[11], (F,), 0.01),
      'sf_wv': nrm(keys[12], (F, F)), 'sf_bv': nrm(keys[13], (F,), 0.01),
      'sf_wo': nrm(keys[14], (F, F)), 'sf_bo': nrm(keys[15], (F,), 0.01),
      'sf_fc_w': nrm(keys[16], (2 * F, F)), 'sf_fc_b': nrm(keys[17], (F,), 0.01),
      # GCNConv
      'gcn_w': nrm(keys[18], (F, F)), 'gcn_b': nrm(keys[19], (F,), 0.01),
      # TransformerConv
      'tr_wq': nrm(keys[20], (F, NUM_HEADS * F)), 'tr_bq': nrm(keys[21], (NUM_HEADS * F,), 0.01),
      'tr_wk': nrm(keys[22], (F, NUM_HEADS * F)), 'tr_bk': nrm(keys[23], (NUM_HEADS * F,), 0.01),
      'tr_wv': nrm(keys[24], (F, NUM_HEADS * F)), 'tr_bv': nrm(keys[25], (NUM_HEADS * F,), 0.01),
      'tr_ws': nrm(keys[26], (F, F)), 'tr_bs': nrm(keys[27], (F,), 0.01),
      # heads
      'fc_w': nrm(keys[28], (2 * F, 1)), 'fc_b': nrm(keys[29], (1,), 0.01),
      # autoencoder: weight is unused at forward time because masked inputs are
      # exactly zero vectors in the reference (recon == bias); kept for fidelity.
      'ae_w': nrm(keys[30], (F, F)), 'ae_b': nrm(keys[31], (F,), 0.01),
      'ep_w': nrm(jax.random.fold_in(key, 100), (2 * F, 1)),
      'ep_b': nrm(jax.random.fold_in(key, 101), (1,), 0.01),
  }
  return p


# ----------------------------------------------------------------------------
# forward pass (host-side prep is tiny XLA; all math is in one pallas_call)
# ----------------------------------------------------------------------------
@functools.partial(jax.jit, static_argnames=('mask_autoencoding',))
def gformer_forward(params, user, wine, edge_index, wine_side_features, key,
                    mask_autoencoding=True):
  nu = params['user_emb'].shape[0]
  ni = params['wine_emb'].shape[0]
  n = nu + ni
  f = FUSION_DIM
  k_drop, k_mask = jax.random.split(key)

  # edge_dropout + dense adjacency scatter (data-dependent; stays in XLA)
  e = edge_index.shape[1]
  keep = (jax.random.uniform(k_drop, (e,)) > DROPOUT_RATE).astype(jnp.float32)
  src, tgt = edge_index[0], edge_index[1]
  adj = jnp.zeros((n, n), jnp.float32).at[tgt, src].max(keep)    # adj[i, j]: edge j -> i

  # masked-autoencoding node mask (RNG stays in XLA)
  if mask_autoencoding:
    node_mask = (jax.random.uniform(k_mask, (n,)) < MASK_RATIO).astype(jnp.float32)
  else:
    node_mask = jnp.zeros((n,), jnp.float32)
  node_mask = node_mask.reshape(n, 1)

  nw, t, ds = wine_side_features.shape
  side_flat = wine_side_features.reshape(nw * t, ds)

  b = user.shape[0]
  user_idx = user.astype(jnp.int32).reshape(b, 1)
  wine_idx = wine.astype(jnp.int32).reshape(b, 1)

  # split / pack weights so no concatenation is needed inside or between kernels
  sf_fcw_base = params['sf_fc_w'][:f]
  sf_fcw_attn = params['sf_fc_w'][f:]
  head_w = jnp.concatenate([params['fc_w'], params['ep_w']], axis=1)   # (2F, 2)
  head_wu, head_ww = head_w[:f], head_w[f:]
  head_b = jnp.concatenate([params['fc_b'], params['ep_b']]).reshape(1, 2)

  def r(name):  # bias as a (1, dim) row for in-kernel broadcasting
    return params[name].reshape(1, -1)

  kernel = functools.partial(
      _gformer_fused_kernel,
      num_users=nu, num_items=ni, num_heads=NUM_HEADS,
      num_side_tokens=t, feat=f, batch=b)

  score, recon, edge_loss = pl.pallas_call(
      kernel,
      out_shape=(jax.ShapeDtypeStruct((b, 1), jnp.float32),
                 jax.ShapeDtypeStruct((1, 1), jnp.float32),
                 jax.ShapeDtypeStruct((1, 1), jnp.float32)),
      scratch_shapes=[pltpu.VMEM((n, f), jnp.float32)],
  )(adj, user_idx, wine_idx, node_mask,
    params['user_emb'], params['wine_emb'],
    params['user_proj_w'], r('user_proj_b'),
    params['wine_proj_w'], r('wine_proj_b'),
    side_flat, params['sf_side_w'], r('sf_side_b'),
    params['sf_wq'], r('sf_bq'), params['sf_wk'], r('sf_bk'),
    params['sf_wv'], r('sf_bv'), params['sf_wo'], r('sf_bo'),
    sf_fcw_base, sf_fcw_attn, r('sf_fc_b'),
    params['gcn_w'], r('gcn_b'),
    params['tr_wq'], r('tr_bq'), params['tr_wk'], r('tr_bk'),
    params['tr_wv'], r('tr_bv'), params['tr_ws'], r('tr_bs'),
    r('ae_b'),
    head_wu, head_ww, head_b)

  return jnp.squeeze(score, axis=-1), recon[0, 0], edge_loss[0, 0]


# ----------------------------------------------------------------------------
if __name__ == "__main__":
  root = jax.random.PRNGKey(0)
  k_param, k_side, k_u, k_w, k_eu, k_ew, k_fwd = jax.random.split(root, 7)

  params = init_params(k_param)
  wine_side_features = jax.random.normal(
      k_side, (NUM_ITEMS, NUM_SIDE_TOKENS, SIDE_TOKEN_DIM), jnp.float32)

  user = jax.random.randint(k_u, (BATCH,), 0, NUM_USERS)
  wine = jax.random.randint(k_w, (BATCH,), 0, NUM_ITEMS)

  eu = jax.random.randint(k_eu, (NUM_EDGE_PAIRS,), 0, NUM_USERS)
  ew = jax.random.randint(k_ew, (NUM_EDGE_PAIRS,), 0, NUM_ITEMS) + NUM_USERS
  src = jnp.concatenate([eu, ew])
  tgt = jnp.concatenate([ew, eu])
  edge_index = jnp.stack([src, tgt]).astype(jnp.int32)       # [2, 24]

  score, recon_loss, edge_pred_loss = gformer_forward(
      params, user, wine, edge_index, wine_side_features, k_fwd,
      mask_autoencoding=True)

  jax.block_until_ready((score, recon_loss, edge_pred_loss))
  assert score.shape == (BATCH,)
  assert jnp.all(jnp.isfinite(score))
  assert jnp.isfinite(recon_loss) and jnp.isfinite(edge_pred_loss)
  print("KERNEL_OK")
</pallas_src>

<mosaic_0001>
module attributes {stable_mosaic.version = 11 : i64} {
  func.func @_gformer_fused_kernel(%arg0: memref<16x16xf32, #tpu.memory_space<vmem>>, %arg1: memref<4x1xi32, #tpu.memory_space<vmem>>, %arg2: memref<4x1xi32, #tpu.memory_space<vmem>>, %arg3: memref<16x1xf32, #tpu.memory_space<vmem>>, %arg4: memref<8x32xf32, #tpu.memory_space<vmem>>, %arg5: memref<8x32xf32, #tpu.memory_space<vmem>>, %arg6: memref<32x128xf32, #tpu.memory_space<vmem>>, %arg7: memref<1x128xf32, #tpu.memory_space<vmem>>, %arg8: memref<32x128xf32, #tpu.memory_space<vmem>>, %arg9: memref<1x128xf32, #tpu.memory_space<vmem>>, %arg10: memref<32x16xf32, #tpu.memory_space<vmem>>, %arg11: memref<16x128xf32, #tpu.memory_space<vmem>>, %arg12: memref<1x128xf32, #tpu.memory_space<vmem>>, %arg13: memref<128x128xf32, #tpu.memory_space<vmem>>, %arg14: memref<1x128xf32, #tpu.memory_space<vmem>>, %arg15: memref<128x128xf32, #tpu.memory_space<vmem>>, %arg16: memref<1x128xf32, #tpu.memory_space<vmem>>, %arg17: memref<128x128xf32, #tpu.memory_space<vmem>>, %arg18: memref<1x128xf32, #tpu.memory_space<vmem>>, %arg19: memref<128x128xf32, #tpu.memory_space<vmem>>, %arg20: memref<1x128xf32, #tpu.memory_space<vmem>>, %arg21: memref<128x128xf32, #tpu.memory_space<vmem>>, %arg22: memref<128x128xf32, #tpu.memory_space<vmem>>, %arg23: memref<1x128xf32, #tpu.memory_space<vmem>>, %arg24: memref<128x128xf32, #tpu.memory_space<vmem>>, %arg25: memref<1x128xf32, #tpu.memory_space<vmem>>, %arg26: memref<128x512xf32, #tpu.memory_space<vmem>>, %arg27: memref<1x512xf32, #tpu.memory_space<vmem>>, %arg28: memref<128x512xf32, #tpu.memory_space<vmem>>, %arg29: memref<1x512xf32, #tpu.memory_space<vmem>>, %arg30: memref<128x512xf32, #tpu.memory_space<vmem>>, %arg31: memref<1x512xf32, #tpu.memory_space<vmem>>, %arg32: memref<128x128xf32, #tpu.memory_space<vmem>>, %arg33: memref<1x128xf32, #tpu.memory_space<vmem>>, %arg34: memref<1x128xf32, #tpu.memory_space<vmem>>, %arg35: memref<128x2xf32, #tpu.memory_space<vmem>>, %arg36: memref<128x2xf32, #tpu.memory_space<vmem>>, %arg37: memref<1x2xf32, #tpu.memory_space<vmem>>, %arg38: memref<4x1xf32, #tpu.memory_space<vmem>>, %arg39: memref<1x1xf32, #tpu.memory_space<vmem>>, %arg40: memref<1x1xf32, #tpu.memory_space<vmem>>, %arg41: memref<16x128xf32, #tpu.memory_space<vmem>>) attributes {dimension_semantics = [], scalar_prefetch = 0 : i64, scratch_operands = 1 : i64, tpu.core_type = #tpu.core_type<tc>} {
    %c0 = arith.constant 0 : index
    %c0_0 = arith.constant 0 : index
    %0 = vector.load %arg0[%c0, %c0_0] : memref<16x16xf32, #tpu.memory_space<vmem>>, vector<16x16xf32>
    %c0_1 = arith.constant 0 : index
    %c0_2 = arith.constant 0 : index
    %1 = vector.load %arg4[%c0_1, %c0_2] : memref<8x32xf32, #tpu.memory_space<vmem>>, vector<8x32xf32>
    %c0_3 = arith.constant 0 : index
    %c0_4 = arith.constant 0 : index
    %2 = vector.load %arg6[%c0_3, %c0_4] : memref<32x128xf32, #tpu.memory_space<vmem>>, vector<32x128xf32>
    %cst = arith.constant dense<0.000000e+00> : vector<8x128xf32>
    %3 = tpu.matmul %1, %2, %cst {dimension_numbers = #tpu.dot_dimension_numbers<[1], [0], [0], [1], [0, 0, 1, 1], [], []>} : vector<8x32xf32>, vector<32x128xf32>, vector<8x128xf32> -> vector<8x128xf32>
    %c0_5 = arith.constant 0 : index
    %c0_6 = arith.constant 0 : index
    %4 = vector.load %arg7[%c0_5, %c0_6] : memref<1x128xf32, #tpu.memory_space<vmem>>, vector<1x128xf32>
    %5 = vector.broadcast %4 : vector<1x128xf32> to vector<8x128xf32>
    %6 = arith.addf %3, %5 : vector<8x128xf32>
    %c0_7 = arith.constant 0 : index
    %c0_8 = arith.constant 0 : index
    %7 = vector.load %arg5[%c0_7, %c0_8] : memref<8x32xf32, #tpu.memory_space<vmem>>, vector<8x32xf32>
    %c0_9 = arith.constant 0 : index
    %c0_10 = arith.constant 0 : index
    %8 = vector.load %arg8[%c0_9, %c0_10] : memref<32x128xf32, #tpu.memory_space<vmem>>, vector<32x128xf32>
    %cst_11 = arith.constant dense<0.000000e+00> : vector<8x128xf32>
    %9 = tpu.matmul %7, %8, %cst_11 {dimension_numbers = #tpu.dot_dimension_numbers<[1], [0], [0], [1], [0, 0, 1, 1], [], []>} : vector<8x32xf32>, vector<32x128xf32>, vector<8x128xf32> -> vector<8x128xf32>
    %c0_12 = arith.constant 0 : index
    %c0_13 = arith.constant 0 : index
    %10 = vector.load %arg9[%c0_12, %c0_13] : memref<1x128xf32, #tpu.memory_space<vmem>>, vector<1x128xf32>
    %11 = vector.broadcast %10 : vector<1x128xf32> to vector<8x128xf32>
    %12 = arith.addf %9, %11 : vector<8x128xf32>
    %c0_14 = arith.constant 0 : index
    %c0_15 = arith.constant 0 : index
    %13 = vector.load %arg10[%c0_14, %c0_15] : memref<32x16xf32, #tpu.memory_space<vmem>>, vector<32x16xf32>
    %c0_16 = arith.constant 0 : index
    %c0_17 = arith.constant 0 : index
    %14 = vector.load %arg11[%c0_16, %c0_17] : memref<16x128xf32, #tpu.memory_space<vmem>>, vector<16x128xf32>
    %cst_18 = arith.constant dense<0.000000e+00> : vector<32x128xf32>
    %15 = tpu.matmul %13, %14, %cst_18 {dimension_numbers = #tpu.dot_dimension_numbers<[1], [0], [0], [1], [0, 0, 1, 1], [], []>} : vector<32x16xf32>, vector<16x128xf32>, vector<32x128xf32> -> vector<32x128xf32>
    %c0_19 = arith.constant 0 : index
    %c0_20 = arith.constant 0 : index
    %16 = vector.load %arg12[%c0_19, %c0_20] : memref<1x128xf32, #tpu.memory_space<vmem>>, vector<1x128xf32>
    %17 = vector.broadcast %16 : vector<1x128xf32> to vector<32x128xf32>
    %18 = arith.addf %15, %17 : vector<32x128xf32>
    %c0_21 = arith.constant 0 : index
    %c0_22 = arith.constant 0 : index
    %19 = vector.load %arg13[%c0_21, %c0_22] : memref<128x128xf32, #tpu.memory_space<vmem>>, vector<128x128xf32>
    %cst_23 = arith.constant dense<0.000000e+00> : vector<8x128xf32>
    %20 = tpu.matmul %12, %19, %cst_23 {dimension_numbers = #tpu.dot_dimension_numbers<[1], [0], [0], [1], [0, 0, 1, 1], [], []>} : vector<8x128xf32>, vector<128x128xf32>, vector<8x128xf32> -> vector<8x128xf32>
    %c0_24 = arith.constant 0 : index
    %c0_25 = arith.constant 0 : index
    %21 = vector.load %arg14[%c0_24, %c0_25] : memref<1x128xf32, #tpu.memory_space<vmem>>, vector<1x128xf32>
    %22 = vector.broadcast %21 : vector<1x128xf32> to vector<8x128xf32>
    %23 = arith.addf %20, %22 : vector<8x128xf32>
    %c0_26 = arith.constant 0 : index
    %c0_27 = arith.constant 0 : index
    %24 = vector.load %arg15[%c0_26, %c0_27] : memref<128x128xf32, #tpu.memory_space<vmem>>, vector<128x128xf32>
    %cst_28 = arith.constant dense<0.000000e+00> : vector<32x128xf32>
    %25 = tpu.matmul %18, %24, %cst_28 {dimension_numbers = #tpu.dot_dimension_numbers<[1], [0], [0], [1], [0, 0, 1, 1], [], []>} : vector<32x128xf32>, vector<128x128xf32>, vector<32x128xf32> -> vector<32x128xf32>
    %c0_29 = arith.constant 0 : index
    %c0_30 = arith.constant 0 : index
    %26 = vector.load %arg16[%c0_29, %c0_30] : memref<1x128xf32, #tpu.memory_space<vmem>>, vector<1x128xf32>
    %27 = vector.broadcast %26 : vector<1x128xf32> to vector<32x128xf32>
    %28 = arith.addf %25, %27 : vector<32x128xf32>
    %c0_31 = arith.constant 0 : index
    %c0_32 = arith.constant 0 : index
    %29 = vector.load %arg17[%c0_31, %c0_32] : memref<128x128xf32, #tpu.memory_space<vmem>>, vector<128x128xf32>
    %cst_33 = arith.constant dense<0.000000e+00> : vector<32x128xf32>
    %30 = tpu.matmul %18, %29, %cst_33 {dimension_numbers = #tpu.dot_dimension_numbers<[1], [0], [0], [1], [0, 0, 1, 1], [], []>} : vector<32x128xf32>, vector<128x128xf32>, vector<32x128xf32> -> vector<32x128xf32>
    %c0_34 = arith.constant 0 : index
    %c0_35 = arith.constant 0 : index
    %31 = vector.load %arg18[%c0_34, %c0_35] : memref<1x128xf32, #tpu.memory_space<vmem>>, vector<1x128xf32>
    %32 = vector.broadcast %31 : vector<1x128xf32> to vector<32x128xf32>
    %33 = arith.addf %30, %32 : vector<32x128xf32>
    %cst_36 = arith.constant dense<0.000000e+00> : vector<8x32xf32>
    %34 = tpu.matmul %23, %28, %cst_36 {dimension_numbers = #tpu.dot_dimension_numbers<[1], [1], [0], [0], [0, 0, 1, 0], [], []>} : vector<8x128xf32>, vector<32x128xf32>, vector<8x32xf32> -> vector<8x32xf32>
    %cst_37 = arith.constant 0.0883883461 : f32
    %35 = vector.broadcast %cst_37 : f32 to vector<8x32xf32>
    %36 = arith.mulf %34, %35 : vector<8x32xf32>
    %37 = tpu.iota {dimensions = array<i32: 0>} : vector<8x32xi32>
    %38 = tpu.iota {dimensions = array<i32: 1>} : vector<8x32xi32>
    %c4_i32 = arith.constant 4 : i32
    %39 = vector.broadcast %c4_i32 : i32 to vector<8x32xi32>
    %40 = arith.muli %37, %39 : vector<8x32xi32>
    %41 = arith.cmpi sge, %38, %40 : vector<8x32xi32>
    %c1_i32 = arith.constant 1 : i32
    %42 = vector.broadcast %c1_i32 : i32 to vector<8x32xi32>
    %43 = arith.addi %37, %42 : vector<8x32xi32>
    %c4_i32_38 = arith.constant 4 : i32
    %44 = vector.broadcast %c4_i32_38 : i32 to vector<8x32xi32>
    %45 = arith.muli %43, %44 : vector<8x32xi32>
    %46 = arith.cmpi slt, %38, %45 : vector<8x32xi32>
    %47 = arith.andi %41, %46 : vector<8x32xi1>
    %cst_39 = arith.constant -1.000000e+30 : f32
    %48 = vector.broadcast %cst_39 : f32 to vector<8x32xf32>
    %49 = arith.select %47, %36, %48 : vector<8x32xi1>, vector<8x32xf32>
    %cst_40 = arith.constant dense<0xFF800000> : vector<8xf32>
    %50 = vector.multi_reduction <maximumf>, %49, %cst_40 [1] : vector<8x32xf32> to vector<8xf32>
    %51 = vector.shape_cast %50 : vector<8xf32> to vector<8x1xf32>
    %52 = vector.broadcast %51 : vector<8x1xf32> to vector<8x32xf32>
    %53 = arith.subf %49, %52 : vector<8x32xf32>
    %54 = math.exp %53 : vector<8x32xf32>
    %cst_41 = arith.constant dense<0.000000e+00> : vector<8xf32>
    %55 = vector.multi_reduction <add>, %54, %cst_41 [1] : vector<8x32xf32> to vector<8xf32>
    %56 = vector.shape_cast %55 : vector<8xf32> to vector<8x1xf32>
    %57 = tpu.reciprocal %56 {approx = true} : vector<8x1xf32> -> vector<8x1xf32>
    %58 = vector.broadcast %57 : vector<8x1xf32> to vector<8x32xf32>
    %59 = arith.mulf %54, %58 : vector<8x32xf32>
    %cst_42 = arith.constant dense<0.000000e+00> : vector<8x128xf32>
    %60 = tpu.matmul %59, %33, %cst_42 {dimension_numbers = #tpu.dot_dimension_numbers<[1], [0], [0], [1], [0, 0, 1, 1], [], []>} : vector<8x32xf32>, vector<32x128xf32>, vector<8x128xf32> -> vector<8x128xf32>
    %c0_43 = arith.constant 0 : index
    %c0_44 = arith.constant 0 : index
    %61 = vector.load %arg19[%c0_43, %c0_44] : memref<128x128xf32, #tpu.memory_space<vmem>>, vector<128x128xf32>
    %cst_45 = arith.constant dense<0.000000e+00> : vector<8x128xf32>
    %62 = tpu.matmul %60, %61, %cst_45 {dimension_numbers = #tpu.dot_dimension_numbers<[1], [0], [0], [1], [0, 0, 1, 1], [], []>} : vector<8x128xf32>, vector<128x128xf32>, vector<8x128xf32> -> vector<8x128xf32>
    %c0_46 = arith.constant 0 : index
    %c0_47 = arith.constant 0 : index
    %63 = vector.load %arg20[%c0_46, %c0_47] : memref<1x128xf32, #tpu.memory_space<vmem>>, vector<1x128xf32>
    %64 = vector.broadcast %63 : vector<1x128xf32> to vector<8x128xf32>
    %65 = arith.addf %62, %64 : vector<8x128xf32>
    %c0_48 = arith.constant 0 : index
    %c0_49 = arith.constant 0 : index
    %66 = vector.load %arg21[%c0_48, %c0_49] : memref<128x128xf32, #tpu.memory_space<vmem>>, vector<128x128xf32>
    %cst_50 = arith.constant dense<0.000000e+00> : vector<8x128xf32>
    %67 = tpu.matmul %12, %66, %cst_50 {dimension_numbers = #tpu.dot_dimension_numbers<[1], [0], [0], [1], [0, 0, 1, 1], [], []>} : vector<8x128xf32>, vector<128x128xf32>, vector<8x128xf32> -> vector<8x128xf32>
    %c0_51 = arith.constant 0 : index
    %c0_52 = arith.constant 0 : index
    %68 = vector.load %arg22[%c0_51, %c0_52] : memref<128x128xf32, #tpu.memory_space<vmem>>, vector<128x128xf32>
    %cst_53 = arith.constant dense<0.000000e+00> : vector<8x128xf32>
    %69 = tpu.matmul %65, %68, %cst_53 {dimension_numbers = #tpu.dot_dimension_numbers<[1], [0], [0], [1], [0, 0, 1, 1], [], []>} : vector<8x128xf32>, vector<128x128xf32>, vector<8x128xf32> -> vector<8x128xf32>
    %70 = arith.addf %67, %69 : vector<8x128xf32>
    %c0_54 = arith.constant 0 : index
    %c0_55 = arith.constant 0 : index
    %71 = vector.load %arg23[%c0_54, %c0_55] : memref<1x128xf32, #tpu.memory_space<vmem>>, vector<1x128xf32>
    %72 = vector.broadcast %71 : vector<1x128xf32> to vector<8x128xf32>
    %73 = arith.addf %70, %72 : vector<8x128xf32>
    %c0_56 = arith.constant 0 : index
    %c0_57 = arith.constant 0 : index
    %74 = vector.load %arg41[%c0_56, %c0_57] : memref<16x128xf32, #tpu.memory_space<vmem>>, vector<8x128xf32>
    tpu.vector_store %arg41[%c0_56, %c0_57], %6 {strides = array<i32>} : memref<16x128xf32, #tpu.memory_space<vmem>>, vector<8x128xf32>,
    %c8 = arith.constant 8 : index
    %c0_58 = arith.constant 0 : index
    %75 = vector.load %arg41[%c8, %c0_58] : memref<16x128xf32, #tpu.memory_space<vmem>>, vector<8x128xf32>
    tpu.vector_store %arg41[%c8, %c0_58], %73 {strides = array<i32>} : memref<16x128xf32, #tpu.memory_space<vmem>>, vector<8x128xf32>,
    %c0_59 = arith.constant 0 : index
    %c0_60 = arith.constant 0 : index
    %76 = vector.load %arg41[%c0_59, %c0_60] : memref<16x128xf32, #tpu.memory_space<vmem>>, vector<16x128xf32>
    %77 = tpu.iota {dimensions = array<i32: 0>} : vector<16x16xi32>
    %78 = tpu.iota {dimensions = array<i32: 1>} : vector<16x16xi32>
    %79 = arith.cmpi eq, %77, %78 : vector<16x16xi32>
    %80 = arith.extui %79 : vector<16x16xi1> to vector<16x16xi32>
    %81 = arith.sitofp %80 : vector<16x16xi32> to vector<16x16xf32>
    %82 = arith.addf %0, %81 : vector<16x16xf32>
    %cst_61 = arith.constant 1.000000e+00 : f32
    %83 = vector.broadcast %cst_61 : f32 to vector<16x16xf32>
    %84 = arith.minimumf %82, %83 : vector<16x16xf32>
    %cst_62 = arith.constant dense<0.000000e+00> : vector<16xf32>
    %85 = vector.multi_reduction <add>, %84, %cst_62 [1] : vector<16x16xf32> to vector<16xf32>
    %86 = vector.shape_cast %85 : vector<16xf32> to vector<16x1xf32>
    %87 = math.rsqrt %86 : vector<16x1xf32>
    %c0_63 = arith.constant 0 : index
    %c0_64 = arith.constant 0 : index
    %88 = vector.load %arg24[%c0_63, %c0_64] : memref<128x128xf32, #tpu.memory_space<vmem>>, vector<128x128xf32>
    %cst_65 = arith.constant dense<0.000000e+00> : vector<16x128xf32>
    %89 = tpu.matmul %76, %88, %cst_65 {dimension_numbers = #tpu.dot_dimension_numbers<[1], [0], [0], [1], [0, 0, 1, 1], [], []>} : vector<16x128xf32>, vector<128x128xf32>, vector<16x128xf32> -> vector<16x128xf32>
    %90 = vector.broadcast %87 : vector<16x1xf32> to vector<16x128xf32>
    %91 = arith.mulf %90, %89 : vector<16x128xf32>
    %cst_66 = arith.constant dense<0.000000e+00> : vector<16x128xf32>
    %92 = tpu.matmul %84, %91, %cst_66 {dimension_numbers = #tpu.dot_dimension_numbers<[1], [0], [0], [1], [0, 0, 1, 1], [], []>} : vector<16x16xf32>, vector<16x128xf32>, vector<16x128xf32> -> vector<16x128xf32>
    %93 = vector.broadcast %87 : vector<16x1xf32> to vector<16x128xf32>
    %94 = arith.mulf %93, %92 : vector<16x128xf32>
    %c0_67 = arith.constant 0 : index
    %c0_68 = arith.constant 0 : index
    %95 = vector.load %arg25[%c0_67, %c0_68] : memref<1x128xf32, #tpu.memory_space<vmem>>, vector<1x128xf32>
    %96 = vector.broadcast %95 : vector<1x128xf32> to vector<16x128xf32>
    %97 = arith.addf %94, %96 : vector<16x128xf32>
    %c0_69 = arith.constant 0 : index
    %c0_70 = arith.constant 0 : index
    %98 = vector.load %arg26[%c0_69, %c0_70] : memref<128x512xf32, #tpu.memory_space<vmem>>, vector<128x512xf32>
    %cst_71 = arith.constant dense<0.000000e+00> : vector<16x512xf32>
    %99 = tpu.matmul %97, %98, %cst_71 {dimension_numbers = #tpu.dot_dimension_numbers<[1], [0], [0], [1], [0, 0, 1, 1], [], []>} : vector<16x128xf32>, vector<128x512xf32>, vector<16x512xf32> -> vector<16x512xf32>
    %c0_72 = arith.constant 0 : index
    %c0_73 = arith.constant 0 : index
    %100 = vector.load %arg27[%c0_72, %c0_73] : memref<1x512xf32, #tpu.memory_space<vmem>>, vector<1x512xf32>
    %101 = vector.broadcast %100 : vector<1x512xf32> to vector<16x512xf32>
    %102 = arith.addf %99, %101 : vector<16x512xf32>
    %c0_74 = arith.constant 0 : index
    %c0_75 = arith.constant 0 : index
    %103 = vector.load %arg28[%c0_74, %c0_75] : memref<128x512xf32, #tpu.memory_space<vmem>>, vector<128x512xf32>
    %cst_76 = arith.constant dense<0.000000e+00> : vector<16x512xf32>
    %104 = tpu.matmul %97, %103, %cst_76 {dimension_numbers = #tpu.dot_dimension_numbers<[1], [0], [0], [1], [0, 0, 1, 1], [], []>} : vector<16x128xf32>, vector<128x512xf32>, vector<16x512xf32> -> vector<16x512xf32>
    %c0_77 = arith.constant 0 : index
    %c0_78 = arith.constant 0 : index
    %105 = vector.load %arg29[%c0_77, %c0_78] : memref<1x512xf32, #tpu.memory_space<vmem>>, vector<1x512xf32>
    %106 = vector.broadcast %105 : vector<1x512xf32> to vector<16x512xf32>
    %107 = arith.addf %104, %106 : vector<16x512xf32>
    %c0_79 = arith.constant 0 : index
    %c0_80 = arith.constant 0 : index
    %108 = vector.load %arg30[%c0_79, %c0_80] : memref<128x512xf32, #tpu.memory_space<vmem>>, vector<128x512xf32>
    %cst_81 = arith.constant dense<0.000000e+00> : vector<16x512xf32>
    %109 = tpu.matmul %97, %108, %cst_81 {dimension_numbers = #tpu.dot_dimension_numbers<[1], [0], [0], [1], [0, 0, 1, 1], [], []>} : vector<16x128xf32>, vector<128x512xf32>, vector<16x512xf32> -> vector<16x512xf32>
    %c0_82 = arith.constant 0 : index
    %c0_83 = arith.constant 0 : index
    %110 = vector.load %arg31[%c0_82, %c0_83] : memref<1x512xf32, #tpu.memory_space<vmem>>, vector<1x512xf32>
    %111 = vector.broadcast %110 : vector<1x512xf32> to vector<16x512xf32>
    %112 = arith.addf %109, %111 : vector<16x512xf32>
    %cst_84 = arith.constant 0.000000e+00 : f32
    %113 = vector.broadcast %cst_84 : f32 to vector<16x16xf32>
    %114 = arith.cmpf ogt, %0, %113 : vector<16x16xf32>
    %cst_85 = arith.constant 0.000000e+00 : f32
    %115 = vector.broadcast %cst_85 : f32 to vector<16x128xf32>
    %116 = vector.extract_strided_slice %102 {offsets = [0, 0], sizes = [16, 128], strides = [1, 1]} : vector<16x512xf32> to vector<16x128xf32>
    %117 = vector.extract_strided_slice %107 {offsets = [0, 0], sizes = [16, 128], strides = [1, 1]} : vector<16x512xf32> to vector<16x128xf32>
    %cst_86 = arith.constant dense<0.000000e+00> : vector<16x16xf32>
    %118 = tpu.matmul %116, %117, %cst_86 {dimension_numbers = #tpu.dot_dimension_numbers<[1], [1], [0], [0], [0, 0, 1, 0], [], []>} : vector<16x128xf32>, vector<16x128xf32>, vector<16x16xf32> -> vector<16x16xf32>
    %cst_87 = arith.constant 0.0883883461 : f32
    %119 = vector.broadcast %cst_87 : f32 to vector<16x16xf32>
    %120 = arith.mulf %118, %119 : vector<16x16xf32>
    %cst_88 = arith.constant -1.000000e+30 : f32
    %121 = vector.broadcast %cst_88 : f32 to vector<16x16xf32>
    %122 = arith.select %114, %120, %121 : vector<16x16xi1>, vector<16x16xf32>
    %cst_89 = arith.constant dense<0xFF800000> : vector<16xf32>
    %123 = vector.multi_reduction <maximumf>, %122, %cst_89 [1] : vector<16x16xf32> to vector<16xf32>
    %124 = vector.shape_cast %123 : vector<16xf32> to vector<16x1xf32>
    %125 = vector.broadcast %124 : vector<16x1xf32> to vector<16x16xf32>
    %126 = arith.subf %122, %125 : vector<16x16xf32>
    %127 = math.exp %126 : vector<16x16xf32>
    %128 = arith.mulf %127, %0 : vector<16x16xf32>
    %cst_90 = arith.constant dense<0.000000e+00> : vector<16xf32>
    %129 = vector.multi_reduction <add>, %128, %cst_90 [1] : vector<16x16xf32> to vector<16xf32>
    %130 = vector.shape_cast %129 : vector<16xf32> to vector<16x1xf32>
    %cst_91 = arith.constant 9.99999968E-21 : f32
    %131 = vector.broadcast %cst_91 : f32 to vector<16x1xf32>
    %132 = arith.maximumf %130, %131 : vector<16x1xf32>
    %133 = tpu.reciprocal %132 {approx = true} : vector<16x1xf32> -> vector<16x1xf32>
    %134 = vector.broadcast %133 : vector<16x1xf32> to vector<16x16xf32>
    %135 = arith.mulf %128, %134 : vector<16x16xf32>
    %136 = vector.extract_strided_slice %112 {offsets = [0, 0], sizes = [16, 128], strides = [1, 1]} : vector<16x512xf32> to vector<16x128xf32>
    %cst_92 = arith.constant dense<0.000000e+00> : vector<16x128xf32>
    %137 = tpu.matmul %135, %136, %cst_92 {dimension_numbers = #tpu.dot_dimension_numbers<[1], [0], [0], [1], [0, 0, 1, 1], [], []>} : vector<16x16xf32>, vector<16x128xf32>, vector<16x128xf32> -> vector<16x128xf32>
    %138 = arith.addf %115, %137 : vector<16x128xf32>
    %139 = vector.extract_strided_slice %102 {offsets = [0, 128], sizes = [16, 128], strides = [1, 1]} : vector<16x512xf32> to vector<16x128xf32>
    %140 = vector.extract_strided_slice %107 {offsets = [0, 128], sizes = [16, 128], strides = [1, 1]} : vector<16x512xf32> to vector<16x128xf32>
    %cst_93 = arith.constant dense<0.000000e+00> : vector<16x16xf32>
    %141 = tpu.matmul %139, %140, %cst_93 {dimension_numbers = #tpu.dot_dimension_numbers<[1], [1], [0], [0], [0, 0, 1, 0], [], []>} : vector<16x128xf32>, vector<16x128xf32>, vector<16x16xf32> -> vector<16x16xf32>
    %cst_94 = arith.constant 0.0883883461 : f32
    %142 = vector.broadcast %cst_94 : f32 to vector<16x16xf32>
    %143 = arith.mulf %141, %142 : vector<16x16xf32>
    %cst_95 = arith.constant -1.000000e+30 : f32
    %144 = vector.broadcast %cst_95 : f32 to vector<16x16xf32>
    %145 = arith.select %114, %143, %144 : vector<16x16xi1>, vector<16x16xf32>
    %cst_96 = arith.constant dense<0xFF800000> : vector<16xf32>
    %146 = vector.multi_reduction <maximumf>, %145, %cst_96 [1] : vector<16x16xf32> to vector<16xf32>
    %147 = vector.shape_cast %146 : vector<16xf32> to vector<16x1xf32>
    %148 = vector.broadcast %147 : vector<16x1xf32> to vector<16x16xf32>
    %149 = arith.subf %145, %148 : vector<16x16xf32>
    %150 = math.exp %149 : vector<16x16xf32>
    %151 = arith.mulf %150, %0 : vector<16x16xf32>
    %cst_97 = arith.constant dense<0.000000e+00> : vector<16xf32>
    %152 = vector.multi_reduction <add>, %151, %cst_97 [1] : vector<16x16xf32> to vector<16xf32>
    %153 = vector.shape_cast %152 : vector<16xf32> to vector<16x1xf32>
    %cst_98 = arith.constant 9.99999968E-21 : f32
    %154 = vector.broadcast %cst_98 : f32 to vector<16x1xf32>
    %155 = arith.maximumf %153, %154 : vector<16x1xf32>
    %156 = tpu.reciprocal %155 {approx = true} : vector<16x1xf32> -> vector<16x1xf32>
    %157 = vector.broadcast %156 : vector<16x1xf32> to vector<16x16xf32>
    %158 = arith.mulf %151, %157 : vector<16x16xf32>
    %159 = vector.extract_strided_slice %112 {offsets = [0, 128], sizes = [16, 128], strides = [1, 1]} : vector<16x512xf32> to vector<16x128xf32>
    %cst_99 = arith.constant dense<0.000000e+00> : vector<16x128xf32>
    %160 = tpu.matmul %158, %159, %cst_99 {dimension_numbers = #tpu.dot_dimension_numbers<[1], [0], [0], [1], [0, 0, 1, 1], [], []>} : vector<16x16xf32>, vector<16x128xf32>, vector<16x128xf32> -> vector<16x128xf32>
    %161 = arith.addf %138, %160 : vector<16x128xf32>
    %162 = vector.extract_strided_slice %102 {offsets = [0, 256], sizes = [16, 128], strides = [1, 1]} : vector<16x512xf32> to vector<16x128xf32>
    %163 = vector.extract_strided_slice %107 {offsets = [0, 256], sizes = [16, 128], strides = [1, 1]} : vector<16x512xf32> to vector<16x128xf32>
    %cst_100 = arith.constant dense<0.000000e+00> : vector<16x16xf32>
    %164 = tpu.matmul %162, %163, %cst_100 {dimension_numbers = #tpu.dot_dimension_numbers<[1], [1], [0], [0], [0, 0, 1, 0], [], []>} : vector<16x128xf32>, vector<16x128xf32>, vector<16x16xf32> -> vector<16x16xf32>
    %cst_101 = arith.constant 0.0883883461 : f32
    %165 = vector.broadcast %cst_101 : f32 to vector<16x16xf32>
    %166 = arith.mulf %164, %165 : vector<16x16xf32>
    %cst_102 = arith.constant -1.000000e+30 : f32
    %167 = vector.broadcast %cst_102 : f32 to vector<16x16xf32>
    %168 = arith.select %114, %166, %167 : vector<16x16xi1>, vector<16x16xf32>
    %cst_103 = arith.constant dense<0xFF800000> : vector<16xf32>
    %169 = vector.multi_reduction <maximumf>, %168, %cst_103 [1] : vector<16x16xf32> to vector<16xf32>
    %170 = vector.shape_cast %169 : vector<16xf32> to vector<16x1xf32>
    %171 = vector.broadcast %170 : vector<16x1xf32> to vector<16x16xf32>
    %172 = arith.subf %168, %171 : vector<16x16xf32>
    %173 = math.exp %172 : vector<16x16xf32>
    %174 = arith.mulf %173, %0 : vector<16x16xf32>
    %cst_104 = arith.constant dense<0.000000e+00> : vector<16xf32>
    %175 = vector.multi_reduction <add>, %174, %cst_104 [1] : vector<16x16xf32> to vector<16xf32>
    %176 = vector.shape_cast %175 : vector<16xf32> to vector<16x1xf32>
    %cst_105 = arith.constant 9.99999968E-21 : f32
    %177 = vector.broadcast %cst_105 : f32 to vector<16x1xf32>
    %178 = arith.maximumf %176, %177 : vector<16x1xf32>
    %179 = tpu.reciprocal %178 {approx = true} : vector<16x1xf32> -> vector<16x1xf32>
    %180 = vector.broadcast %179 : vector<16x1xf32> to vector<16x16xf32>
    %181 = arith.mulf %174, %180 : vector<16x16xf32>
    %182 = vector.extract_strided_slice %112 {offsets = [0, 256], sizes = [16, 128], strides = [1, 1]} : vector<16x512xf32> to vector<16x128xf32>
    %cst_106 = arith.constant dense<0.000000e+00> : vector<16x128xf32>
    %183 = tpu.matmul %181, %182, %cst_106 {dimension_numbers = #tpu.dot_dimension_numbers<[1], [0], [0], [1], [0, 0, 1, 1], [], []>} : vector<16x16xf32>, vector<16x128xf32>, vector<16x128xf32> -> vector<16x128xf32>
    %184 = arith.addf %161, %183 : vector<16x128xf32>
    %185 = vector.extract_strided_slice %102 {offsets = [0, 384], sizes = [16, 128], strides = [1, 1]} : vector<16x512xf32> to vector<16x128xf32>
    %186 = vector.extract_strided_slice %107 {offsets = [0, 384], sizes = [16, 128], strides = [1, 1]} : vector<16x512xf32> to vector<16x128xf32>
    %cst_107 = arith.constant dense<0.000000e+00> : vector<16x16xf32>
    %187 = tpu.matmul %185, %186, %cst_107 {dimension_numbers = #tpu.dot_dimension_numbers<[1], [1], [0], [0], [0, 0, 1, 0], [], []>} : vector<16x128xf32>, vector<16x128xf32>, vector<16x16xf32> -> vector<16x16xf32>
    %cst_108 = arith.constant 0.0883883461 : f32
    %188 = vector.broadcast %cst_108 : f32 to vector<16x16xf32>
    %189 = arith.mulf %187, %188 : vector<16x16xf32>
    %cst_109 = arith.constant -1.000000e+30 : f32
    %190 = vector.broadcast %cst_109 : f32 to vector<16x16xf32>
    %191 = arith.select %114, %189, %190 : vector<16x16xi1>, vector<16x16xf32>
    %cst_110 = arith.constant dense<0xFF800000> : vector<16xf32>
    %192 = vector.multi_reduction <maximumf>, %191, %cst_110 [1] : vector<16x16xf32> to vector<16xf32>
    %193 = vector.shape_cast %192 : vector<16xf32> to vector<16x1xf32>
    %194 = vector.broadcast %193 : vector<16x1xf32> to vector<16x16xf32>
    %195 = arith.subf %191, %194 : vector<16x16xf32>
    %196 = math.exp %195 : vector<16x16xf32>
    %197 = arith.mulf %196, %0 : vector<16x16xf32>
    %cst_111 = arith.constant dense<0.000000e+00> : vector<16xf32>
    %198 = vector.multi_reduction <add>, %197, %cst_111 [1] : vector<16x16xf32> to vector<16xf32>
    %199 = vector.shape_cast %198 : vector<16xf32> to vector<16x1xf32>
    %cst_112 = arith.constant 9.99999968E-21 : f32
    %200 = vector.broadcast %cst_112 : f32 to vector<16x1xf32>
    %201 = arith.maximumf %199, %200 : vector<16x1xf32>
    %202 = tpu.reciprocal %201 {approx = true} : vector<16x1xf32> -> vector<16x1xf32>
    %203 = vector.broadcast %202 : vector<16x1xf32> to vector<16x16xf32>
    %204 = arith.mulf %197, %203 : vector<16x16xf32>
    %205 = vector.extract_strided_slice %112 {offsets = [0, 384], sizes = [16, 128], strides = [1, 1]} : vector<16x512xf32> to vector<16x128xf32>
    %cst_113 = arith.constant dense<0.000000e+00> : vector<16x128xf32>
    %206 = tpu.matmul %204, %205, %cst_113 {dimension_numbers = #tpu.dot_dimension_numbers<[1], [0], [0], [1], [0, 0, 1, 1], [], []>} : vector<16x16xf32>, vector<16x128xf32>, vector<16x128xf32> -> vector<16x128xf32>
    %207 = arith.addf %184, %206 : vector<16x128xf32>
    %cst_114 = arith.constant 2.500000e-01 : f32
    %208 = vector.broadcast %cst_114 : f32 to vector<16x128xf32>
    %209 = arith.mulf %207, %208 : vector<16x128xf32>
    %c0_115 = arith.constant 0 : index
    %c0_116 = arith.constant 0 : index
    %210 = vector.load %arg32[%c0_115, %c0_116] : memref<128x128xf32, #tpu.memory_space<vmem>>, vector<128x128xf32>
    %cst_117 = arith.constant dense<0.000000e+00> : vector<16x128xf32>
    %211 = tpu.matmul %97, %210, %cst_117 {dimension_numbers = #tpu.dot_dimension_numbers<[1], [0], [0], [1], [0, 0, 1, 1], [], []>} : vector<16x128xf32>, vector<128x128xf32>, vector<16x128xf32> -> vector<16x128xf32>
    %212 = arith.addf %209, %211 : vector<16x128xf32>
    %c0_118 = arith.constant 0 : index
    %c0_119 = arith.constant 0 : index
    %213 = vector.load %arg33[%c0_118, %c0_119] : memref<1x128xf32, #tpu.memory_space<vmem>>, vector<1x128xf32>
    %214 = vector.broadcast %213 : vector<1x128xf32> to vector<16x128xf32>
    %215 = arith.addf %212, %214 : vector<16x128xf32>
    %c0_120 = arith.constant 0 : index
    %c0_121 = arith.constant 0 : index
    %216 = vector.load %arg3[%c0_120, %c0_121] : memref<16x1xf32, #tpu.memory_space<vmem>>, vector<16x1xf32>
    %c0_122 = arith.constant 0 : index
    %c0_123 = arith.constant 0 : index
    %217 = vector.load %arg34[%c0_122, %c0_123] : memref<1x128xf32, #tpu.memory_space<vmem>>, vector<1x128xf32>
    %218 = vector.broadcast %217 : vector<1x128xf32> to vector<16x128xf32>
    %219 = arith.subf %218, %215 : vector<16x128xf32>
    %220 = arith.mulf %219, %219 : vector<16x128xf32>
    %cst_124 = arith.constant dense<0.000000e+00> : vector<16xf32>
    %221 = vector.multi_reduction <add>, %220, %cst_124 [1] : vector<16x128xf32> to vector<16xf32>
    %222 = vector.shape_cast %221 : vector<16xf32> to vector<16x1xf32>
    %cst_125 = arith.constant dense<0.000000e+00> : vector<1xf32>
    %223 = vector.multi_reduction <add>, %216, %cst_125 [0] : vector<16x1xf32> to vector<1xf32>
    %224 = vector.shape_cast %223 : vector<1xf32> to vector<1x1xf32>
    %225 = arith.mulf %216, %222 : vector<16x1xf32>
    %cst_126 = arith.constant dense<0.000000e+00> : vector<1xf32>
    %226 = vector.multi_reduction <add>, %225, %cst_126 [0] : vector<16x1xf32> to vector<1xf32>
    %227 = vector.shape_cast %226 : vector<1xf32> to vector<1x1xf32>
    %cst_127 = arith.constant 1.000000e+00 : f32
    %228 = vector.broadcast %cst_127 : f32 to vector<1x1xf32>
    %229 = arith.maximumf %224, %228 : vector<1x1xf32>
    %cst_128 = arith.constant 1.280000e+02 : f32
    %230 = vector.broadcast %cst_128 : f32 to vector<1x1xf32>
    %231 = arith.mulf %229, %230 : vector<1x1xf32>
    %232 = arith.divf %227, %231 : vector<1x1xf32>
    %c0_129 = arith.constant 0 : index
    %c0_130 = arith.constant 0 : index
    %233 = vector.load %arg39[%c0_129, %c0_130] : memref<1x1xf32, #tpu.memory_space<vmem>>, vector<1x1xf32>
    tpu.vector_store %arg39[%c0_129, %c0_130], %232 {strides = array<i32>} : memref<1x1xf32, #tpu.memory_space<vmem>>, vector<1x1xf32>,
    %234 = tpu.iota {dimensions = array<i32: 1>} : vector<4x16xi32>
    %c0_131 = arith.constant 0 : index
    %c0_132 = arith.constant 0 : index
    %235 = vector.load %arg1[%c0_131, %c0_132] : memref<4x1xi32, #tpu.memory_space<vmem>>, vector<4x1xi32>
    %236 = vector.broadcast %235 : vector<4x1xi32> to vector<4x16xi32>
    %237 = arith.cmpi eq, %234, %236 : vector<4x16xi32>
    %238 = arith.extui %237 : vector<4x16xi1> to vector<4x16xi32>
    %239 = arith.sitofp %238 : vector<4x16xi32> to vector<4x16xf32>
    %c0_133 = arith.constant 0 : index
    %c0_134 = arith.constant 0 : index
    %240 = vector.load %arg2[%c0_133, %c0_134] : memref<4x1xi32, #tpu.memory_space<vmem>>, vector<4x1xi32>
    %c8_i32 = arith.constant 8 : i32
    %241 = vector.broadcast %c8_i32 : i32 to vector<4x1xi32>
    %242 = arith.addi %240, %241 : vector<4x1xi32>
    %243 = vector.broadcast %242 : vector<4x1xi32> to vector<4x16xi32>
    %244 = arith.cmpi eq, %234, %243 : vector<4x16xi32>
    %245 = arith.extui %244 : vector<4x16xi1> to vector<4x16xi32>
    %246 = arith.sitofp %245 : vector<4x16xi32> to vector<4x16xf32>
    %cst_135 = arith.constant dense<0.000000e+00> : vector<4x128xf32>
    %247 = tpu.matmul %239, %215, %cst_135 {dimension_numbers = #tpu.dot_dimension_numbers<[1], [0], [0], [1], [0, 0, 1, 1], [], []>} : vector<4x16xf32>, vector<16x128xf32>, vector<4x128xf32> -> vector<4x128xf32>
    %cst_136 = arith.constant dense<0.000000e+00> : vector<4x128xf32>
    %248 = tpu.matmul %246, %215, %cst_136 {dimension_numbers = #tpu.dot_dimension_numbers<[1], [0], [0], [1], [0, 0, 1, 1], [], []>} : vector<4x16xf32>, vector<16x128xf32>, vector<4x128xf32> -> vector<4x128xf32>
    %c0_137 = arith.constant 0 : index
    %c0_138 = arith.constant 0 : index
    %249 = vector.load %arg35[%c0_137, %c0_138] : memref<128x2xf32, #tpu.memory_space<vmem>>, vector<128x2xf32>
    %cst_139 = arith.constant dense<0.000000e+00> : vector<4x2xf32>
    %250 = tpu.matmul %247, %249, %cst_139 {dimension_numbers = #tpu.dot_dimension_numbers<[1], [0], [0], [1], [0, 0, 1, 1], [], []>} : vector<4x128xf32>, vector<128x2xf32>, vector<4x2xf32> -> vector<4x2xf32>
    %c0_140 = arith.constant 0 : index
    %c0_141 = arith.constant 0 : index
    %251 = vector.load %arg36[%c0_140, %c0_141] : memref<128x2xf32, #tpu.memory_space<vmem>>, vector<128x2xf32>
    %cst_142 = arith.constant dense<0.000000e+00> : vector<4x2xf32>
    %252 = tpu.matmul %248, %251, %cst_142 {dimension_numbers = #tpu.dot_dimension_numbers<[1], [0], [0], [1], [0, 0, 1, 1], [], []>} : vector<4x128xf32>, vector<128x2xf32>, vector<4x2xf32> -> vector<4x2xf32>
    %253 = arith.addf %250, %252 : vector<4x2xf32>
    %c0_143 = arith.constant 0 : index
    %c0_144 = arith.constant 0 : index
    %254 = vector.load %arg37[%c0_143, %c0_144] : memref<1x2xf32, #tpu.memory_space<vmem>>, vector<1x2xf32>
    %255 = vector.broadcast %254 : vector<1x2xf32> to vector<4x2xf32>
    %256 = arith.addf %253, %255 : vector<4x2xf32>
    %257 = vector.extract_strided_slice %256 {offsets = [0, 1], sizes = [4, 1], strides = [1, 1]} : vector<4x2xf32> to vector<4x1xf32>
    %258 = arith.negf %257 : vector<4x1xf32>
    %259 = math.exp %258 : vector<4x1xf32>
    %cst_145 = arith.constant 1.000000e+00 : f32
    %260 = vector.broadcast %cst_145 : f32 to vector<4x1xf32>
    %261 = arith.addf %260, %259 : vector<4x1xf32>
    %262 = arith.divf %260, %261 : vector<4x1xf32>
    %cst_146 = arith.constant 1.000000e+00 : f32
    %263 = vector.broadcast %cst_146 : f32 to vector<4x1xf32>
    %264 = arith.subf %262, %263 : vector<4x1xf32>
    %265 = arith.mulf %264, %264 : vector<4x1xf32>
    %cst_147 = arith.constant dense<0.000000e+00> : vector<1xf32>
    %266 = vector.multi_reduction <add>, %265, %cst_147 [0] : vector<4x1xf32> to vector<1xf32>
    %267 = vector.shape_cast %266 : vector<1xf32> to vector<1x1xf32>
    %cst_148 = arith.constant 4.000000e+00 : f32
    %268 = vector.broadcast %cst_148 : f32 to vector<1x1xf32>
    %269 = arith.divf %267, %268 : vector<1x1xf32>
    %c0_149 = arith.constant 0 : index
    %c0_150 = arith.constant 0 : index
    %270 = vector.load %arg40[%c0_149, %c0_150] : memref<1x1xf32, #tpu.memory_space<vmem>>, vector<1x1xf32>
    tpu.vector_store %arg40[%c0_149, %c0_150], %269 {strides = array<i32>} : memref<1x1xf32, #tpu.memory_space<vmem>>, vector<1x1xf32>,
    %271 = vector.extract_strided_slice %256 {offsets = [0, 0], sizes = [4, 1], strides = [1, 1]} : vector<4x2xf32> to vector<4x1xf32>
    %272 = arith.negf %271 : vector<4x1xf32>
    %273 = math.exp %272 : vector<4x1xf32>
    %cst_151 = arith.constant 1.000000e+00 : f32
    %274 = vector.broadcast %cst_151 : f32 to vector<4x1xf32>
    %275 = arith.addf %274, %273 : vector<4x1xf32>
    %276 = arith.divf %274, %275 : vector<4x1xf32>
    %cst_152 = arith.constant 4.000000e+00 : f32
    %277 = vector.broadcast %cst_152 : f32 to vector<4x1xf32>
    %278 = arith.mulf %276, %277 : vector<4x1xf32>
    %cst_153 = arith.constant 1.000000e+00 : f32
    %279 = vector.broadcast %cst_153 : f32 to vector<4x1xf32>
    %280 = arith.addf %278, %279 : vector<4x1xf32>
    %c0_154 = arith.constant 0 : index
    %c0_155 = arith.constant 0 : index
    %281 = vector.load %arg38[%c0_154, %c0_155] : memref<4x1xf32, #tpu.memory_space<vmem>>, vector<4x1xf32>
    tpu.vector_store %arg38[%c0_154, %c0_155], %280 {strides = array<i32>} : memref<4x1xf32, #tpu.memory_space<vmem>>, vector<4x1xf32>,
    return
  }
}

</mosaic_0001>

<bundles_post_ra>
// kernel: gformer_forward.1
= control target key start
LH: loop header
LB: loop body
LE: loop exit
PB: predicated region body
PF: predicated region fallthrough
CT: control target
= control target key end

     0   :  { %s4918_s6 = smov 1   ;;  %s4919_s10 = smov 2   ;;  %s5853_s0 = inlined_call_operand.smem [shape: u32[41], index: -1, kind: input, shape index: {}] }
   0x1   :  { %s4973_s5 = sld [smem:[%s5853_s0]]   ;;  %s4920_s14 = smov 3  }
   0x2   :  { %s4978_s9 = sld [smem:[%s5853_s0 + %s4918_s6]]   ;;  %s4921_s18 = smov 4  }
   0x3   :  { %s4983_s13 = sld [smem:[%s5853_s0 + %s4919_s10]]   ;;  %s4922_s22 = smov 5  }
   0x4   :  { %s4988_s17 = sld [smem:[%s5853_s0 + %s4920_s14]]   ;;  %s4923_s26 = smov 6  }
   0x5   :  { %s4993_s21 = sld [smem:[%s5853_s0 + %s4921_s18]]   ;;  %s4924_s30 = smov 7  }
   0x6   :  { %s4998_s25 = sld [smem:[%s5853_s0 + %s4922_s22]]   ;;  %s4925_s4 = smov 8  }
   0x7   :  { %5866 = sst [smem:[#allocation9_spill]] %s4973_s5  ;;  %s4926_s10 = smov 9  }
   0x8   :  { %5867 = sst [smem:[#allocation10_spill]] %s4978_s9  ;;  %s4927_s15 = smov 10  }
   0x9   :  { %5868 = sst [smem:[#allocation11_spill]] %s4983_s13  ;;  %s4928_s20 = smov 11  }
   0xa   :  { %5869 = sst [smem:[#allocation12_spill]] %s4988_s17  ;;  %s4930_s1 = smov 13  }
   0xb   :  { %s5003_s29 = sld [smem:[%s5853_s0 + %s4923_s26]]   ;;  %s4929_s26 = smov 12  }
   0xc   :  { %s5008_s3 = sld [smem:[%s5853_s0 + %s4924_s30]]   ;;  %s4931_s7 = smov 14  }
   0xd   :  { %s5013_s8 = sld [smem:[%s5853_s0 + %s4925_s4]]   ;;  %s4933_s22 = smov 16  }
   0xe   :  { %s5018_s14 = sld [smem:[%s5853_s0 + %s4926_s10]]   ;;  %s4934_s28 = smov 17  }
   0xf   :  { %s5023_s19 = sld [smem:[%s5853_s0 + %s4927_s15]]   ;;  %s4932_s15 = smov 15  }
  0x10   :  { %s5028_s24 = sld [smem:[%s5853_s0 + %s4928_s20]]  }
  0x11   :  { %s5033_s30 = sld [smem:[%s5853_s0 + %s4929_s26]]  }
  0x12   :  { %5870 = sst [smem:[#allocation13_spill]] %s5008_s3 }
  0x13   :  { %s5038_s6 = sld [smem:[%s5853_s0 + %s4930_s1]]  }
  0x14   :  { %s5043_s12 = sld [smem:[%s5853_s0 + %s4931_s7]]   ;;  %s4935_s7 = smov 18  }
  0x15   :  { %s5048_s20 = sld [smem:[%s5853_s0 + %s4932_s15]]   ;;  %s4936_s15 = smov 19  }
  0x16   :  { %s5053_s27 = sld [smem:[%s5853_s0 + %s4933_s22]]   ;;  %s4937_s22 = smov 20  }
  0x17   :  { %s5058_s4 = sld [smem:[%s5853_s0 + %s4934_s28]]   ;;  %s4938_s28 = smov 21  }
  0x18   :  { %s5063_s17 = sld [smem:[%s5853_s0 + %s4935_s7]]   ;;  %s4939_s7 = smov 22  }
  0x19   :  { %s5068_s13 = sld [smem:[%s5853_s0 + %s4936_s15]]   ;;  %s4940_s15 = smov 23  }
  0x1a   :  { %s5073_s9 = sld [smem:[%s5853_s0 + %s4937_s22]]   ;;  %s4941_s22 = smov 24  }
  0x1b   :  { %s5078_s5 = sld [smem:[%s5853_s0 + %s4938_s28]]   ;;  %s4942_s28 = smov 25  }
  0x1c   :  { %s5083_s3 = sld [smem:[%s5853_s0 + %s4939_s7]]   ;;  %s4943_s7 = smov 26  }
  0x1f   :  { %5871 = sst [smem:[#allocation14_spill]] %s5068_s13 }
  0x20   :  { %5872 = sst [smem:[#allocation15_spill]] %s5073_s9 }
  0x21   :  { %5873 = sst [smem:[#allocation16_spill]] %s5078_s5 }
  0x22   :  { %5874 = sst [smem:[#allocation17_spill]] %s5083_s3 }
  0x23   :  { %s5088_s13 = sld [smem:[%s5853_s0 + %s4940_s15]]   ;;  %s4944_s15 = smov 27  }
  0x24   :  { %s5093_s9 = sld [smem:[%s5853_s0 + %s4941_s22]]   ;;  %s4945_s22 = smov 28  }
  0x25   :  { %s5098_s5 = sld [smem:[%s5853_s0 + %s4942_s28]]   ;;  %s4946_s28 = smov 29  }
  0x26   :  { %s5103_s3 = sld [smem:[%s5853_s0 + %s4943_s7]]   ;;  %s4947_s7 = smov 30  }
  0x29   :  { %5875 = sst [smem:[#allocation18_spill]] %s5088_s13 }
  0x2a   :  { %5876 = sst [smem:[#allocation19_spill]] %s5093_s9 }
  0x2b   :  { %5877 = sst [smem:[#allocation20_spill]] %s5098_s5 }
  0x2c   :  { %5878 = sst [smem:[#allocation21_spill]] %s5103_s3 }
  0x2d   :  { %s5108_s13 = sld [smem:[%s5853_s0 + %s4944_s15]]   ;;  %s4948_s15 = smov 31  }
  0x2e   :  { %s5113_s9 = sld [smem:[%s5853_s0 + %s4945_s22]]   ;;  %s4949_s22 = smov 32  }
  0x2f   :  { %s5118_s5 = sld [smem:[%s5853_s0 + %s4946_s28]]   ;;  %s4950_s28 = smov 33  }
  0x30   :  { %s5123_s3 = sld [smem:[%s5853_s0 + %s4947_s7]]   ;;  %s4951_s7 = smov 34  }
  0x33   :  { %5879 = sst [smem:[#allocation22_spill]] %s5108_s13 }
  0x34   :  { %5880 = sst [smem:[#allocation23_spill]] %s5113_s9 }
  0x35   :  { %5881 = sst [smem:[#allocation24_spill]] %s5118_s5 }
  0x36   :  { %5882 = sst [smem:[#allocation25_spill]] %s5123_s3 }
  0x37   :  { %s5128_s13 = sld [smem:[%s5853_s0 + %s4948_s15]]   ;;  %s4952_s15 = smov 35  }
  0x38   :  { %s5133_s9 = sld [smem:[%s5853_s0 + %s4949_s22]]   ;;  %s4953_s22 = smov 36  }
  0x39   :  { %s5138_s5 = sld [smem:[%s5853_s0 + %s4950_s28]]   ;;  %s4954_s28 = smov 37  }
  0x3a   :  { %s5143_s3 = sld [smem:[%s5853_s0 + %s4951_s7]]   ;;  %s4955_s7 = smov 38  }
  0x3d   :  { %5883 = sst [smem:[#allocation26_spill]] %s5128_s13 }
  0x3e   :  { %5884 = sst [smem:[#allocation27_spill]] %s5133_s9 }
  0x3f   :  { %5885 = sst [smem:[#allocation28_spill]] %s5138_s5 }
  0x40   :  { %5886 = sst [smem:[#allocation29_spill]] %s5143_s3 }
  0x41   :  { %s5148_s13 = sld [smem:[%s5853_s0 + %s4952_s15]]   ;;  %s4956_s15 = smov 39  }
  0x42   :  { %s5153_s9 = sld [smem:[%s5853_s0 + %s4953_s22]]   ;;  %s4957_s22 = smov 40  }
  0x43   :  { %s5158_s5 = sld [smem:[%s5853_s0 + %s4954_s28]]  }
  0x44   :  { %s5163_s3 = sld [smem:[%s5853_s0 + %s4955_s7]]  }
  0x47   :  { %5887 = sst [smem:[#allocation30_spill]] %s5148_s13 }
  0x48   :  { %5888 = sst [smem:[#allocation31_spill]] %s5153_s9 }
  0x49   :  { %s5168_s13 = sld [smem:[%s5853_s0 + %s4956_s15]]  }
  0x4a   :  { %s5173_s9 = sld [smem:[%s5853_s0 + %s4957_s22]]  }
  0x4b   :  { %87 = vsyncpa [#allocation4], 0  ;;  %v168_v0 = vld [vmem:[%s5003_s29] sm:$0xff]  ;;  %v169_v1 = vld [vmem:[%s5003_s29 + $0x8] sm:$0xff]  ;;  %v4958_v3 = vmov 0.0|0.0   ;;  %vm4959_vm0 = vmmov 0  }
  0x4c   :  { %v170_v2 = vld [vmem:[%s5003_s29 + $0x10] sm:$0xff]  ;;  %4233 = vmatprep.subr.bf16.mxu1 %v4958_v3  ;;  %v4234_v4 = vpack.c.bf16 %v169_v1, %v168_v0  ;;  %v171_v5 = vld [vmem:[%s5003_s29 + $0x18] sm:$0xff]  ;;  %v4960_v6 = vmov 0.0   ;;  %v254_v8 = vld [vmem:[%s5013_s8] sm:$0xff]  ;;  %vm179_vm1 = vcmask 261120  }
  0x4d   :  { %3754 = vmatprep.mubr.msk.f32.mxu1 %vm4959_vm0, %v4960_v6  ;;  %v4237_v7 = vpack.c.bf16 %v171_v5, %v170_v2  ;;  %v255_v9 = vld [vmem:[%s5013_s8 + $0x8] sm:$0xff]  ;;  %v542_v10 = vld [vmem:[%s5048_s20] sm:$0xff]  ;;  %v256_v13 = vld [vmem:[%s5013_s8 + $0x10] sm:$0xff] }
  0x4e   :  { %4235 = vmatpush3.bf16.msra.mxu1 %v4234_v4  ;;  %v167_v11 = vld [vmem:[%s4993_s21] sm:$0xff]  ;;  %v4240_v12 = vpack.c.bf16 %v255_v9, %v254_v8  ;;  %v543_v14 = vld [vmem:[%s5048_s20 + $0x8] sm:$0xff]  ;;  %v257_v15 = vld [vmem:[%s5013_s8 + $0x18] sm:$0xff] }
  0x4f   :  { %4236 = vmatprep.subr.bf16.mxu1 %v4958_v3  ;;  %v4273_v16 = vpack.c.bf16 %v543_v14, %v542_v10  ;;  %v544_v17 = vld [vmem:[%s5048_s20 + $0x10] sm:$0xff]  ;;  %v545_v18 = vld [vmem:[%s5048_s20 + $0x18] sm:$0xff]  ;;  %v342_v19 = vld [vmem:[%s5028_s24] sm:$0xff]  ;;  %v4243_v24 = vpack.c.bf16 %v257_v15, %v256_v13 }
  0x50   :  { %v343_v20 = vld [vmem:[%s5028_s24 + $0x8] sm:$0xff]  ;;  %v4277_v21 = vpack.c.bf16 %v545_v18, %v544_v17  ;;  %v546_v22 = vld [vmem:[%s5048_s20 + $0x20] sm:$0xff] }
  0x51   :  { %4274 = vmatprep.subr.bf16.mxu0 %v4273_v16  ;;  %v547_v23 = vld [vmem:[%s5048_s20 + $0x28] sm:$0xff]  ;;  %v4245_v25 = vpack.c.bf16 %v343_v20, %v342_v19 }
  0x52   :  { %4238 = vmatpush3.bf16.msra.mxu1 %v4237_v7  ;;  %4276 = vmatpush3.bf16.msra.mxu0 %v4273_v16 }
  0x53   :  { %4239 = vmatprep.subr.bf16.mxu1 %v4958_v3 }
  0x55   :  { %3755 = vmatmul.mubr.msk.f32.vlgmr.msra.gmra.mrb[0].mxu1 %vm179_vm1, %v167_v11 }
  0x56   :  { %4241 = vmatpush3.bf16.msra.mxu1 %v4240_v12  ;;  %3765 = vmatprep.mubr.msk.f32.mxu1 %vm4959_vm0, %v4960_v6 }
  0x57   :  { %4242 = vmatprep.subr.bf16.mxu1 %v4958_v3 }
  0x58   :  { %88 = vsyncpa [#allocation6], 0  ;;  %4278 = vmatprep.subr.bf16.mxu0 %v4277_v21  ;;  %v4281_v26 = vpack.c.bf16 %v547_v23, %v546_v22  ;;  %v548_v27 = vld [vmem:[%s5048_s20 + $0x30] sm:$0xff]  ;;  %v549_v28 = vld [vmem:[%s5048_s20 + $0x38] sm:$0xff]  ;;  %vm351_vm2 = vcmask 130048   ;;  %s5889_s0 = sld [smem:[#allocation14_spill]] }
  0x59   :  { %v253_v29 = vld [vmem:[%s4998_s25] sm:$0xff]  ;;  %v450_v32 = vld [vmem:[%s5038_s6 + $0x8] sm:$0xff]  ;;  %4280 = vmatpush3.bf16.msra.mxu0 %v4277_v21  ;;  %v4285_v33 = vpack.c.bf16 %v549_v28, %v548_v27  ;;  %v340_v36 = vld [vmem:[%s5023_s19 + $0x10] sm:$0xff]  ;;  %s5891_s21 = sld [smem:[#allocation16_spill]]  ;;  %s5892_s25 = sld [smem:[#allocation19_spill]]  ;;  %vm2996_vm12 = vcmask 7168  }
  0x5a   :  { %4244 = vmatpush3.bf16.msra.mxu1 %v4243_v24  ;;  %v338_v30 = vld [vmem:[%s5023_s19] sm:$0xff]  ;;  %4282 = vmatprep.subr.bf16.mxu0 %v4281_v26  ;;  %v339_v34 = vld [vmem:[%s5023_s19 + $0x8] sm:$0xff]  ;;  %v451_v37 = vld [vmem:[%s5038_s6 + $0x10] sm:$0xff]  ;;  %s5893_s29 = sld [smem:[#allocation15_spill]]  ;;  %s5894_s8 = sld [smem:[#allocation13_spill]]  ;;  %vm3021_vm13 = vcmask 0  }
  0x5b   :  { %4246 = vmatprep.subr.bf16.mxu1 %v4245_v25  ;;  %v449_v31 = vld [vmem:[%s5038_s6] sm:$0xff]  ;;  %v452_v38 = vld [vmem:[%s5038_s6 + $0x18] sm:$0xff]  ;;  %v454_v42 = vld [vmem:[%s5038_s6 + $0x28] sm:$0xff]  ;;  %s5897_s24 = sld [smem:[#allocation21_spill]]  ;;  %s5904_s28 = sld [smem:[#allocation10_spill]]  ;;  %vm3389_vm14 = vcmask 3072  }
  0x5c   :  { %v4250_v35 = vpack.c.bf16 %v450_v32, %v449_v31  ;;  %v341_v39 = vld [vmem:[%s5023_s19 + $0x18] sm:$0xff]  ;;  %v4253_v40 = vpack.c.bf16 %v452_v38, %v451_v37  ;;  %v453_v41 = vld [vmem:[%s5038_s6 + $0x20] sm:$0xff]  ;;  %v455_v44 = vld [vmem:[%s5038_s6 + $0x30] sm:$0xff]  ;;  %s5896_s19 = sld [smem:[#allocation18_spill]]  ;;  %s5905_s1 = sld [smem:[#allocation11_spill]]  ;;  %vm3372_vm15 = vcmask 11272  }
  0x5d   :  { %3766 = vmatmul.mubr.msk.f32.vlgmr.msra.gmra.mrb[2].mxu1 %vm179_vm1, %v253_v29  ;;  %4284 = vmatpush3.bf16.msra.mxu0 %v4281_v26  ;;  %v4256_v43 = vpack.c.bf16 %v454_v42, %v453_v41  ;;  %v456_v45 = vld [vmem:[%s5038_s6 + $0x38] sm:$0xff]  ;;  %v457_v47 = vld [vmem:[%s5038_s6 + $0x40] sm:$0xff]  ;;  %v458_v48 = vld [vmem:[%s5038_s6 + $0x48] sm:$0xff]  ;;  %s5906_s2 = sld [smem:[#allocation27_spill]]  ;;  %s5907_s7 = sld [smem:[#allocation28_spill]] }
  0x5e   :  { %4248 = vmatpush3.bf16.msra.mxu1 %v4245_v25  ;;  %3772 = vmatprep.mubr.msk.f32.mxu1 %vm351_vm2, %v338_v30  ;;  %v4259_v46 = vpack.c.bf16 %v456_v45, %v455_v44  ;;  %v4262_v49 = vpack.c.bf16 %v458_v48, %v457_v47  ;;  %v459_v50 = vld [vmem:[%s5038_s6 + $0x50] sm:$0xff]  ;;  %v460_v51 = vld [vmem:[%s5038_s6 + $0x58] sm:$0xff]  ;;  %v550_v53 = vld [vmem:[%s5048_s20 + $0x40] sm:$0xff]  ;;  %s5908_s10 = sld [smem:[#allocation29_spill]]  ;;  %s5909_s11 = sld [smem:[#allocation30_spill]] }
  0x5f   :  { %4249 = vmatprep.subr.bf16.mxu1 %v4958_v3  ;;  %4286 = vmatprep.subr.bf16.mxu0 %v4285_v33  ;;  %v4265_v52 = vpack.c.bf16 %v460_v51, %v459_v50  ;;  %v551_v54 = vld [vmem:[%s5048_s20 + $0x48] sm:$0xff]  ;;  %v461_v56 = vld [vmem:[%s5038_s6 + $0x60] sm:$0xff]  ;;  %v552_v59 = vld [vmem:[%s5048_s20 + $0x50] sm:$0xff]  ;;  %s5910_s15 = sld [smem:[#allocation31_spill]]  ;;  %s5911_s16 = sld [smem:[#allocation12_spill]] }
  0x60   :  { %v4289_v55 = vpack.c.bf16 %v551_v54, %v550_v53  ;;  %v462_v57 = vld [vmem:[%s5038_s6 + $0x68] sm:$0xff]  ;;  %v553_v60 = vld [vmem:[%s5048_s20 + $0x58] sm:$0xff]  ;;  %v463_v61 = vld [vmem:[%s5038_s6 + $0x70] sm:$0xff] }
  0x61   :  { %3773 = vmatmul.mubr.msk.f32.vlgmr.msra.gmra.mrb[4].mxu1 %vm351_vm2, %v339_v34  ;;  %4288 = vmatpush3.bf16.msra.mxu0 %v4285_v33  ;;  %v4268_v58 = vpack.c.bf16 %v462_v57, %v461_v56  ;;  %v4293_v62 = vpack.c.bf16 %v553_v60, %v552_v59  ;;  %v464_v63 = vld [vmem:[%s5038_s6 + $0x78] sm:$0xff]  ;;  %v554_v1 = vld [vmem:[%s5048_s20 + $0x60] sm:$0xff]  ;;  %v555_v2 = vld [vmem:[%s5048_s20 + $0x68] sm:$0xff]  ;;  %s5899_s6 = sld [smem:[#allocation20_spill]] }
  0x62   :  { %3775 = vmatprep.mubr.msk.f32.mxu1 %vm351_vm2, %v340_v36  ;;  %4251 = vmatpush3.bf16.msra.mxu1 %v4250_v35  ;;  %v4271_v0 = vpack.c.bf16 %v464_v63, %v463_v61  ;;  %v4297_v4 = vpack.c.bf16 %v555_v2, %v554_v1  ;;  %v650_v5 = vld [vmem:[%s5058_s4] sm:$0xff]  ;;  %v651_v7 = vld [vmem:[%s5058_s4 + $0x8] sm:$0xff]  ;;  %v556_v9 = vld [vmem:[%s5048_s20 + $0x70] sm:$0xff] }
  0x63   :  { %4252 = vmatprep.subr.bf16.mxu1 %v4958_v3  ;;  %4290 = vmatprep.subr.bf16.mxu0 %v4289_v55  ;;  %v4305_v8 = vpack.c.bf16 %v651_v7, %v650_v5  ;;  %v557_v10 = vld [vmem:[%s5048_s20 + $0x78] sm:$0xff]  ;;  %v3465_v14 = vld [vmem:[%s5018_s14] ss:$0 sm:$0xff]  ;;  %v652_v15 = vld [vmem:[%s5058_s4 + $0x10] sm:$0xff]  ;;  %s5895_s14 = sld [smem:[#allocation9_spill]]  ;;  %s5901_s20 = sld [smem:[#allocation26_spill]] }
  0x64   :  { %v4301_v11 = vpack.c.bf16 %v557_v10, %v556_v9  ;;  %v653_v16 = vld [vmem:[%s5058_s4 + $0x18] sm:$0xff]  ;;  %v3467_v21 = vld [vmem:[%s5033_s30] ss:$0 sm:$0xff]  ;;  %v655_v23 = vld [vmem:[%s5058_s4 + $0x28] sm:$0xff]  ;;  %s5898_s30 = sld [smem:[#allocation23_spill]] }
  0x65   :  { %3776 = vmatmul.mubr.msk.f32.gmra.mrb[6].mxu1 %vm351_vm2, %v341_v39  ;;  %4292 = vmatpush3.bf16.msra.mxu0 %v4289_v55  ;;  %v4309_v20 = vpack.c.bf16 %v653_v16, %v652_v15  ;;  %v654_v22 = vld [vmem:[%s5058_s4 + $0x20] sm:$0xff]  ;;  %v656_v28 = vld [vmem:[%s5058_s4 + $0x30] sm:$0xff]  ;;  %v657_v29 = vld [vmem:[%s5058_s4 + $0x38] sm:$0xff] }
  0x66   :  { %4254 = vmatpush3.bf16.msra.mxu1 %v4253_v40  ;;  %3810 = vmatprep.mubr.msk.f32.mxu1 %vm4959_vm0, %v4960_v6  ;;  %v4313_v27 = vpack.c.bf16 %v655_v23, %v654_v22  ;;  %v4317_v34 = vpack.c.bf16 %v657_v29, %v656_v28  ;;  %v658_v36 = vld [vmem:[%s5058_s4 + $0x40] sm:$0xff]  ;;  %v659_v37 = vld [vmem:[%s5058_s4 + $0x48] sm:$0xff]  ;;  %v660_v39 = vld [vmem:[%s5058_s4 + $0x50] sm:$0xff] }
  0x67   :  { %4255 = vmatprep.subr.bf16.mxu1 %v4958_v3  ;;  %4294 = vmatprep.subr.bf16.mxu0 %v4293_v62  ;;  %v4321_v38 = vpack.c.bf16 %v659_v37, %v658_v36  ;;  %v661_v40 = vld [vmem:[%s5058_s4 + $0x58] sm:$0xff]  ;;  %v662_v42 = vld [vmem:[%s5058_s4 + $0x60] sm:$0xff]  ;;  %v664_v45 = vld [vmem:[%s5058_s4 + $0x70] sm:$0xff] }
  0x68   :  { %v4325_v41 = vpack.c.bf16 %v661_v40, %v660_v39  ;;  %v3473_v50 = vld [vmem:[%s5053_s27] ss:$0 sm:$0xff]  ;;  %v926_v36 = vld [vmem:[%s5889_s0 + $0x10] sm:$0xff]  ;;  %v927_v37 = vld [vmem:[%s5889_s0 + $0x18] sm:$0xff]  ;;  %s5902_s27 = sld [smem:[#allocation22_spill]] }
  0x69   :  { %4296 = vmatpush3.bf16.msra.mxu0 %v4293_v62  ;;  %v3472_v61 = vld [vmem:[%s5043_s12] ss:$0 sm:$0xff]  ;;  %v929_v40 = vld [vmem:[%s5889_s0 + $0x28] sm:$0xff]  ;;  %s5900_s12 = sld [smem:[#allocation25_spill]] }
  0x6a   :  { %4257 = vmatpush3.bf16.msra.mxu1 %v4256_v43  ;;  %4298 = vmatprep.subr.bf16.mxu0 %v4297_v4  ;;  %v663_v43 = vld [vmem:[%s5058_s4 + $0x68] sm:$0xff]  ;;  %v3474_v63 = vld [vmem:[%s5063_s17] ss:$0 sm:$0xff]  ;;  %s5890_s17 = sld [smem:[#allocation17_spill]] }
  0x6b   :  { %4258 = vmatprep.subr.bf16.mxu1 %v4958_v3  ;;  %v4329_v44 = vpack.c.bf16 %v663_v43, %v662_v42  ;;  %v928_v39 = vld [vmem:[%s5889_s0 + $0x20] sm:$0xff]  ;;  %v930_v42 = vld [vmem:[%s5889_s0 + $0x30] sm:$0xff]  ;;  %v931_v43 = vld [vmem:[%s5889_s0 + $0x38] sm:$0xff] }
  0x6d   :  { %4300 = vmatpush3.bf16.msra.mxu0 %v4297_v4 }
  0x6e   :  { %4260 = vmatpush3.bf16.msra.mxu1 %v4259_v46  ;;  %4302 = vmatprep.subr.bf16.mxu0 %v4301_v11  ;;  %v665_v46 = vld [vmem:[%s5058_s4 + $0x78] sm:$0xff]  ;;  %s5903_s4 = sld [smem:[#allocation24_spill]] }
  0x6f   :  { %4261 = vmatprep.subr.bf16.mxu1 %v4958_v3  ;;  %v4333_v47 = vpack.c.bf16 %v665_v46, %v664_v45  ;;  %v932_v45 = vld [vmem:[%s5889_s0 + $0x40] sm:$0xff]  ;;  %v933_v46 = vld [vmem:[%s5889_s0 + $0x48] sm:$0xff] }
  0x71   :  { %4304 = vmatpush3.bf16.msra.mxu0 %v4301_v11 }
  0x72   :  { %4263 = vmatpush3.bf16.msra.mxu1 %v4262_v49  ;;  %4337 = vmatprep.subr.bf16.mxu0 %v4958_v3 }
  0x73   :  { %4264 = vmatprep.subr.bf16.mxu1 %v4958_v3 }
  0x76   :  { %4266 = vmatpush3.bf16.msra.mxu1 %v4265_v52 }
  0x77   :  { %4267 = vmatprep.subr.bf16.mxu1 %v4958_v3 }
  0x7a   :  { %4269 = vmatpush3.bf16.msra.mxu1 %v4268_v58 }
  0x7b   :  { %4270 = vmatprep.subr.bf16.mxu1 %v4958_v3 }
  0x7e   :  { %4272 = vmatpush3.bf16.msra.mxu1 %v4271_v0 }
  0x7f   :  { %4306 = vmatprep.subr.bf16.mxu1 %v4305_v8 }
 0x128   :  { %v5250_v12 = vpop.f32.mrb[0].mxu1 }
 0x129   :  { %v3756_v13 = vpop.f32.mrb[1].mxu1 }
 0x12a   :  { %v829_v13 = vlaneseq }
 0x12c   :  { %v5288_v16 = vand.u32 127, %v829_v13 }
 0x130   :  { %v334_v17 = vpop.f32.mrb[2].mxu1 }
 0x131   :  { %v5255_v18 = vadd.f32 %v3465_v14, %v334_v17  ;;  %v3767_v19 = vpop.f32.mrb[3].mxu1  ;;  %v5285_v14 = vshrl.u32 %v829_v13, 7 }
 0x133   :  { %3811 = vmatmul.mubr.f32.vlgmr.msra.gmra.mrb[8].mxu1 %v5255_v18  ;;  %v835_v15 = vadd.s32 1, %v5285_v14  ;;  %v833_v17 = vmul.u32 4, %v5285_v14  ;;  %vm1202_vm6 = vcmp.eq.s32.totalorder %v5285_v14, %v5288_v16 }
 0x134   :  { %4308 = vmatpush3.bf16.msra.mxu1 %v4305_v8  ;;  %v3774_v24 = vpop.f32.mrb[4].mxu1 }
 0x135   :  { %v430_v25 = vpop.f32.mrb[5].mxu1  ;;  %4310 = vmatprep.subr.bf16.mxu1 %v4309_v20  ;;  %v436_v30 = vadd.f32 %v3774_v24, %v3467_v21  ;;  %v836_v19 = vmul.u32 4, %v835_v15  ;;  %vm834_vm3 = vcmp.ge.s32.totalorder %v5288_v16, %v833_v17  ;;  %v1045_v15 = vld [vmem:[%s5890_s17 + $0x60] sm:$0xff]  ;;  %v1046_v17 = vld [vmem:[%s5890_s17 + $0x68] sm:$0xff] }
 0x136   :  { %v431_v26 = vadd.f32 %v3467_v21, %v430_v25 }
 0x137   :  { %vm837_vm4 = vcmp.lt.s32.totalorder %v5288_v16, %v836_v19  ;;  %v4392_v19 = vpack.c.bf16 %v1046_v17, %v1045_v15  ;;  %v1234_v17 = vld [vmem:[%s5892_s25 + $0x70] sm:$0xff] }
 0x138   :  { %4312 = vmatpush3.bf16.msra.mxu1 %v4309_v20  ;;  %3845 = vmatprep.mubr.f32.mxu0 %v431_v26  ;;  %v3777_v31 = vpop.f32.mrb[6].mxu1  ;;  %vm838_vm5 = vmand %vm834_vm3, %vm837_vm4 }
 0x139   :  { %3883 = vmatprep.mubr.f32.mxu1 %v431_v26  ;;  %v446_v32 = vadd.f32 %v3777_v31, %v3467_v21  ;;  %3846 = vmatmul.mubr.f32.vlgmr.msra.gmra.mrb[0].mxu0 %v436_v30  ;;  %v440_v33 = vpop.f32.mrb[7].mxu1  ;;  %v924_v31 = vld [vmem:[%s5889_s0] sm:$0xff] }
 0x13a   :  { %v441_v35 = vadd.f32 %v3467_v21, %v440_v33  ;;  %4314 = vmatprep.subr.bf16.mxu1 %v4313_v27 }
 0x13c   :  { %4316 = vmatpush3.bf16.msra.mxu1 %v4313_v27  ;;  %3848 = vmatprep.mubr.f32.mxu0 %v441_v35 }
 0x13d   :  { %3849 = vmatmul.mubr.f32.gmra.mrb[2].mxu0 %v446_v32  ;;  %4318 = vmatprep.subr.bf16.mxu1 %v4317_v34 }
 0x13e   :  { %3897 = vmatprep.mubr.msk.f32.mxu0 %vm4959_vm0, %v4960_v6 }
 0x140   :  { %4320 = vmatpush3.bf16.msra.mxu1 %v4317_v34 }
 0x141   :  { %4322 = vmatprep.subr.bf16.mxu1 %v4321_v38 }
 0x144   :  { %4324 = vmatpush3.bf16.msra.mxu1 %v4321_v38  ;;  %v4353_v38 = vpack.c.bf16 %v927_v37, %v926_v36  ;;  %v1027_v37 = vld [vmem:[%s5891_s21 + $0x50] sm:$0xff] }
 0x145   :  { %4326 = vmatprep.subr.bf16.mxu1 %v4325_v41 }
 0x148   :  { %4328 = vmatpush3.bf16.msra.mxu1 %v4325_v41  ;;  %v4356_v41 = vpack.c.bf16 %v929_v40, %v928_v39  ;;  %v1029_v40 = vld [vmem:[%s5891_s21 + $0x60] sm:$0xff] }
 0x149   :  { %4330 = vmatprep.subr.bf16.mxu1 %v4329_v44 }
 0x14c   :  { %4332 = vmatpush3.bf16.msra.mxu1 %v4329_v44  ;;  %v4359_v44 = vpack.c.bf16 %v931_v43, %v930_v42  ;;  %v1031_v43 = vld [vmem:[%s5891_s21 + $0x70] sm:$0xff] }
 0x14d   :  { %4334 = vmatprep.subr.bf16.mxu1 %v4333_v47 }
 0x150   :  { %4336 = vmatpush3.bf16.msra.mxu1 %v4333_v47  ;;  %v4362_v47 = vpack.c.bf16 %v933_v46, %v932_v45  ;;  %v1047_v46 = vld [vmem:[%s5890_s17 + $0x70] sm:$0xff] }
 0x151   :  { %4373 = vmatprep.subr.bf16.mxu1 %v4958_v3 }
 0x153   :  { %3884 = vmatmul.mubr.f32.vlgmr.msra.gmra.mrb[10].mxu1 %v436_v30 }
 0x154   :  { %3886 = vmatprep.mubr.f32.mxu1 %v441_v35 }
 0x157   :  { %3887 = vmatmul.mubr.f32.gmra.mrb[12].mxu1 %v446_v32  ;;  %v925_v32 = vld [vmem:[%s5889_s0 + $0x8] sm:$0xff] }
 0x158   :  { %3978 = vmatprep.mubr.msk.f32.mxu1 %vm4959_vm0, %v4960_v6  ;;  %v4350_v34 = vpack.c.bf16 %v925_v32, %v924_v31  ;;  %v1023_v31 = vld [vmem:[%s5891_s21 + $0x30] sm:$0xff]  ;;  %v1024_v32 = vld [vmem:[%s5891_s21 + $0x38] sm:$0xff] }
 0x206   :  { %v538_v48 = vpop.f32.mrb[8].mxu1 }
 0x207   :  { %v3812_v49 = vpop.f32.mrb[9].mxu1  ;;  %v539_v62 = vadd.f32 %v3472_v61, %v538_v48  ;;  %v934_v48 = vld [vmem:[%s5889_s0 + $0x50] sm:$0xff]  ;;  %v1036_v61 = vld [vmem:[%s5890_s17 + $0x18] sm:$0xff] }
 0x208   :  { %v935_v49 = vld [vmem:[%s5889_s0 + $0x58] sm:$0xff] }
 0x20c   :  { %v3847_v51 = vpop.f32.mrb[0].mxu0 }
 0x20d   :  { %v637_v52 = vadd.f32 %v3847_v51, %v3473_v50  ;;  %v631_v53 = vpop.f32.mrb[1].mxu0  ;;  %v936_v51 = vld [vmem:[%s5889_s0 + $0x60] sm:$0xff] }
 0x20e   :  { %v632_v54 = vadd.f32 %v3473_v50, %v631_v53 }
 0x210   :  { %v4338_v55 = vpack.c.bf16 %v637_v52, %v632_v54  ;;  %v3850_v56 = vpop.f32.mrb[2].mxu0  ;;  %v937_v52 = vld [vmem:[%s5889_s0 + $0x68] sm:$0xff]  ;;  %v938_v54 = vld [vmem:[%s5889_s0 + $0x70] sm:$0xff] }
 0x211   :  { %v647_v57 = vadd.f32 %v3850_v56, %v3473_v50  ;;  %v641_v58 = vpop.f32.mrb[3].mxu0  ;;  %v4368_v53 = vpack.c.bf16 %v937_v52, %v936_v51  ;;  %v3476_v52 = vld [vmem:[%s5893_s29] ss:$0 sm:$0xff] }
 0x212   :  { %v642_v59 = vadd.f32 %v3473_v50, %v641_v58  ;;  %4339 = vmatpush3.bf16.xpose.msra.mxu0 %v4338_v55  ;;  %v4365_v50 = vpack.c.bf16 %v935_v49, %v934_v48  ;;  %v939_v55 = vld [vmem:[%s5889_s0 + $0x78] sm:$0xff]  ;;  %v1034_v58 = vld [vmem:[%s5890_s17 + $0x8] sm:$0xff]  ;;  %v1220_v49 = vld [vmem:[%s5892_s25] sm:$0xff] }
 0x213   :  { %4340 = vmatprep.subr.bf16.mxu0 %v4958_v3  ;;  %v4371_v56 = vpack.c.bf16 %v939_v55, %v938_v54  ;;  %v1223_v54 = vld [vmem:[%s5892_s25 + $0x18] sm:$0xff]  ;;  %v3463_v55 = vld [vmem:[%s5894_s8] ss:$0 sm:$0xff] }
 0x214   :  { %v4341_v60 = vpack.c.bf16 %v647_v57, %v642_v59  ;;  %v1033_v57 = vld [vmem:[%s5890_s17] sm:$0xff]  ;;  %v1035_v59 = vld [vmem:[%s5890_s17 + $0x10] sm:$0xff] }
 0x21a   :  { %4342 = vmatpush3.bf16.xpose.msra.mxu0 %v4341_v60  ;;  %v4374_v60 = vpack.c.bf16 %v1034_v58, %v1033_v57 }
 0x21b   :  { %4343 = vmatprep.subr.bf16.mxu0 %v4958_v3 }
 0x21c   :  { %4375 = vmatpush3.bf16.msra.mxu1 %v4374_v60  ;;  %v1224_v60 = vld [vmem:[%s5892_s25 + $0x20] sm:$0xff] }
 0x21d   :  { %4376 = vmatprep.subr.bf16.mxu1 %v4958_v3 }
 0x221   :  { %3898 = vmatmul.mubr.f32.vlgmr.msra.gmra.mrb[4].mxu0 %v539_v62  ;;  %v4377_v62 = vpack.c.bf16 %v1036_v61, %v1035_v59  ;;  %v250_v59 = vadd.f32 %v3463_v55, %v5250_v12  ;;  %v1225_v61 = vld [vmem:[%s5892_s25 + $0x28] sm:$0xff]  ;;  %v1432_v55 = vld [vmem:[%s5897_s24 + $0xd8] sm:$0xff] }
 0x222   :  { %3908 = vmatprep.mubr.msk.f32.mxu0 %vm4959_vm0, %v4960_v6 }
 0x223   :  { %4378 = vmatpush3.bf16.msra.mxu1 %v4377_v62  ;;  %v4429_v62 = vpack.c.bf16 %v1225_v61, %v1224_v60  ;;  %v1440_v60 = vld [vmem:[%s5897_s24 + $0x118] sm:$0xff] }
 0x224   :  { %4379 = vmatprep.subr.bf16.mxu1 %v4958_v3  ;;  %v1444_v61 = vld [vmem:[%s5897_s24 + $0x138] sm:$0xff] }
 0x226   :  { %v3885_v0 = vpop.f32.mrb[10].mxu1 }
 0x227   :  { %v745_v1 = vadd.f32 %v3885_v0, %v3474_v63  ;;  %v739_v2 = vpop.f32.mrb[11].mxu1  ;;  %v1038_v0 = vld [vmem:[%s5890_s17 + $0x28] sm:$0xff] }
 0x228   :  { %v740_v4 = vadd.f32 %v3474_v63, %v739_v2  ;;  %v1039_v2 = vld [vmem:[%s5890_s17 + $0x30] sm:$0xff] }
 0x22a   :  { %v4344_v5 = vpack.c.bf16 %v745_v1, %v740_v4  ;;  %v3888_v7 = vpop.f32.mrb[12].mxu1  ;;  %v1040_v4 = vld [vmem:[%s5890_s17 + $0x38] sm:$0xff] }
 0x22b   :  { %v755_v8 = vadd.f32 %v3888_v7, %v3474_v63  ;;  %v749_v9 = vpop.f32.mrb[13].mxu1  ;;  %v1041_v7 = vld [vmem:[%s5890_s17 + $0x40] sm:$0xff] }
 0x22c   :  { %v750_v10 = vadd.f32 %v3474_v63, %v749_v9  ;;  %4345 = vmatpush3.bf16.msra.mxu0 %v4344_v5  ;;  %v1037_v63 = vld [vmem:[%s5890_s17 + $0x20] sm:$0xff]  ;;  %v4383_v5 = vpack.c.bf16 %v1040_v4, %v1039_v2  ;;  %v1229_v4 = vld [vmem:[%s5892_s25 + $0x48] sm:$0xff] }
 0x22d   :  { %4346 = vmatprep.subr.bf16.mxu0 %v4958_v3  ;;  %v4380_v1 = vpack.c.bf16 %v1038_v0, %v1037_v63  ;;  %v1226_v63 = vld [vmem:[%s5892_s25 + $0x30] sm:$0xff]  ;;  %v1227_v0 = vld [vmem:[%s5892_s25 + $0x38] sm:$0xff]  ;;  %v1228_v2 = vld [vmem:[%s5892_s25 + $0x40] sm:$0xff] }
 0x22e   :  { %v4347_v11 = vpack.c.bf16 %v755_v8, %v750_v10  ;;  %v1042_v8 = vld [vmem:[%s5890_s17 + $0x48] sm:$0xff]  ;;  %v1043_v10 = vld [vmem:[%s5890_s17 + $0x50] sm:$0xff]  ;;  %v4437_v12 = vpack.c.bf16 %v1229_v4, %v1228_v2  ;;  %v1448_v2 = vld [vmem:[%s5897_s24 + $0x158] sm:$0xff] }
 0x22f   :  { %4381 = vmatpush3.bf16.msra.mxu1 %v4380_v1  ;;  %v4386_v9 = vpack.c.bf16 %v1042_v8, %v1041_v7  ;;  %v4433_v1 = vpack.c.bf16 %v1227_v0, %v1226_v63  ;;  %v1231_v7 = vld [vmem:[%s5892_s25 + $0x58] sm:$0xff]  ;;  %v1439_v63 = vld [vmem:[%s5897_s24 + $0x110] sm:$0xff] }
 0x230   :  { %4348 = vmatpush3.bf16.msra.mxu0 %v4347_v11  ;;  %4382 = vmatprep.subr.bf16.mxu1 %v4958_v3  ;;  %v1044_v11 = vld [vmem:[%s5890_s17 + $0x58] sm:$0xff]  ;;  %v1443_v0 = vld [vmem:[%s5897_s24 + $0x130] sm:$0xff] }
 0x231   :  { %4349 = vmatprep.subr.bf16.mxu0 %v4958_v3  ;;  %v4389_v13 = vpack.c.bf16 %v1044_v11, %v1043_v10  ;;  %v1233_v10 = vld [vmem:[%s5892_s25 + $0x68] sm:$0xff]  ;;  %v1452_v4 = vld [vmem:[%s5897_s24 + $0x178] sm:$0xff] }
 0x233   :  { %4384 = vmatpush3.bf16.msra.mxu1 %v4383_v5  ;;  %v1230_v5 = vld [vmem:[%s5892_s25 + $0x50] sm:$0xff] }
 0x234   :  { %4385 = vmatprep.subr.bf16.mxu1 %v4958_v3  ;;  %v4441_v8 = vpack.c.bf16 %v1231_v7, %v1230_v5  ;;  %v1447_v5 = vld [vmem:[%s5897_s24 + $0x150] sm:$0xff] }
 0x235   :  { %v1451_v7 = vld [vmem:[%s5897_s24 + $0x170] sm:$0xff] }
 0x237   :  { %4387 = vmatpush3.bf16.msra.mxu1 %v4386_v9  ;;  %v1232_v9 = vld [vmem:[%s5892_s25 + $0x60] sm:$0xff] }
 0x238   :  { %4388 = vmatprep.subr.bf16.mxu1 %v4958_v3  ;;  %v4445_v11 = vpack.c.bf16 %v1233_v10, %v1232_v9  ;;  %v1456_v9 = vld [vmem:[%s5897_s24 + $0x198] sm:$0xff] }
 0x239   :  { %v1460_v10 = vld [vmem:[%s5897_s24 + $0x1b8] sm:$0xff] }
 0x23b   :  { %4390 = vmatpush3.bf16.msra.mxu1 %v4389_v13 }
 0x23c   :  { %4391 = vmatprep.subr.bf16.mxu1 %v4958_v3 }
 0x23f   :  { %4393 = vmatpush3.bf16.msra.mxu1 %v4392_v19  ;;  %v1235_v19 = vld [vmem:[%s5892_s25 + $0x78] sm:$0xff] }
 0x240   :  { %4394 = vmatprep.subr.bf16.mxu1 %v4958_v3 }
 0x2f4   :  { %v824_v20 = vpop.f32.mrb[4].mxu0 }
 0x2f5   :  { %v828_v21 = vmul.f32 0.088388346, %v824_v20  ;;  %v3899_v22 = vpop.f32.mrb[5].mxu0  ;;  %v1017_v20 = vld [vmem:[%s5891_s21] sm:$0xff] }
 0x2f7   :  { %v839_v23 = vsel %vm838_vm5, %v828_v21, -1e+30  ;;  %v1018_v21 = vld [vmem:[%s5891_s21 + $0x8] sm:$0xff] }
 0x2f8   :  { %v840_v24 = vsel %vm179_vm1, %v839_v23, -inf  ;;  %v4398_v22 = vpack.c.bf16 %v1018_v21, %v1017_v20  ;;  %v4449_v20 = vpack.c.bf16 %v1235_v19, %v1234_v17  ;;  %v165_v21 = vld [vmem:[%s5895_s14] sm:$0xff] }
 0x2f9   :  { %841 = vmax.xlane.f32.xlu0 %v840_v24  ;;  %v1020_v24 = vld [vmem:[%s5891_s21 + $0x18] sm:$0xff] }
 0x386   :  { %v842_v25 = vpop.xlane.xlu0 %841 }
 0x387   :  { %v843_v26 = vsub.f32 %v839_v23, %v842_v25  ;;  %v1019_v23 = vld [vmem:[%s5891_s21 + $0x10] sm:$0xff] }
 0x389   :  { %v844_v27 = vmul.f32 1.442695, %v843_v26 }
 0x38b   :  { %4822 = vpow2.f32 %v844_v27  ;;  %v4401_v27 = vpack.c.bf16 %v1020_v24, %v1019_v23  ;;  %v3478_v23 = vsel %vm1202_vm6, 1.0, %v4960_v6  ;;  %v166_v24 = vld [vmem:[%s5895_s14 + $0x8] sm:$0xff] }
 0x395   :  { %v4823_v28 = vpop.eup %4822 }
 0x396   :  { %v846_v29 = vsel %vm179_vm1, %v4823_v28, 0.0 }
 0x397   :  { %847 = vadd.xlane.f32.xlu0 %v846_v29  ;;  %v1022_v29 = vld [vmem:[%s5891_s21 + $0x28] sm:$0xff] }
 0x424   :  { %v848_v30 = vpop.xlane.xlu0 %847 }
 0x425   :  { %4824 = vrcp.f32 %v848_v30 }
 0x42f   :  { %v4825_v33 = vpop.eup %4824 }
 0x430   :  { %v850_v35 = vmul.f32 %v4825_v33, %v4823_v28  ;;  %v1021_v28 = vld [vmem:[%s5891_s21 + $0x20] sm:$0xff]  ;;  %v4407_v33 = vpack.c.bf16 %v1024_v32, %v1023_v31 }
 0x431   :  { %v4404_v30 = vpack.c.bf16 %v1022_v29, %v1021_v28 }
 0x432   :  { %3909 = vmatmul.mubr.msk.f32.vlgmr.msra.gmra.mrb[6].mxu0 %vm179_vm1, %v850_v35  ;;  %v1026_v35 = vld [vmem:[%s5891_s21 + $0x48] sm:$0xff] }
 0x433   :  { %4351 = vmatpush3.bf16.msra.mxu0 %v4350_v34  ;;  %3943 = vmatprep.mubr.msk.f32.mxu0 %vm4959_vm0, %v4960_v6  ;;  %v1025_v34 = vld [vmem:[%s5891_s21 + $0x40] sm:$0xff] }
 0x434   :  { %4352 = vmatprep.subr.bf16.mxu0 %v4958_v3  ;;  %v4410_v36 = vpack.c.bf16 %v1026_v35, %v1025_v34 }
 0x437   :  { %4354 = vmatpush3.bf16.msra.mxu0 %v4353_v38  ;;  %v1028_v38 = vld [vmem:[%s5891_s21 + $0x58] sm:$0xff] }
 0x438   :  { %4355 = vmatprep.subr.bf16.mxu0 %v4958_v3  ;;  %v4413_v39 = vpack.c.bf16 %v1028_v38, %v1027_v37  ;;  %v1408_v37 = vld [vmem:[%s5897_s24 + $0x18] sm:$0xff] }
 0x439   :  { %v1412_v38 = vld [vmem:[%s5897_s24 + $0x38] sm:$0xff] }
 0x43b   :  { %4357 = vmatpush3.bf16.msra.mxu0 %v4356_v41  ;;  %v1030_v41 = vld [vmem:[%s5891_s21 + $0x68] sm:$0xff] }
 0x43c   :  { %4358 = vmatprep.subr.bf16.mxu0 %v4958_v3  ;;  %v4416_v42 = vpack.c.bf16 %v1030_v41, %v1029_v40  ;;  %v1407_v40 = vld [vmem:[%s5897_s24 + $0x10] sm:$0xff] }
 0x43d   :  { %v1411_v41 = vld [vmem:[%s5897_s24 + $0x30] sm:$0xff] }
 0x43f   :  { %4360 = vmatpush3.bf16.msra.mxu0 %v4359_v44  ;;  %v1032_v44 = vld [vmem:[%s5891_s21 + $0x78] sm:$0xff] }
 0x440   :  { %4361 = vmatprep.subr.bf16.mxu0 %v4958_v3  ;;  %v4419_v45 = vpack.c.bf16 %v1032_v44, %v1031_v43  ;;  %v1416_v43 = vld [vmem:[%s5897_s24 + $0x58] sm:$0xff] }
 0x441   :  { %v1420_v44 = vld [vmem:[%s5897_s24 + $0x78] sm:$0xff] }
 0x443   :  { %4363 = vmatpush3.bf16.msra.mxu0 %v4362_v47  ;;  %v1048_v47 = vld [vmem:[%s5890_s17 + $0x78] sm:$0xff] }
 0x444   :  { %4364 = vmatprep.subr.bf16.mxu0 %v4958_v3  ;;  %v4395_v48 = vpack.c.bf16 %v1048_v47, %v1047_v46  ;;  %v1415_v46 = vld [vmem:[%s5897_s24 + $0x50] sm:$0xff] }
 0x445   :  { %v1419_v47 = vld [vmem:[%s5897_s24 + $0x70] sm:$0xff] }
 0x446   :  { %4396 = vmatpush3.bf16.msra.mxu1 %v4395_v48  ;;  %v4495_v48 = vpack.c.bf16 %v1419_v47, %v1415_v46  ;;  %v1425_v46 = vld [vmem:[%s5897_s24 + $0xa0] sm:$0xff]  ;;  %v1430_v47 = vld [vmem:[%s5897_s24 + $0xc8] sm:$0xff] }
 0x447   :  { %4366 = vmatpush3.bf16.msra.mxu0 %v4365_v50  ;;  %v1221_v50 = vld [vmem:[%s5892_s25 + $0x8] sm:$0xff] }
 0x448   :  { %4367 = vmatprep.subr.bf16.mxu0 %v4958_v3  ;;  %v4421_v51 = vpack.c.bf16 %v1221_v50, %v1220_v49  ;;  %v1424_v49 = vld [vmem:[%s5897_s24 + $0x98] sm:$0xff] }
 0x449   :  { %v1428_v50 = vld [vmem:[%s5897_s24 + $0xb8] sm:$0xff] }
 0x44a   :  { %4422 = vmatprep.subr.bf16.mxu1 %v4421_v51 }
 0x44b   :  { %4369 = vmatpush3.bf16.msra.mxu0 %v4368_v53  ;;  %v1222_v53 = vld [vmem:[%s5892_s25 + $0x10] sm:$0xff] }
 0x44c   :  { %4370 = vmatprep.subr.bf16.mxu0 %v4958_v3  ;;  %v4425_v58 = vpack.c.bf16 %v1223_v54, %v1222_v53  ;;  %v1427_v53 = vld [vmem:[%s5897_s24 + $0xb0] sm:$0xff] }
 0x44f   :  { %4372 = vmatpush3.bf16.msra.mxu0 %v4371_v56 }
 0x450   :  { %4397 = vmatprep.subr.bf16.mxu0 %v4958_v3 }
 0x505   :  { %v920_v25 = vpop.f32.mrb[6].mxu0 }
 0x506   :  { %v3910_v26 = vpop.f32.mrb[7].mxu0  ;;  %3944 = vmatmul.mubr.f32.vlgmr.msra.gmra.mrb[8].mxu0 %v920_v25  ;;  %v1208_v25 = vadd.f32 %v3478_v23, %v165_v21 }
 0x507   :  { %4399 = vmatpush3.bf16.msra.mxu0 %v4398_v22  ;;  %4013 = vmatprep.mubr.msk.f32.mxu0 %vm4959_vm0, %v4960_v6  ;;  %v1201_v22 = vadd.s32 8, %v5285_v14 }
 0x508   :  { %4400 = vmatprep.subr.bf16.mxu0 %v4958_v3 }
 0x509   :  { %vm1203_vm7 = vcmp.eq.s32.totalorder %v1201_v22, %v5288_v16 }
 0x50a   :  { %v3479_v26 = vsel %vm1203_vm7, 1.0, %v4960_v6 }
 0x50b   :  { %4402 = vmatpush3.bf16.msra.mxu0 %v4401_v27  ;;  %v1210_v27 = vmin.f32 %v1208_v25, 1.0  ;;  %v5398_v28 = vadd.f32 %v3479_v26, %v166_v24  ;;  %v1406_v26 = vld [vmem:[%s5897_s24 + $0x8] sm:$0xff] }
 0x50c   :  { %4403 = vmatprep.subr.bf16.mxu0 %v4958_v3 }
 0x50d   :  { %v1212_v29 = vsel %vm351_vm2, %v1210_v27, 0.0 }
 0x50e   :  { %1213 = vadd.xlane.f32.xlu1 %v1212_v29 }
 0x50f   :  { %4405 = vmatpush3.bf16.msra.mxu0 %v4404_v30  ;;  %v1211_v30 = vmin.f32 %v5398_v28, 1.0 }
 0x510   :  { %4406 = vmatprep.subr.bf16.mxu0 %v4958_v3 }
 0x511   :  { %v1215_v31 = vsel %vm351_vm2, %v1211_v30, 0.0 }
 0x512   :  { %1216 = vadd.xlane.f32.xlu1 %v1215_v31 }
 0x513   :  { %4408 = vmatpush3.bf16.msra.mxu0 %v4407_v33  ;;  %v3477_v33 = vld [vmem:[%s5896_s19] ss:$0 sm:$0xff] }
 0x514   :  { %4409 = vmatprep.subr.bf16.mxu0 %v4958_v3 }
 0x517   :  { %4411 = vmatpush3.bf16.msra.mxu0 %v4410_v36 }
 0x518   :  { %4412 = vmatprep.subr.bf16.mxu0 %v4958_v3 }
 0x51b   :  { %4414 = vmatpush3.bf16.msra.mxu0 %v4413_v39  ;;  %v4489_v39 = vpack.c.bf16 %v1412_v38, %v1408_v37 }
 0x51c   :  { %4415 = vmatprep.subr.bf16.mxu0 %v4958_v3 }
 0x51f   :  { %4417 = vmatpush3.bf16.msra.mxu0 %v4416_v42  ;;  %v4491_v42 = vpack.c.bf16 %v1411_v41, %v1407_v40  ;;  %v1417_v40 = vld [vmem:[%s5897_s24 + $0x60] sm:$0xff]  ;;  %v1422_v41 = vld [vmem:[%s5897_s24 + $0x88] sm:$0xff] }
 0x520   :  { %4418 = vmatprep.subr.bf16.mxu0 %v4958_v3 }
 0x523   :  { %4420 = vmatpush3.bf16.msra.mxu0 %v4419_v45  ;;  %v4493_v45 = vpack.c.bf16 %v1420_v44, %v1416_v43 }
 0x526   :  { %4014 = vmatmul.mubr.f32.vlgmr.msra.gmra.mrb[10].mxu0 %v5255_v18 }
 0x527   :  { %4055 = vmatprep.mubr.msk.f32.mxu0 %vm351_vm2, %v1210_v27  ;;  %v1410_v27 = vld [vmem:[%s5897_s24 + $0x28] sm:$0xff] }
 0x59b   :  { %v1214_v19 = vpop.xlane.xlu1 %1213 }
 0x5d9   :  { %v1013_v56 = vpop.f32.mrb[8].mxu0 }
 0x5da   :  { %v1014_v57 = vadd.f32 %v3476_v52, %v1013_v56  ;;  %v3945_v18 = vpop.f32.mrb[9].mxu0  ;;  %v1423_v52 = vld [vmem:[%s5897_s24 + $0x90] sm:$0xff]  ;;  %v1436_v56 = vld [vmem:[%s5897_s24 + $0xf8] sm:$0xff] }
 0x5db   :  { %v4499_v54 = vpack.c.bf16 %v1427_v53, %v1423_v52  ;;  %v1431_v18 = vld [vmem:[%s5897_s24 + $0xd0] sm:$0xff]  ;;  %v1442_v52 = vld [vmem:[%s5897_s24 + $0x128] sm:$0xff] }
 0x5dc   :  { %3979 = vmatmul.mubr.f32.vlgmr.msra.gmra.mrb[14].mxu1 %v1014_v57  ;;  %v4501_v57 = vpack.c.bf16 %v1436_v56, %v1432_v55  ;;  %v1437_v55 = vld [vmem:[%s5897_s24 + $0x100] sm:$0xff] }
 0x5dd   :  { %4048 = vmatprep.mubr.f32.mxu1 %v250_v59  ;;  %4424 = vmatpush3.bf16.msra.mxu1 %v4421_v51  ;;  %v4497_v51 = vpack.c.bf16 %v1428_v50, %v1424_v49  ;;  %v1429_v49 = vld [vmem:[%s5897_s24 + $0xc0] sm:$0xff] }
 0x5de   :  { %4426 = vmatprep.subr.bf16.mxu1 %v4425_v58  ;;  %v1433_v50 = vld [vmem:[%s5897_s24 + $0xe0] sm:$0xff] }
 0x5df   :  { %v4471_v53 = vpack.c.bf16 %v1433_v50, %v1429_v49  ;;  %v1441_v56 = vld [vmem:[%s5897_s24 + $0x120] sm:$0xff]  ;;  %v1659_v49 = vld [vmem:[%s5898_s30 + $0x70] sm:$0xff]  ;;  %v1662_v50 = vld [vmem:[%s5898_s30 + $0x88] sm:$0xff] }
 0x5e1   :  { %4428 = vmatpush3.bf16.msra.mxu1 %v4425_v58  ;;  %v1435_v58 = vld [vmem:[%s5897_s24 + $0xf0] sm:$0xff] }
 0x5e2   :  { %4430 = vmatprep.subr.bf16.mxu1 %v4429_v62  ;;  %v4503_v59 = vpack.c.bf16 %v1435_v58, %v1431_v18  ;;  %v1450_v18 = vld [vmem:[%s5897_s24 + $0x168] sm:$0xff]  ;;  %v4475_v58 = vpack.c.bf16 %v1441_v56, %v1437_v55  ;;  %v1661_v56 = vld [vmem:[%s5898_s30 + $0x80] sm:$0xff] }
 0x5e5   :  { %4432 = vmatpush3.bf16.msra.mxu1 %v4429_v62  ;;  %v4505_v62 = vpack.c.bf16 %v1444_v61, %v1440_v60  ;;  %v1445_v60 = vld [vmem:[%s5897_s24 + $0x140] sm:$0xff] }
 0x5e6   :  { %4434 = vmatprep.subr.bf16.mxu1 %v4433_v1  ;;  %v1449_v61 = vld [vmem:[%s5897_s24 + $0x160] sm:$0xff] }
 0x5e9   :  { %4436 = vmatpush3.bf16.msra.mxu1 %v4433_v1  ;;  %v4507_v1 = vpack.c.bf16 %v1443_v0, %v1439_v63  ;;  %v1458_v63 = vld [vmem:[%s5897_s24 + $0x1a8] sm:$0xff]  ;;  %v4479_v0 = vpack.c.bf16 %v1449_v61, %v1445_v60  ;;  %v1663_v60 = vld [vmem:[%s5898_s30 + $0x90] sm:$0xff] }
 0x5ea   :  { %4438 = vmatprep.subr.bf16.mxu1 %v4437_v12  ;;  %v1667_v61 = vld [vmem:[%s5898_s30 + $0xb0] sm:$0xff] }
 0x5ed   :  { %4440 = vmatpush3.bf16.msra.mxu1 %v4437_v12  ;;  %v4509_v12 = vpack.c.bf16 %v1452_v4, %v1448_v2  ;;  %v1453_v2 = vld [vmem:[%s5897_s24 + $0x180] sm:$0xff] }
 0x5ee   :  { %4442 = vmatprep.subr.bf16.mxu1 %v4441_v8  ;;  %v1457_v4 = vld [vmem:[%s5897_s24 + $0x1a0] sm:$0xff] }
 0x5f1   :  { %4444 = vmatpush3.bf16.msra.mxu1 %v4441_v8  ;;  %v4511_v8 = vpack.c.bf16 %v1451_v7, %v1447_v5  ;;  %v1462_v5 = vld [vmem:[%s5897_s24 + $0x1c8] sm:$0xff] }
 0x5f2   :  { %4446 = vmatprep.subr.bf16.mxu1 %v4445_v11  ;;  %v1466_v7 = vld [vmem:[%s5897_s24 + $0x1e8] sm:$0xff] }
 0x5f5   :  { %4448 = vmatpush3.bf16.msra.mxu1 %v4445_v11  ;;  %v4513_v11 = vpack.c.bf16 %v1460_v10, %v1456_v9  ;;  %v4485_v9 = vpack.c.bf16 %v1466_v7, %v1462_v5  ;;  %v1468_v10 = vld [vmem:[%s5897_s24 + $0x1f8] sm:$0xff]  ;;  %v1673_v5 = vld [vmem:[%s5898_s30 + $0xe0] sm:$0xff] }
 0x5f6   :  { %4450 = vmatprep.subr.bf16.mxu1 %v4449_v20 }
 0x5f9   :  { %v1185_v13 = vpop.f32.mrb[10].mxu0  ;;  %4452 = vmatpush3.bf16.msra.mxu1 %v4449_v20  ;;  %v1217_v20 = vpop.xlane.xlu1 %1216 }
 0x5fa   :  { %v4015_v15 = vpop.f32.mrb[11].mxu0  ;;  %4490 = vmatprep.subr.bf16.mxu1 %v4489_v39  ;;  %4826 = vrsqrt.f32 %v1217_v20  ;;  %v1413_v39 = vld [vmem:[%s5897_s24 + $0x40] sm:$0xff]  ;;  %v1467_v20 = vld [vmem:[%s5897_s24 + $0x1f0] sm:$0xff] }
 0x5fb   :  { %v1459_v15 = vld [vmem:[%s5897_s24 + $0x1b0] sm:$0xff]  ;;  %4828 = vrsqrt.f32 %v1214_v19  ;;  %v4463_v43 = vpack.c.bf16 %v1417_v40, %v1413_v39  ;;  %v1654_v39 = vld [vmem:[%s5898_s30 + $0x48] sm:$0xff] }
 0x5fc   :  { %v1463_v19 = vld [vmem:[%s5897_s24 + $0x1d0] sm:$0xff] }
 0x604   :  { %v5436_v21 = vpop.eup %4826 }
 0x605   :  { %v5438_v23 = vpop.eup %4828 }
 0x6af   :  { %v1115_v32 = vpop.f32.mrb[14].mxu1 }
 0x6b0   :  { %v1186_v34 = vadd.f32 %v1185_v13, %v1115_v32  ;;  %v3980_v35 = vpop.f32.mrb[15].mxu1  ;;  %v1455_v13 = vld [vmem:[%s5897_s24 + $0x190] sm:$0xff]  ;;  %v4457_v32 = vpack.c.bf16 %v1410_v27, %v1406_v26  ;;  %v1648_v26 = vld [vmem:[%s5898_s30 + $0x18] sm:$0xff] }
 0x6b1   :  { %v4515_v17 = vpack.c.bf16 %v1459_v15, %v1455_v13  ;;  %v1414_v35 = vld [vmem:[%s5897_s24 + $0x48] sm:$0xff]  ;;  %v1465_v13 = vld [vmem:[%s5897_s24 + $0x1e0] sm:$0xff] }
 0x6b2   :  { %v1196_v36 = vadd.f32 %v3477_v33, %v1186_v34  ;;  %v1405_v33 = vld [vmem:[%s5897_s24] sm:$0xff] }
 0x6b3   :  { %v1409_v34 = vld [vmem:[%s5897_s24 + $0x20] sm:$0xff] }
 0x6b4   :  { %4049 = vmatmul.mubr.f32.vlgmr.msra.gmra.mrb[16].mxu1 %v1196_v36  ;;  %v1418_v36 = vld [vmem:[%s5897_s24 + $0x68] sm:$0xff]  ;;  %v4459_v37 = vpack.c.bf16 %v1409_v34, %v1405_v33  ;;  %v1649_v34 = vld [vmem:[%s5898_s30 + $0x20] sm:$0xff] }
 0x6b5   :  { %1632 = vmatprep.mubr.f32.mxu1 %v4960_v6  ;;  %4492 = vmatpush1.bf16.msra.mxu1 %v4491_v42  ;;  %v4461_v38 = vpack.c.bf16 %v1418_v36, %v1414_v35  ;;  %v1426_v42 = vld [vmem:[%s5897_s24 + $0xa8] sm:$0xff]  ;;  %v1647_v35 = vld [vmem:[%s5898_s30 + $0x10] sm:$0xff] }
 0x6b6   :  { %4494 = vmatprep.subr.bf16.mxu1 %v4493_v45  ;;  %v4465_v44 = vpack.c.bf16 %v1426_v42, %v1422_v41  ;;  %v1421_v45 = vld [vmem:[%s5897_s24 + $0x80] sm:$0xff]  ;;  %v1651_v36 = vld [vmem:[%s5898_s30 + $0x30] sm:$0xff]  ;;  %v1658_v41 = vld [vmem:[%s5898_s30 + $0x68] sm:$0xff] }
 0x6b7   :  { %v4467_v28 = vpack.c.bf16 %v1425_v46, %v1421_v45  ;;  %v1656_v42 = vld [vmem:[%s5898_s30 + $0x58] sm:$0xff]  ;;  %v4555_v45 = vpack.c.bf16 %v1651_v36, %v1647_v35  ;;  %v1653_v46 = vld [vmem:[%s5898_s30 + $0x40] sm:$0xff] }
 0x6b9   :  { %4496 = vmatpush1.bf16.msra.mxu1 %v4495_v48  ;;  %v1434_v48 = vld [vmem:[%s5897_s24 + $0xe8] sm:$0xff] }
 0x6ba   :  { %4498 = vmatprep.subr.bf16.mxu1 %v4497_v51  ;;  %v1438_v51 = vld [vmem:[%s5897_s24 + $0x108] sm:$0xff] }
 0x6bd   :  { %4500 = vmatpush1.bf16.msra.mxu1 %v4499_v54  ;;  %v4473_v54 = vpack.c.bf16 %v1442_v52, %v1438_v51  ;;  %v4525_v51 = vpack.c.bf16 %v1658_v41, %v1654_v39  ;;  %v1666_v52 = vld [vmem:[%s5898_s30 + $0xa8] sm:$0xff]  ;;  %v1687_v41 = vld [vmem:[%s5898_s30 + $0x150] sm:$0xff] }
 0x6be   :  { %4502 = vmatprep.subr.bf16.mxu1 %v4501_v57  ;;  %v1446_v57 = vld [vmem:[%s5897_s24 + $0x148] sm:$0xff] }
 0x6c1   :  { %4504 = vmatpush1.bf16.msra.mxu1 %v4503_v59  ;;  %v4477_v59 = vpack.c.bf16 %v1450_v18, %v1446_v57  ;;  %v1665_v57 = vld [vmem:[%s5898_s30 + $0xa0] sm:$0xff] }
 0x6c2   :  { %4506 = vmatprep.subr.bf16.mxu1 %v4505_v62  ;;  %v1454_v62 = vld [vmem:[%s5897_s24 + $0x188] sm:$0xff] }
 0x6c5   :  { %4508 = vmatpush1.bf16.msra.mxu1 %v4507_v1  ;;  %v4481_v1 = vpack.c.bf16 %v1458_v63, %v1454_v62  ;;  %v1670_v62 = vld [vmem:[%s5898_s30 + $0xc8] sm:$0xff] }
 0x6c6   :  { %4510 = vmatprep.subr.bf16.mxu1 %v4509_v12  ;;  %v4483_v12 = vpack.c.bf16 %v1457_v4, %v1453_v2  ;;  %v1674_v63 = vld [vmem:[%s5898_s30 + $0xe8] sm:$0xff]  ;;  %v4531_v2 = vpack.c.bf16 %v1665_v57, %v1661_v56  ;;  %v4563_v4 = vpack.c.bf16 %v1667_v61, %v1663_v60 }
 0x6c7   :  { %v4533_v7 = vpack.c.bf16 %v1674_v63, %v1670_v62  ;;  %v1703_v62 = vld [vmem:[%s5898_s30 + $0x1d0] sm:$0xff] }
 0x6c8   :  { %v1707_v63 = vld [vmem:[%s5898_s30 + $0x1f0] sm:$0xff] }
 0x6c9   :  { %4512 = vmatpush1.bf16.msra.mxu1 %v4511_v8  ;;  %v1464_v8 = vld [vmem:[%s5897_s24 + $0x1d8] sm:$0xff] }
 0x6ca   :  { %4514 = vmatprep.subr.bf16.mxu1 %v4513_v11  ;;  %v1461_v11 = vld [vmem:[%s5897_s24 + $0x1c0] sm:$0xff]  ;;  %v4517_v15 = vpack.c.bf16 %v1468_v10, %v1464_v8  ;;  %v1675_v10 = vld [vmem:[%s5898_s30 + $0xf0] sm:$0xff] }
 0x6cd   :  { %4516 = vmatpush1.bf16.msra.mxu1 %v4515_v17  ;;  %v4487_v17 = vpack.c.bf16 %v1465_v13, %v1461_v11  ;;  %v1678_v11 = vld [vmem:[%s5898_s30 + $0x108] sm:$0xff] }
 0x6ce   :  { %4518 = vmatprep.subr.bf16.mxu1 %v4517_v15  ;;  %v1682_v13 = vld [vmem:[%s5898_s30 + $0x128] sm:$0xff]  ;;  %v1680_v15 = vld [vmem:[%s5898_s30 + $0x118] sm:$0xff] }
 0x787   :  { %v4050_v22 = vpop.f32.mrb[16].mxu1 }
 0x788   :  { %v1312_v24 = vmul.f32 %v5436_v21, %v4050_v22  ;;  %v1302_v25 = vpop.f32.mrb[17].mxu1  ;;  %v4519_v22 = vpack.c.bf16 %v1467_v20, %v1463_v19 }
 0x789   :  { %v1311_v29 = vmul.f32 %v5438_v23, %v1302_v25  ;;  %v1650_v25 = vld [vmem:[%s5898_s30 + $0x28] sm:$0xff] }
 0x78a   :  { %4520 = vmatpush1.bf16.msra.mxu1 %v4519_v22  ;;  %v1677_v22 = vld [vmem:[%s5898_s30 + $0x100] sm:$0xff] }
 0x78b   :  { %v4453_v31 = vpack.c.bf16 %v1312_v24, %v1311_v29  ;;  %v1646_v24 = vld [vmem:[%s5898_s30 + $0x8] sm:$0xff]  ;;  %v1652_v29 = vld [vmem:[%s5898_s30 + $0x38] sm:$0xff] }
 0x78c   :  { %v4521_v27 = vpack.c.bf16 %v1650_v25, %v1646_v24  ;;  %v1681_v24 = vld [vmem:[%s5898_s30 + $0x120] sm:$0xff]  ;;  %v4537_v25 = vpack.c.bf16 %v1682_v13, %v1678_v11  ;;  %v1887_v11 = vld [vmem:[%s5900_s12 + $0x10] sm:$0xff] }
 0x78d   :  { %4454 = vmatprep.subr.bf16.mxu0 %v4453_v31  ;;  %v4539_v35 = vpack.c.bf16 %v1681_v24, %v1677_v22  ;;  %v1891_v13 = vld [vmem:[%s5900_s12 + $0x30] sm:$0xff] }
 0x78e   :  { %4456 = vmatpush3.bf16.msra.mxu0 %v4453_v31  ;;  %v4553_v31 = vpack.c.bf16 %v1652_v29, %v1648_v26  ;;  %v1683_v29 = vld [vmem:[%s5898_s30 + $0x130] sm:$0xff]  ;;  %v4619_v24 = vpack.c.bf16 %v1891_v13, %v1887_v11 }
 0x78f   :  { %4458 = vmatprep.subr.bf16.mxu0 %v4457_v32  ;;  %v1645_v32 = vld [vmem:[%s5898_s30] sm:$0xff] }
 0x790   :  { %4554 = vmatprep.subr.bf16.mxu1 %v4553_v31  ;;  %v1686_v31 = vld [vmem:[%s5898_s30 + $0x148] sm:$0xff] }
 0x791   :  { %4056 = vmatmul.mubr.msk.f32.vlgmr.msra.gmra.mrb[12].mxu0 %vm351_vm2, %v1211_v30  ;;  %v4469_v30 = vpack.c.bf16 %v1434_v48, %v1430_v47  ;;  %v1657_v47 = vld [vmem:[%s5898_s30 + $0x60] sm:$0xff] }
 0x792   :  { %4460 = vmatpush1.bf16.msra.mxu0 %v4459_v37  ;;  %1555 = vmatprep.mubr.f32.mxu0 %v4960_v6  ;;  %v3482_v37 = vld [vmem:[%s5899_s6] ss:$0 sm:$0xff] }
 0x793   :  { %4462 = vmatprep.subr.bf16.mxu0 %v4461_v38 }
 0x796   :  { %4464 = vmatpush1.bf16.msra.mxu0 %v4463_v43  ;;  %v1660_v43 = vld [vmem:[%s5898_s30 + $0x78] sm:$0xff] }
 0x797   :  { %4466 = vmatprep.subr.bf16.mxu0 %v4465_v44  ;;  %v4523_v44 = vpack.c.bf16 %v1649_v34, %v1645_v32  ;;  %v1690_v32 = vld [vmem:[%s5898_s30 + $0x168] sm:$0xff]  ;;  %v1692_v34 = vld [vmem:[%s5898_s30 + $0x178] sm:$0xff] }
 0x798   :  { %v4541_v39 = vpack.c.bf16 %v1690_v32, %v1686_v31  ;;  %v1902_v31 = vld [vmem:[%s5900_s12 + $0x88] sm:$0xff] }
 0x79a   :  { %4468 = vmatpush1.bf16.msra.mxu0 %v4467_v28 }
 0x79b   :  { %4470 = vmatprep.subr.bf16.mxu0 %v4469_v30  ;;  %v1655_v30 = vld [vmem:[%s5898_s30 + $0x50] sm:$0xff] }
 0x79c   :  { %v4559_v55 = vpack.c.bf16 %v1659_v49, %v1655_v30  ;;  %v1693_v30 = vld [vmem:[%s5898_s30 + $0x180] sm:$0xff] }
 0x79d   :  { %v1697_v49 = vld [vmem:[%s5898_s30 + $0x1a0] sm:$0xff] }
 0x79e   :  { %4472 = vmatpush1.bf16.msra.mxu0 %v4471_v53  ;;  %v1664_v53 = vld [vmem:[%s5898_s30 + $0x98] sm:$0xff]  ;;  %v4547_v56 = vpack.c.bf16 %v1697_v49, %v1693_v30 }
 0x79f   :  { %4474 = vmatprep.subr.bf16.mxu0 %v4473_v54  ;;  %v1668_v54 = vld [vmem:[%s5898_s30 + $0xb8] sm:$0xff] }
 0x7a2   :  { %4476 = vmatpush1.bf16.msra.mxu0 %v4475_v58  ;;  %v4529_v58 = vpack.c.bf16 %v1666_v52, %v1662_v50  ;;  %v1699_v52 = vld [vmem:[%s5898_s30 + $0x1b0] sm:$0xff] }
 0x7a3   :  { %4478 = vmatprep.subr.bf16.mxu0 %v4477_v59  ;;  %v4561_v59 = vpack.c.bf16 %v1668_v54, %v1664_v53  ;;  %v1702_v53 = vld [vmem:[%s5898_s30 + $0x1c8] sm:$0xff] }
 0x7a4   :  { %v1706_v54 = vld [vmem:[%s5898_s30 + $0x1e8] sm:$0xff] }
 0x7a5   :  { %v4549_v60 = vpack.c.bf16 %v1706_v54, %v1702_v53  ;;  %v1911_v53 = vld [vmem:[%s5900_s12 + $0xd0] sm:$0xff] }
 0x7a6   :  { %4480 = vmatpush1.bf16.msra.mxu0 %v4479_v0  ;;  %v1672_v0 = vld [vmem:[%s5898_s30 + $0xd8] sm:$0xff]  ;;  %v1915_v54 = vld [vmem:[%s5900_s12 + $0xf0] sm:$0xff] }
 0x7a7   :  { %4482 = vmatprep.subr.bf16.mxu0 %v4481_v1  ;;  %v1676_v1 = vld [vmem:[%s5898_s30 + $0xf8] sm:$0xff] }
 0x7a8   :  { %v4565_v8 = vpack.c.bf16 %v1676_v1, %v1672_v0  ;;  %v1886_v0 = vld [vmem:[%s5900_s12 + $0x8] sm:$0xff] }
 0x7a9   :  { %v1890_v1 = vld [vmem:[%s5900_s12 + $0x28] sm:$0xff] }
 0x7aa   :  { %4484 = vmatpush1.bf16.msra.mxu0 %v4483_v12  ;;  %v1669_v12 = vld [vmem:[%s5898_s30 + $0xc0] sm:$0xff] }
 0x7ab   :  { %4486 = vmatprep.subr.bf16.mxu0 %v4485_v9  ;;  %v1671_v9 = vld [vmem:[%s5898_s30 + $0xd0] sm:$0xff]  ;;  %v4535_v19 = vpack.c.bf16 %v1673_v5, %v1669_v12  ;;  %v4583_v5 = vpack.c.bf16 %v1707_v63, %v1703_v62 }
 0x7ac   :  { %v4567_v20 = vpack.c.bf16 %v1675_v10, %v1671_v9  ;;  %v1889_v10 = vld [vmem:[%s5900_s12 + $0x20] sm:$0xff] }
 0x7ae   :  { %4488 = vmatpush1.bf16.msra.mxu0 %v4487_v17  ;;  %v1684_v17 = vld [vmem:[%s5898_s30 + $0x138] sm:$0xff] }
 0x7af   :  { %4522 = vmatprep.subr.bf16.mxu0 %v4521_v27  ;;  %v4569_v26 = vpack.c.bf16 %v1684_v17, %v1680_v15  ;;  %v1679_v27 = vld [vmem:[%s5898_s30 + $0x110] sm:$0xff]  ;;  %v1894_v15 = vld [vmem:[%s5900_s12 + $0x48] sm:$0xff] }
 0x7b0   :  { %v4571_v36 = vpack.c.bf16 %v1683_v29, %v1679_v27  ;;  %v1898_v17 = vld [vmem:[%s5900_s12 + $0x68] sm:$0xff]  ;;  %v1895_v27 = vld [vmem:[%s5900_s12 + $0x50] sm:$0xff] }
 0x7b1   :  { %v1899_v29 = vld [vmem:[%s5900_s12 + $0x70] sm:$0xff]  ;;  %v4589_v32 = vpack.c.bf16 %v1898_v17, %v1894_v15 }
 0x7b2   :  { %v1927_v15 = vld [vmem:[%s5900_s12 + $0x150] sm:$0xff] }
 0x7b3   :  { %v1931_v17 = vld [vmem:[%s5900_s12 + $0x170] sm:$0xff] }
 0x864   :  { %v4057_v33 = vpop.f32.mrb[12].mxu0 }
 0x865   :  { %v1385_v38 = vpop.f32.mrb[13].mxu0  ;;  %v1395_v48 = vmul.f32 %v5436_v21, %v4057_v33  ;;  %v4527_v21 = vpack.c.bf16 %v1657_v47, %v1653_v46  ;;  %v1688_v33 = vld [vmem:[%s5898_s30 + $0x158] sm:$0xff] }
 0x866   :  { %v1394_v40 = vmul.f32 %v5438_v23, %v1385_v38  ;;  %v4557_v23 = vpack.c.bf16 %v1660_v43, %v1656_v42  ;;  %v1689_v38 = vld [vmem:[%s5898_s30 + $0x160] sm:$0xff]  ;;  %v1691_v42 = vld [vmem:[%s5898_s30 + $0x170] sm:$0xff]  ;;  %v1694_v43 = vld [vmem:[%s5898_s30 + $0x188] sm:$0xff] }
 0x867   :  { %v5511_v18 = vadd.f32 %v3482_v37, %v1395_v48  ;;  %v1700_v46 = vld [vmem:[%s5898_s30 + $0x1b8] sm:$0xff]  ;;  %v4575_v48 = vpack.c.bf16 %v1691_v42, %v1687_v41 }
 0x868   :  { %v5499_v28 = vadd.f32 %v3482_v37, %v1394_v40  ;;  %v1685_v37 = vld [vmem:[%s5898_s30 + $0x140] sm:$0xff]  ;;  %v4573_v40 = vpack.c.bf16 %v1692_v34, %v1688_v33  ;;  %v1906_v34 = vld [vmem:[%s5900_s12 + $0xa8] sm:$0xff] }
 0x869   :  { %v4543_v47 = vpack.c.bf16 %v1689_v38, %v1685_v37  ;;  %v4623_v38 = vpack.c.bf16 %v1899_v29, %v1895_v27  ;;  %v4593_v41 = vpack.c.bf16 %v1906_v34, %v1902_v31  ;;  %v1933_v27 = vld [vmem:[%s5900_s12 + $0x180] sm:$0xff]  ;;  %v1939_v34 = vld [vmem:[%s5900_s12 + $0x1b0] sm:$0xff] }
 0x86a   :  { %1556 = vmatmul.mubr.f32.vlgmr.msra.gmra.mrb[14].mxu0 %v5499_v28  ;;  %1633 = vmatmul.mubr.f32.vlgmr.msra.gmra.mrb[18].mxu1 %v5499_v28  ;;  %v1937_v29 = vld [vmem:[%s5900_s12 + $0x1a0] sm:$0xff] }
 0x86b   :  { %4524 = vmatpush1.bf16.msra.mxu0 %v4523_v44  ;;  %4556 = vmatpush1.bf16.msra.mxu1 %v4555_v45  ;;  %v1698_v44 = vld [vmem:[%s5898_s30 + $0x1a8] sm:$0xff]  ;;  %v1696_v45 = vld [vmem:[%s5898_s30 + $0x198] sm:$0xff] }
 0x86c   :  { %1561 = vmatprep.mubr.f32.mxu0 %v4960_v6  ;;  %1638 = vmatprep.mubr.f32.mxu1 %v4960_v6  ;;  %v4545_v50 = vpack.c.bf16 %v1698_v44, %v1694_v43  ;;  %v1903_v43 = vld [vmem:[%s5900_s12 + $0x90] sm:$0xff] }
 0x86d   :  { %4526 = vmatprep.subr.bf16.mxu0 %v4525_v51  ;;  %4558 = vmatprep.subr.bf16.mxu1 %v4557_v23  ;;  %v4577_v51 = vpack.c.bf16 %v1700_v46, %v1696_v45  ;;  %v1695_v23 = vld [vmem:[%s5898_s30 + $0x190] sm:$0xff]  ;;  %v1910_v45 = vld [vmem:[%s5900_s12 + $0xc8] sm:$0xff] }
 0x86e   :  { %1562 = vmatmul.mubr.f32.gmra.mrb[16].mxu0 %v5511_v18  ;;  %1639 = vmatmul.mubr.f32.gmra.mrb[20].mxu1 %v5511_v18  ;;  %v4579_v57 = vpack.c.bf16 %v1699_v52, %v1695_v23  ;;  %v1907_v44 = vld [vmem:[%s5900_s12 + $0xb0] sm:$0xff]  ;;  %v1914_v46 = vld [vmem:[%s5900_s12 + $0xe8] sm:$0xff] }
 0x86f   :  { %4528 = vmatpush1.bf16.msra.mxu0 %v4527_v21  ;;  %4560 = vmatpush1.bf16.msra.mxu1 %v4559_v55  ;;  %v1704_v21 = vld [vmem:[%s5898_s30 + $0x1d8] sm:$0xff]  ;;  %v4627_v49 = vpack.c.bf16 %v1907_v44, %v1903_v43  ;;  %v4597_v23 = vpack.c.bf16 %v1914_v46, %v1910_v45  ;;  %v1945_v44 = vld [vmem:[%s5900_s12 + $0x1e0] sm:$0xff]  ;;  %v1943_v45 = vld [vmem:[%s5900_s12 + $0x1d0] sm:$0xff] }
 0x870   :  { %4530 = vmatprep.subr.bf16.mxu0 %v4529_v58  ;;  %4562 = vmatprep.subr.bf16.mxu1 %v4561_v59  ;;  %v1708_v55 = vld [vmem:[%s5898_s30 + $0x1f8] sm:$0xff]  ;;  %v1701_v58 = vld [vmem:[%s5898_s30 + $0x1c0] sm:$0xff]  ;;  %v1947_v46 = vld [vmem:[%s5900_s12 + $0x1f0] sm:$0xff] }
 0x871   :  { %1795 = vmatprep.mubr.f32.mxu0 %v4960_v6  ;;  %1872 = vmatprep.mubr.f32.mxu1 %v4960_v6  ;;  %v1705_v59 = vld [vmem:[%s5898_s30 + $0x1e0] sm:$0xff]  ;;  %v4581_v61 = vpack.c.bf16 %v1708_v55, %v1704_v21  ;;  %v1918_v21 = vld [vmem:[%s5900_s12 + $0x108] sm:$0xff] }
 0x872   :  { %v4551_v12 = vpack.c.bf16 %v1705_v59, %v1701_v58  ;;  %v1922_v55 = vld [vmem:[%s5900_s12 + $0x128] sm:$0xff]  ;;  %v4631_v59 = vpack.c.bf16 %v1915_v54, %v1911_v53  ;;  %v1469_v53 = vld [vmem:[%s5902_s27] sm:$0xf]  ;;  %v1477_v54 = vsub.s32 1, %v5285_v14 }
 0x873   :  { %4532 = vmatpush1.bf16.msra.mxu0 %v4531_v2  ;;  %4564 = vmatpush1.bf16.msra.mxu1 %v4563_v4  ;;  %v1888_v2 = vld [vmem:[%s5900_s12 + $0x18] sm:$0xff]  ;;  %v4601_v62 = vpack.c.bf16 %v1922_v55, %v1918_v21 }
 0x874   :  { %4534 = vmatprep.subr.bf16.mxu0 %v4533_v7  ;;  %4566 = vmatprep.subr.bf16.mxu1 %v4565_v8  ;;  %v1892_v4 = vld [vmem:[%s5900_s12 + $0x38] sm:$0xff]  ;;  %v1885_v7 = vld [vmem:[%s5900_s12] sm:$0xff]  ;;  %v4585_v8 = vpack.c.bf16 %v1890_v1, %v1886_v0  ;;  %v1919_v0 = vld [vmem:[%s5900_s12 + $0x110] sm:$0xff]  ;;  %v1478_v55 = vrot.slane %v1469_v53, %v1477_v54 }
 0x875   :  { %v4617_v9 = vpack.c.bf16 %v1892_v4, %v1888_v2  ;;  %v4587_v22 = vpack.c.bf16 %v1889_v10, %v1885_v7  ;;  %v1923_v1 = vld [vmem:[%s5900_s12 + $0x130] sm:$0xff]  ;;  %v1926_v2 = vld [vmem:[%s5900_s12 + $0x148] sm:$0xff]  ;;  %v1929_v10 = vld [vmem:[%s5900_s12 + $0x160] sm:$0xff] }
 0x876   :  { %v1930_v4 = vld [vmem:[%s5900_s12 + $0x168] sm:$0xff] }
 0x877   :  { %4536 = vmatpush1.bf16.msra.mxu0 %v4535_v19  ;;  %4568 = vmatpush1.bf16.msra.mxu1 %v4567_v20  ;;  %v1896_v19 = vld [vmem:[%s5900_s12 + $0x58] sm:$0xff]  ;;  %v4605_v11 = vpack.c.bf16 %v1930_v4, %v1926_v2  ;;  %v1709_v2 = vld [vmem:[%s5903_s4] sm:$0xf] }
 0x878   :  { %4538 = vmatprep.subr.bf16.mxu0 %v4537_v25  ;;  %4570 = vmatprep.subr.bf16.mxu1 %v4569_v26  ;;  %v1900_v20 = vld [vmem:[%s5900_s12 + $0x78] sm:$0xff]  ;;  %v1893_v25 = vld [vmem:[%s5900_s12 + $0x40] sm:$0xff] }
 0x879   :  { %v1897_v26 = vld [vmem:[%s5900_s12 + $0x60] sm:$0xff]  ;;  %v4621_v33 = vpack.c.bf16 %v1900_v20, %v1896_v19  ;;  %v1934_v19 = vld [vmem:[%s5900_s12 + $0x188] sm:$0xff] }
 0x87a   :  { %v4591_v37 = vpack.c.bf16 %v1897_v26, %v1893_v25  ;;  %v1938_v20 = vld [vmem:[%s5900_s12 + $0x1a8] sm:$0xff]  ;;  %v4639_v26 = vpack.c.bf16 %v1931_v17, %v1927_v15 }
 0x87b   :  { %4540 = vmatpush1.bf16.msra.mxu0 %v4539_v35  ;;  %4572 = vmatpush1.bf16.msra.mxu1 %v4571_v36  ;;  %v1904_v35 = vld [vmem:[%s5900_s12 + $0x98] sm:$0xff]  ;;  %v4609_v31 = vpack.c.bf16 %v1938_v20, %v1934_v19 }
 0x87c   :  { %4542 = vmatprep.subr.bf16.mxu0 %v4541_v39  ;;  %4574 = vmatprep.subr.bf16.mxu1 %v4573_v40  ;;  %v1908_v36 = vld [vmem:[%s5900_s12 + $0xb8] sm:$0xff]  ;;  %v1901_v39 = vld [vmem:[%s5900_s12 + $0x80] sm:$0xff] }
 0x87d   :  { %v1905_v40 = vld [vmem:[%s5900_s12 + $0xa0] sm:$0xff]  ;;  %v4625_v42 = vpack.c.bf16 %v1908_v36, %v1904_v35  ;;  %v1942_v35 = vld [vmem:[%s5900_s12 + $0x1c8] sm:$0xff] }
 0x87e   :  { %v4595_v30 = vpack.c.bf16 %v1905_v40, %v1901_v39  ;;  %v1946_v36 = vld [vmem:[%s5900_s12 + $0x1e8] sm:$0xff]  ;;  %v4611_v39 = vpack.c.bf16 %v1937_v29, %v1933_v27 }
 0x87f   :  { %4544 = vmatpush1.bf16.msra.mxu0 %v4543_v47  ;;  %4576 = vmatpush1.bf16.msra.mxu1 %v4575_v48  ;;  %v1912_v47 = vld [vmem:[%s5900_s12 + $0xd8] sm:$0xff] }
 0x880   :  { %4546 = vmatprep.subr.bf16.mxu0 %v4545_v50  ;;  %4578 = vmatprep.subr.bf16.mxu1 %v4577_v51  ;;  %v1916_v48 = vld [vmem:[%s5900_s12 + $0xf8] sm:$0xff]  ;;  %v1909_v50 = vld [vmem:[%s5900_s12 + $0xc0] sm:$0xff] }
 0x881   :  { %v1913_v51 = vld [vmem:[%s5900_s12 + $0xe0] sm:$0xff]  ;;  %v4629_v52 = vpack.c.bf16 %v1916_v48, %v1912_v47  ;;  %v4647_v48 = vpack.c.bf16 %v1947_v46, %v1943_v45 }
 0x882   :  { %v4599_v58 = vpack.c.bf16 %v1913_v51, %v1909_v50  ;;  %v1485_v50 = vsub.s32 3, %v5285_v14 }
 0x883   :  { %4548 = vmatpush1.bf16.msra.mxu0 %v4547_v56  ;;  %4580 = vmatpush1.bf16.msra.mxu1 %v4579_v57  ;;  %v1920_v56 = vld [vmem:[%s5900_s12 + $0x118] sm:$0xff] }
 0x884   :  { %4550 = vmatprep.subr.bf16.mxu0 %v4549_v60  ;;  %4582 = vmatprep.subr.bf16.mxu1 %v4581_v61  ;;  %v1924_v57 = vld [vmem:[%s5900_s12 + $0x138] sm:$0xff]  ;;  %v1917_v60 = vld [vmem:[%s5900_s12 + $0x100] sm:$0xff] }
 0x885   :  { %v1921_v61 = vld [vmem:[%s5900_s12 + $0x120] sm:$0xff]  ;;  %v4633_v63 = vpack.c.bf16 %v1924_v57, %v1920_v56 }
 0x886   :  { %v4603_v7 = vpack.c.bf16 %v1921_v61, %v1917_v60 }
 0x887   :  { %4552 = vmatpush1.bf16.msra.mxu0 %v4551_v12  ;;  %4584 = vmatpush1.bf16.msra.mxu1 %v4583_v5  ;;  %v1928_v12 = vld [vmem:[%s5900_s12 + $0x158] sm:$0xff] }
 0x888   :  { %4586 = vmatprep.subr.bf16.mxu0 %v4585_v8  ;;  %4618 = vmatprep.subr.bf16.mxu1 %v4617_v9  ;;  %v1932_v5 = vld [vmem:[%s5900_s12 + $0x178] sm:$0xff]  ;;  %v4635_v8 = vpack.c.bf16 %v1923_v1, %v1919_v0  ;;  %v1925_v9 = vld [vmem:[%s5900_s12 + $0x140] sm:$0xff] }
 0x889   :  { %v4637_v13 = vpack.c.bf16 %v1932_v5, %v1928_v12  ;;  %v4607_v25 = vpack.c.bf16 %v1929_v10, %v1925_v9  ;;  %v1718_v9 = vrot.slane %v1709_v2, %v1477_v54  ;;  %v1726_v10 = vrot.slane %v1709_v2, %v1485_v50 }
 0x88a   :  { %1796 = vmatmul.mubr.f32.vlgmr.msra.gmra.mrb[18].mxu0 %v5499_v28  ;;  %1873 = vmatmul.mubr.f32.vlgmr.msra.gmra.mrb[22].mxu1 %v5499_v28 }
 0x88b   :  { %4588 = vmatpush1.bf16.msra.mxu0 %v4587_v22  ;;  %4620 = vmatpush1.bf16.msra.mxu1 %v4619_v24  ;;  %v1936_v22 = vld [vmem:[%s5900_s12 + $0x198] sm:$0xff] }
 0x88c   :  { %1801 = vmatprep.mubr.f32.mxu0 %v4960_v6  ;;  %1878 = vmatprep.mubr.f32.mxu1 %v4960_v6  ;;  %v1940_v24 = vld [vmem:[%s5900_s12 + $0x1b8] sm:$0xff] }
 0x88d   :  { %4590 = vmatprep.subr.bf16.mxu0 %v4589_v32  ;;  %4622 = vmatprep.subr.bf16.mxu1 %v4621_v33  ;;  %v4641_v32 = vpack.c.bf16 %v1940_v24, %v1936_v22  ;;  %v1935_v33 = vld [vmem:[%s5900_s12 + $0x190] sm:$0xff] }
 0x88e   :  { %1802 = vmatmul.mubr.f32.gmra.mrb[20].mxu0 %v5511_v18  ;;  %1879 = vmatmul.mubr.f32.gmra.mrb[24].mxu1 %v5511_v18  ;;  %v4643_v40 = vpack.c.bf16 %v1939_v34, %v1935_v33 }
 0x88f   :  { %4592 = vmatpush1.bf16.msra.mxu0 %v4591_v37  ;;  %4624 = vmatpush1.bf16.msra.mxu1 %v4623_v38  ;;  %v1944_v37 = vld [vmem:[%s5900_s12 + $0x1d8] sm:$0xff] }
 0x890   :  { %4594 = vmatprep.subr.bf16.mxu0 %v4593_v41  ;;  %4626 = vmatprep.subr.bf16.mxu1 %v4625_v42  ;;  %v1948_v38 = vld [vmem:[%s5900_s12 + $0x1f8] sm:$0xff]  ;;  %v1941_v41 = vld [vmem:[%s5900_s12 + $0x1c0] sm:$0xff]  ;;  %v4613_v42 = vpack.c.bf16 %v1946_v36, %v1942_v35 }
 0x891   :  { %2035 = vmatprep.mubr.f32.mxu0 %v4960_v6  ;;  %2112 = vmatprep.mubr.f32.mxu1 %v4960_v6  ;;  %v4645_v43 = vpack.c.bf16 %v1948_v38, %v1944_v37  ;;  %v4615_v47 = vpack.c.bf16 %v1945_v44, %v1941_v41 }
 0x893   :  { %4596 = vmatpush1.bf16.msra.mxu0 %v4595_v30  ;;  %4628 = vmatpush1.bf16.msra.mxu1 %v4627_v49  ;;  %v5640_v30 = vld [vmem:[%s5901_s20] sm:$0xf]  ;;  %v1481_v49 = vsub.s32 2, %v5285_v14 }
 0x894   :  { %4598 = vmatprep.subr.bf16.mxu0 %v4597_v23  ;;  %4630 = vmatprep.subr.bf16.mxu1 %v4629_v52  ;;  %v5648_v23 = vrot.slane %v5640_v30, %v1485_v50  ;;  %v5651_v52 = vsub.s32 0, %v5285_v14 }
 0x895   :  { %v5645_v51 = vrot.slane %v5640_v30, %v1481_v49  ;;  %v1722_v5 = vrot.slane %v1709_v2, %v1481_v49  ;;  %v1482_v35 = vrot.slane %v1469_v53, %v1481_v49 }
 0x896   :  { %v1474_v21 = vrot.slane %v1469_v53, %v5651_v52  ;;  %v1714_v14 = vrot.slane %v1709_v2, %v5651_v52  ;;  %v1954_v46 = vrot.slane %v5640_v30, %v5651_v52  ;;  %v5676_v2 = vld [vmem:[%s5895_s14 + $0x8] sm:$0xff] }
 0x897   :  { %4600 = vmatpush1.bf16.msra.mxu0 %v4599_v58  ;;  %4632 = vmatpush1.bf16.msra.mxu1 %v4631_v59  ;;  %vm2126_vm8 = vcmp.gt.f32.partialorder %v5676_v2, 0.0 }
 0x898   :  { %4602 = vmatprep.subr.bf16.mxu0 %v4601_v62  ;;  %4634 = vmatprep.subr.bf16.mxu1 %v4633_v63 }
 0x89b   :  { %4604 = vmatpush1.bf16.msra.mxu0 %v4603_v7  ;;  %4636 = vmatpush1.bf16.msra.mxu1 %v4635_v8 }
 0x89c   :  { %4606 = vmatprep.subr.bf16.mxu0 %v4605_v11  ;;  %4638 = vmatprep.subr.bf16.mxu1 %v4637_v13 }
 0x89f   :  { %4608 = vmatpush1.bf16.msra.mxu0 %v4607_v25  ;;  %4640 = vmatpush1.bf16.msra.mxu1 %v4639_v26 }
 0x8a0   :  { %4610 = vmatprep.subr.bf16.mxu0 %v4609_v31  ;;  %4642 = vmatprep.subr.bf16.mxu1 %v4641_v32 }
 0x8a3   :  { %4612 = vmatpush1.bf16.msra.mxu0 %v4611_v39  ;;  %4644 = vmatpush1.bf16.msra.mxu1 %v4643_v40  ;;  %v1486_v39 = vrot.slane %v1469_v53, %v1485_v50 }
 0x8a4   :  { %4614 = vmatprep.subr.bf16.mxu0 %v4613_v42  ;;  %4646 = vmatprep.subr.bf16.mxu1 %v4645_v43  ;;  %v1958_v42 = vrot.slane %v5640_v30, %v1477_v54 }
 0x8a7   :  { %4616 = vmatpush1.bf16.msra.mxu0 %v4615_v47  ;;  %4648 = vmatpush1.bf16.msra.mxu1 %v4647_v48 }
 0x8aa   :  { %2036 = vmatmul.mubr.f32.vlgmr.msra.gmra.mrb[22].mxu0 %v5499_v28  ;;  %2113 = vmatmul.mubr.f32.vlgmr.msra.gmra.mrb[26].mxu1 %v5499_v28 }
 0x8ab   :  { %2041 = vmatprep.mubr.f32.mxu0 %v4960_v6  ;;  %2118 = vmatprep.mubr.f32.mxu1 %v4960_v6 }
 0x8ae   :  { %2042 = vmatmul.mubr.f32.gmra.mrb[24].mxu0 %v5511_v18  ;;  %2119 = vmatmul.mubr.f32.gmra.mrb[28].mxu1 %v5511_v18 }
 0x93d   :  { %v1557_v56 = vpop.f32.mrb[14].mxu0  ;;  %v1634_v57 = vpop.f32.mrb[18].mxu1 }
 0x93e   :  { %v1558_v58 = vadd.f32 %v1557_v56, %v1474_v21  ;;  %v1559_v59 = vpop.f32.mrb[15].mxu0  ;;  %v1636_v60 = vpop.f32.mrb[19].mxu1  ;;  %v1635_v38 = vadd.f32 %v1634_v57, %v1482_v35 }
 0x93f   :  { %v1560_v61 = vadd.f32 %v1559_v59, %v1478_v55  ;;  %v1637_v41 = vadd.f32 %v1636_v60, %v1486_v39 }
 0x940   :  { %4062 = vmatprep.mubr.f32.mxu0 %v1558_v58 }
 0x941   :  { %v1563_v62 = vpop.f32.mrb[16].mxu0  ;;  %v1640_v63 = vpop.f32.mrb[20].mxu1  ;;  %4069 = vmatprep.mubr.f32.mxu1 %v1560_v61 }
 0x942   :  { %v1565_v0 = vpop.f32.mrb[17].mxu0  ;;  %v1642_v1 = vpop.f32.mrb[21].mxu1  ;;  %v1564_v36 = vadd.f32 %v1563_v62, %v1474_v21  ;;  %v1641_v40 = vadd.f32 %v1640_v63, %v1482_v35 }
 0x943   :  { %v1566_v37 = vadd.f32 %v1565_v0, %v1478_v55  ;;  %v1643_v43 = vadd.f32 %v1642_v1, %v1486_v39 }
 0x95d   :  { %v1797_v4 = vpop.f32.mrb[18].mxu0  ;;  %v1874_v12 = vpop.f32.mrb[22].mxu1 }
 0x95e   :  { %v1799_v7 = vpop.f32.mrb[19].mxu0  ;;  %v1876_v8 = vpop.f32.mrb[23].mxu1  ;;  %v1798_v15 = vadd.f32 %v1797_v4, %v1714_v14  ;;  %v1875_v17 = vadd.f32 %v1874_v12, %v1722_v5 }
 0x95f   :  { %v1800_v25 = vadd.f32 %v1799_v7, %v1718_v9  ;;  %v1877_v26 = vadd.f32 %v1876_v8, %v1726_v10 }
 0x961   :  { %v1803_v11 = vpop.f32.mrb[20].mxu0  ;;  %v1880_v13 = vpop.f32.mrb[24].mxu1 }
 0x962   :  { %v1804_v19 = vadd.f32 %v1803_v11, %v1714_v14  ;;  %v1881_v20 = vadd.f32 %v1880_v13, %v1722_v5  ;;  %v1805_v22 = vpop.f32.mrb[21].mxu0  ;;  %v1882_v24 = vpop.f32.mrb[25].mxu1  ;;  %v5680_v14 = vld [vmem:[%s5895_s14] sm:$0xff] }
 0x963   :  { %v1806_v27 = vadd.f32 %v1805_v22, %v1718_v9  ;;  %v1883_v29 = vadd.f32 %v1882_v24, %v1726_v10  ;;  %vm2125_vm9 = vcmp.gt.f32.partialorder %v5680_v14, 0.0 }
 0x964   :  { %v4649_v31 = vpack.c.bf16 %v1804_v19, %v1798_v15  ;;  %v4665_v32 = vpack.c.bf16 %v1881_v20, %v1875_v17 }
 0x965   :  { %v4653_v33 = vpack.c.bf16 %v1806_v27, %v1800_v25  ;;  %v4673_v34 = vpack.c.bf16 %v1883_v29, %v1877_v26 }
 0x966   :  { %4650 = vmatprep.subr.bf16.mxu0 %v4649_v31 }
 0x967   :  { %4652 = vmatpush3.bf16.xpose.msra.mxu0 %v4649_v31  ;;  %4654 = vmatprep.subr.bf16.mxu1 %v4653_v33 }
 0x968   :  { %4656 = vmatpush3.bf16.xpose.msra.mxu1 %v4653_v33 }
 0x969   :  { %4666 = vmatprep.subr.bf16.mxu1 %v4665_v32 }
 0x96e   :  { %4063 = vmatmul.mubr.f32.vlgmr.msra.gmra.mrb[26].mxu0 %v1564_v36 }
 0x96f   :  { %4070 = vmatmul.mubr.f32.vlgmr.msra.gmra.mrb[30].mxu1 %v1566_v37 }
 0x970   :  { %4668 = vmatpush3.bf16.xpose.msra.mxu1 %v4665_v32  ;;  %4090 = vmatprep.mubr.f32.mxu1 %v1635_v38 }
 0x971   :  { %4674 = vmatprep.subr.bf16.mxu1 %v4673_v34 }
 0x977   :  { %4091 = vmatmul.mubr.f32.vlgmr.msra.gmra.mrb[32].mxu1 %v1641_v40 }
 0x978   :  { %4676 = vmatpush3.bf16.xpose.msra.mxu1 %v4673_v34  ;;  %4104 = vmatprep.mubr.f32.mxu1 %v1637_v41 }
 0x979   :  { %4713 = vmatprep.subr.bf16.mxu1 %v4958_v3 }
 0x97d   :  { %v2037_v44 = vpop.f32.mrb[22].mxu0  ;;  %v2114_v45 = vpop.f32.mrb[26].mxu1 }
 0x97e   :  { %v2115_v47 = vadd.f32 %v2114_v45, %v5645_v51  ;;  %v2039_v48 = vpop.f32.mrb[23].mxu0  ;;  %v2116_v49 = vpop.f32.mrb[27].mxu1  ;;  %v2038_v54 = vadd.f32 %v2037_v44, %v1954_v46 }
 0x97f   :  { %v2040_v50 = vadd.f32 %v2039_v48, %v1958_v42  ;;  %v2117_v53 = vadd.f32 %v2116_v49, %v5648_v23  ;;  %4105 = vmatmul.mubr.f32.vlgmr.msra.gmra.mrb[34].mxu1 %v1643_v43 }
 0x980   :  { %4153 = vmatprep.mubr.msk.f32.mxu1 %vm4959_vm0, %v4960_v6 }
 0x981   :  { %v2043_v21 = vpop.f32.mrb[24].mxu0  ;;  %v2120_v55 = vpop.f32.mrb[28].mxu1 }
 0x982   :  { %v2044_v56 = vadd.f32 %v2043_v21, %v1954_v46  ;;  %v2121_v57 = vadd.f32 %v2120_v55, %v5645_v51  ;;  %v2045_v58 = vpop.f32.mrb[25].mxu0  ;;  %v2122_v30 = vpop.f32.mrb[29].mxu1 }
 0x983   :  { %v2046_v52 = vadd.f32 %v2045_v58, %v1958_v42  ;;  %v2123_v59 = vadd.f32 %v2122_v30, %v5648_v23 }
 0x984   :  { %v5668_v60 = vpack.c.bf16 %v2044_v56, %v2038_v54  ;;  %v5670_v61 = vpack.c.bf16 %v2121_v57, %v2115_v47 }
 0x985   :  { %v4657_v62 = vpack.c.bf16 %v2046_v52, %v2040_v50  ;;  %v5672_v63 = vpack.c.bf16 %v2123_v59, %v2117_v53 }
 0x987   :  { %4658 = vmatprep.subr.bf16.mxu0 %v4657_v62 }
 0x988   :  { %4660 = vmatpush3.bf16.msra.mxu0 %v4657_v62 }
 0x989   :  { %4662 = vmatprep.subr.bf16.mxu0 %v5668_v60 }
 0xa41   :  { %v4064_v0 = vpop.f32.mrb[26].mxu0 }
 0xa42   :  { %v2193_v1 = vpop.f32.mrb[27].mxu0  ;;  %v4071_v51 = vpop.f32.mrb[30].mxu1  ;;  %v2203_v23 = vmul.f32 0.088388346, %v4064_v0 }
 0xa43   :  { %v2308_v4 = vmul.f32 0.088388346, %v4071_v51  ;;  %v2298_v12 = vpop.f32.mrb[31].mxu1  ;;  %v2202_v5 = vmul.f32 0.088388346, %v2193_v1 }
 0xa44   :  { %v2307_v7 = vmul.f32 0.088388346, %v2298_v12  ;;  %v2205_v13 = vsel %vm2126_vm8, %v2203_v23, -1e+30 }
 0xa45   :  { %v2310_v8 = vsel %vm2126_vm8, %v2308_v4, -1e+30  ;;  %v2204_v15 = vsel %vm2125_vm9, %v2202_v5, -1e+30  ;;  %v2209_v19 = vsel %vm351_vm2, %v2205_v13, -inf }
 0xa46   :  { %v2314_v9 = vsel %vm351_vm2, %v2310_v8, -inf  ;;  %v2309_v10 = vsel %vm2125_vm9, %v2307_v7, -1e+30  ;;  %v2206_v24 = vsel %vm351_vm2, %v2204_v15, -inf }
 0xa47   :  { %2315 = vmax.xlane.f32.xlu1 %v2314_v9  ;;  %v2311_v11 = vsel %vm351_vm2, %v2309_v10, -inf }
 0xa48   :  { %2312 = vmax.xlane.f32.xlu0 %v2311_v11 }
 0xa4a   :  { %v4092_v17 = vpop.f32.mrb[32].mxu1 }
 0xa4b   :  { %v2575_v20 = vmul.f32 0.088388346, %v4092_v17  ;;  %v2565_v22 = vpop.f32.mrb[33].mxu1  ;;  %2210 = vmax.xlane.f32.xlu1 %v2209_v19 }
 0xa4c   :  { %v2574_v25 = vmul.f32 0.088388346, %v2565_v22  ;;  %2207 = vmax.xlane.f32.xlu0 %v2206_v24 }
 0xa4d   :  { %v2577_v26 = vsel %vm2126_vm8, %v2575_v20, -1e+30 }
 0xa4e   :  { %v2581_v27 = vsel %vm351_vm2, %v2577_v26, -inf  ;;  %v2576_v29 = vsel %vm2125_vm9, %v2574_v25, -1e+30 }
 0xa4f   :  { %2582 = vmax.xlane.f32.xlu1 %v2581_v27  ;;  %v2578_v31 = vsel %vm351_vm2, %v2576_v29, -inf }
 0xa50   :  { %2579 = vmax.xlane.f32.xlu0 %v2578_v31 }
 0xa52   :  { %v4106_v32 = vpop.f32.mrb[34].mxu1 }
 0xa53   :  { %v2763_v33 = vmul.f32 0.088388346, %v4106_v32  ;;  %v2753_v34 = vpop.f32.mrb[35].mxu1 }
 0xa54   :  { %v2762_v35 = vmul.f32 0.088388346, %v2753_v34  ;;  %v3023_v34 = vld [vmem:[%s5904_s28] sm:$0xf] }
 0xa55   :  { %v2765_v36 = vsel %vm2126_vm8, %v2763_v33, -1e+30 }
 0xa56   :  { %v2769_v37 = vsel %vm351_vm2, %v2765_v36, -inf  ;;  %v2764_v38 = vsel %vm2125_vm9, %v2762_v35, -1e+30  ;;  %v3030_v35 = vld [vmem:[%s5905_s1] sm:$0xf] }
 0xa57   :  { %2770 = vmax.xlane.f32.xlu1 %v2769_v37  ;;  %v2766_v39 = vsel %vm351_vm2, %v2764_v38, -inf  ;;  %v3031_v37 = vadd.s32 8, %v3030_v35 }
 0xa58   :  { %2767 = vmax.xlane.f32.xlu0 %v2766_v39 }
 0xad4   :  { %v2316_v40 = vpop.xlane.xlu1 %2315 }
 0xad5   :  { %v2318_v41 = vsub.f32 %v2310_v8, %v2316_v40  ;;  %v2313_v42 = vpop.xlane.xlu0 %2312 }
 0xad6   :  { %v2317_v43 = vsub.f32 %v2309_v10, %v2313_v42 }
 0xad7   :  { %v2321_v44 = vmul.f32 1.442695, %v2318_v41 }
 0xad8   :  { %v2319_v45 = vmul.f32 1.442695, %v2317_v43  ;;  %v2211_v46 = vpop.xlane.xlu1 %2210 }
 0xad9   :  { %4830 = vpow2.f32 %v2321_v44  ;;  %v2213_v47 = vsub.f32 %v2205_v13, %v2211_v46  ;;  %v2208_v48 = vpop.xlane.xlu0 %2207 }
 0xada   :  { %4832 = vpow2.f32 %v2319_v45  ;;  %v2212_v49 = vsub.f32 %v2204_v15, %v2208_v48 }
 0xadb   :  { %v2216_v50 = vmul.f32 1.442695, %v2213_v47 }
 0xadc   :  { %v2214_v53 = vmul.f32 1.442695, %v2212_v49  ;;  %v2583_v21 = vpop.xlane.xlu1 %2582 }
 0xadd   :  { %4834 = vpow2.f32 %v2216_v50  ;;  %v2585_v55 = vsub.f32 %v2577_v26, %v2583_v21  ;;  %v2580_v54 = vpop.xlane.xlu0 %2579 }
 0xade   :  { %4836 = vpow2.f32 %v2214_v53  ;;  %v2584_v56 = vsub.f32 %v2576_v29, %v2580_v54 }
 0xadf   :  { %v2588_v57 = vmul.f32 1.442695, %v2585_v55 }
 0xae0   :  { %v2586_v58 = vmul.f32 1.442695, %v2584_v56 }
 0xae1   :  { %4838 = vpow2.f32 %v2588_v57 }
 0xae2   :  { %4840 = vpow2.f32 %v2586_v58 }
 0xae3   :  { %v4831_v30 = vpop.eup %4830 }
 0xae4   :  { %v4833_v52 = vpop.eup %4832  ;;  %v2771_v59 = vpop.xlane.xlu1 %2770  ;;  %v5708_v62 = vmul.f32 %v5676_v2, %v4831_v30 }
 0xae5   :  { %v2773_v0 = vsub.f32 %v2765_v36, %v2771_v59  ;;  %v2768_v1 = vpop.xlane.xlu0 %2767  ;;  %v2323_v51 = vmul.f32 %v5680_v14, %v4833_v52  ;;  %v4961_v36 = vmov 0  }
 0xae6   :  { %v2772_v23 = vsub.f32 %v2764_v38, %v2768_v1  ;;  %v2328_v4 = vsel %vm351_vm2, %v5708_v62, 0.0  ;;  %4820 = vset.pattern.permute.xlu0 %v4961_v36  ;;  %4821 = vset.pattern.permute.xlu1 %v4961_v36  ;;  %v2878_v1 = vld [vmem:[%s5906_s2 + $0x8] sm:$0xff] }
 0xae7   :  { %v4835_v12 = vpop.eup %4834  ;;  %v2776_v5 = vmul.f32 1.442695, %v2773_v0  ;;  %2329 = vadd.xlane.f32.xlu1 %v2328_v4  ;;  %v2325_v7 = vsel %vm351_vm2, %v2323_v51, 0.0  ;;  %v2877_v0 = vld [vmem:[%s5906_s2] sm:$0xff] }
 0xae8   :  { %v4837_v8 = vpop.eup %4836  ;;  %v2774_v9 = vmul.f32 1.442695, %v2772_v23  ;;  %2326 = vadd.xlane.f32.xlu0 %v2325_v7  ;;  %v5715_v10 = vmul.f32 %v5676_v2, %v4835_v12  ;;  %v4681_v4 = vpack.c.bf16 %v2878_v1, %v2877_v0  ;;  %v2880_v7 = vld [vmem:[%s5906_s2 + $0x18] sm:$0xff]  ;;  %v3189_v0 = vld [vmem:[%s5909_s11 + $0x28] sm:$0xff]  ;;  %v3204_v1 = vld [vmem:[%s5910_s15 + $0x20] sm:$0xff] }
 0xae9   :  { %4842 = vpow2.f32 %v2776_v5  ;;  %v2218_v11 = vmul.f32 %v5680_v14, %v4837_v8  ;;  %v2879_v5 = vld [vmem:[%s5906_s2 + $0x10] sm:$0xff] }
 0xaea   :  { %4844 = vpow2.f32 %v2774_v9  ;;  %v2223_v13 = vsel %vm351_vm2, %v5715_v10, 0.0  ;;  %v4685_v9 = vpack.c.bf16 %v2880_v7, %v2879_v5  ;;  %v3206_v5 = vld [vmem:[%s5910_s15 + $0x30] sm:$0xff]  ;;  %v3207_v7 = vld [vmem:[%s5910_s15 + $0x38] sm:$0xff] }
 0xaeb   :  { %v4839_v15 = vpop.eup %4838  ;;  %2224 = vadd.xlane.f32.xlu1 %v2223_v13  ;;  %v2220_v17 = vsel %vm351_vm2, %v2218_v11, 0.0  ;;  %v2883_v13 = vld [vmem:[%s5906_s2 + $0x30] sm:$0xff] }
 0xaec   :  { %v4841_v19 = vpop.eup %4840  ;;  %2221 = vadd.xlane.f32.xlu0 %v2220_v17  ;;  %v5722_v20 = vmul.f32 %v5676_v2, %v4839_v15  ;;  %v2884_v15 = vld [vmem:[%s5906_s2 + $0x38] sm:$0xff] }
 0xaed   :  { %v2590_v22 = vmul.f32 %v5680_v14, %v4841_v19  ;;  %v4693_v17 = vpack.c.bf16 %v2884_v15, %v2883_v13  ;;  %v2885_v19 = vld [vmem:[%s5906_s2 + $0x40] sm:$0xff]  ;;  %v3209_v13 = vld [vmem:[%s5910_s15 + $0x48] sm:$0xff] }
 0xaee   :  { %v2595_v24 = vsel %vm351_vm2, %v5722_v20, 0.0 }
 0xaef   :  { %2596 = vadd.xlane.f32.xlu1 %v2595_v24  ;;  %v2592_v25 = vsel %vm351_vm2, %v2590_v22, 0.0  ;;  %v2887_v24 = vld [vmem:[%s5906_s2 + $0x50] sm:$0xff] }
 0xaf0   :  { %2593 = vadd.xlane.f32.xlu0 %v2592_v25  ;;  %v2888_v25 = vld [vmem:[%s5906_s2 + $0x58] sm:$0xff] }
 0xaf3   :  { %v4843_v26 = vpop.eup %4842 }
 0xaf4   :  { %v4845_v27 = vpop.eup %4844  ;;  %v5729_v29 = vmul.f32 %v5676_v2, %v4843_v26  ;;  %v2889_v26 = vld [vmem:[%s5906_s2 + $0x60] sm:$0xff] }
 0xaf5   :  { %v2778_v31 = vmul.f32 %v5680_v14, %v4845_v27  ;;  %v2890_v27 = vld [vmem:[%s5906_s2 + $0x68] sm:$0xff] }
 0xaf6   :  { %v2783_v32 = vsel %vm351_vm2, %v5729_v29, 0.0 }
 0xaf7   :  { %2784 = vadd.xlane.f32.xlu1 %v2783_v32  ;;  %v2780_v33 = vsel %vm351_vm2, %v2778_v31, 0.0  ;;  %v2892_v32 = vld [vmem:[%s5906_s2 + $0x78] sm:$0xff] }
 0xaf8   :  { %2781 = vadd.xlane.f32.xlu0 %v2780_v33 }
 0xb08   :  { %3033 = vperm.xlu1 %4821, %v3031_v37  }
 0xb0e   :  { %3025 = vperm.xlu0 %4820, %v3023_v34  }
 0xb74   :  { %v2330_v38 = vpop.xlane.xlu1 %2329 }
 0xb75   :  { %v2332_v2 = vmax.f32 %v2330_v38, 1e-20  ;;  %v2327_v39 = vpop.xlane.xlu0 %2326 }
 0xb76   :  { %v2331_v40 = vmax.f32 %v2327_v39, 1e-20 }
 0xb77   :  { %4846 = vrcp.f32 %v2332_v2  ;;  %v3491_v2 = vld [vmem:[%s5907_s7] ss:$0 sm:$0xff] }
 0xb78   :  { %4848 = vrcp.f32 %v2331_v40  ;;  %v2225_v14 = vpop.xlane.xlu1 %2224 }
 0xb79   :  { %v2222_v41 = vpop.xlane.xlu0 %2221  ;;  %v2227_v43 = vmax.f32 %v2225_v14, 1e-20 }
 0xb7a   :  { %v2226_v42 = vmax.f32 %v2222_v41, 1e-20 }
 0xb7c   :  { %4850 = vrcp.f32 %v2226_v42  ;;  %v2597_v46 = vpop.xlane.xlu1 %2596  ;;  %v3492_v42 = vld [vmem:[%s5908_s10] ss:$0 sm:$0xff] }
 0xb7d   :  { %v2594_v44 = vpop.xlane.xlu0 %2593  ;;  %4852 = vrcp.f32 %v2227_v43  ;;  %v2599_v49 = vmax.f32 %v2597_v46, 1e-20 }
 0xb7e   :  { %v2598_v45 = vmax.f32 %v2594_v44, 1e-20 }
 0xb80   :  { %4854 = vrcp.f32 %v2598_v45 }
 0xb81   :  { %v4847_v47 = vpop.eup %4846  ;;  %4856 = vrcp.f32 %v2599_v49 }
 0xb82   :  { %v4849_v48 = vpop.eup %4848  ;;  %v2336_v53 = vmul.f32 %v4847_v47, %v5708_v62 }
 0xb83   :  { %v2335_v50 = vmul.f32 %v4849_v48, %v2323_v51 }
 0xb84   :  { %v2785_v57 = vpop.xlane.xlu1 %2784 }
 0xb85   :  { %4076 = vmatprep.mubr.msk.f32.mxu0 %vm351_vm2, %v2335_v50  ;;  %v2782_v21 = vpop.xlane.xlu0 %2781  ;;  %v2787_v52 = vmax.f32 %v2785_v57, 1e-20  ;;  %v3186_v57 = vld [vmem:[%s5909_s11 + $0x10] sm:$0xff] }
 0xb86   :  { %v4851_v55 = vpop.eup %4850  ;;  %v2786_v54 = vmax.f32 %v2782_v21, 1e-20  ;;  %4077 = vmatmul.mubr.msk.f32.vlgmr.msra.gmra.mrb[28].mxu0 %vm351_vm2, %v2336_v53  ;;  %v3185_v21 = vld [vmem:[%s5909_s11 + $0x8] sm:$0xff] }
 0xb87   :  { %4664 = vmatpush3.bf16.msra.mxu0 %v5668_v60  ;;  %v2230_v56 = vmul.f32 %v4851_v55, %v2218_v11  ;;  %v4853_v58 = vpop.eup %4852  ;;  %v2882_v11 = vld [vmem:[%s5906_s2 + $0x28] sm:$0xff]  ;;  %v3200_v55 = vld [vmem:[%s5910_s15] sm:$0xff] }
 0xb88   :  { %4858 = vrcp.f32 %v2786_v54  ;;  %4670 = vmatprep.subr.bf16.mxu0 %v5670_v61  ;;  %v2231_v59 = vmul.f32 %v4853_v58, %v5715_v10  ;;  %v2881_v10 = vld [vmem:[%s5906_s2 + $0x20] sm:$0xff]  ;;  %v3034_v47 = vpop.permute.xlu1 %3033  ;;  %v3187_v58 = vld [vmem:[%s5909_s11 + $0x18] sm:$0xff] }
 0xb89   :  { %4083 = vmatprep.mubr.msk.f32.mxu0 %vm351_vm2, %v2230_v56  ;;  %4860 = vrcp.f32 %v2787_v52  ;;  %vm3035_vm11 = vcmp.eq.s32.totalorder %v5288_v16, %v3034_v47  ;;  %v3201_v56 = vld [vmem:[%s5910_s15 + $0x8] sm:$0xff]  ;;  %v3202_v52 = vld [vmem:[%s5910_s15 + $0x10] sm:$0xff] }
 0xb8a   :  { %v4855_v30 = vpop.eup %4854  ;;  %v3494_v53 = vsel %vm3035_vm11, 1.0, %v4960_v6 }
 0xb8b   :  { %v2602_v62 = vmul.f32 %v4855_v30, %v2590_v22  ;;  %v4857_v60 = vpop.eup %4856  ;;  %v4720_v30 = vpack.c.bf16 %v3201_v56, %v3200_v55 }
 0xb8c   :  { %v2603_v23 = vmul.f32 %v4857_v60, %v5722_v20  ;;  %v2886_v20 = vld [vmem:[%s5906_s2 + $0x48] sm:$0xff]  ;;  %v3188_v60 = vld [vmem:[%s5909_s11 + $0x20] sm:$0xff] }
 0xb8d   :  { %v4697_v22 = vpack.c.bf16 %v2886_v20, %v2885_v19  ;;  %v3026_v41 = vpop.permute.xlu0 %3025  ;;  %v3194_v19 = vld [vmem:[%s5909_s11 + $0x50] sm:$0xff]  ;;  %v3195_v20 = vld [vmem:[%s5909_s11 + $0x58] sm:$0xff] }
 0xb8e   :  { %4084 = vmatmul.mubr.msk.f32.vlgmr.msra.gmra.mrb[28].mxu0 %vm351_vm2, %v2231_v59  ;;  %vm3027_vm10 = vcmp.eq.s32.totalorder %v5288_v16, %v3026_v41  ;;  %v3184_v16 = vld [vmem:[%s5909_s11] sm:$0xff]  ;;  %v3203_v59 = vld [vmem:[%s5910_s15 + $0x18] sm:$0xff] }
 0xb8f   :  { %4672 = vmatpush3.bf16.msra.mxu0 %v5670_v61  ;;  %4097 = vmatprep.mubr.msk.f32.mxu0 %vm351_vm2, %v2602_v62  ;;  %v3493_v49 = vsel %vm3027_vm10, 1.0, %v4960_v6  ;;  %v4744_v54 = vpack.c.bf16 %v3185_v21, %v3184_v16  ;;  %v4747_v62 = vpack.c.bf16 %v3187_v58, %v3186_v57 }
 0xb90   :  { %4678 = vmatprep.subr.bf16.mxu0 %v5672_v63 }
 0xb92   :  { %v4859_v51 = vpop.eup %4858 }
 0xb93   :  { %v2790_v12 = vmul.f32 %v4859_v51, %v2778_v31  ;;  %v4861_v61 = vpop.eup %4860  ;;  %v2891_v31 = vld [vmem:[%s5906_s2 + $0x70] sm:$0xff]  ;;  %v3205_v51 = vld [vmem:[%s5910_s15 + $0x28] sm:$0xff] }
 0xb94   :  { %v2791_v8 = vmul.f32 %v4861_v61, %v5729_v29  ;;  %v4705_v29 = vpack.c.bf16 %v2890_v27, %v2889_v26  ;;  %v4709_v33 = vpack.c.bf16 %v2892_v32, %v2891_v31  ;;  %v3191_v61 = vld [vmem:[%s5909_s11 + $0x38] sm:$0xff]  ;;  %v3196_v26 = vld [vmem:[%s5909_s11 + $0x60] sm:$0xff]  ;;  %v3197_v27 = vld [vmem:[%s5909_s11 + $0x68] sm:$0xff] }
 0xb95   :  { %v3213_v31 = vld [vmem:[%s5910_s15 + $0x68] sm:$0xff]  ;;  %v4762_v32 = vpack.c.bf16 %v3197_v27, %v3196_v26 }
 0xb96   :  { %4098 = vmatmul.mubr.msk.f32.vlgmr.msra.gmra.mrb[28].mxu0 %vm351_vm2, %v2603_v23  ;;  %v4750_v23 = vpack.c.bf16 %v3189_v0, %v3188_v60 }
 0xb97   :  { %4680 = vmatpush3.bf16.msra.mxu0 %v5672_v63  ;;  %4111 = vmatprep.mubr.msk.f32.mxu0 %vm351_vm2, %v2790_v12  ;;  %v4689_v63 = vpack.c.bf16 %v2882_v11, %v2881_v10  ;;  %v3190_v12 = vld [vmem:[%s5909_s11 + $0x30] sm:$0xff]  ;;  %v3192_v10 = vld [vmem:[%s5909_s11 + $0x40] sm:$0xff]  ;;  %v3193_v11 = vld [vmem:[%s5909_s11 + $0x48] sm:$0xff] }
 0xb98   :  { %4682 = vmatprep.subr.bf16.mxu0 %v4681_v4  ;;  %v4756_v15 = vpack.c.bf16 %v3193_v11, %v3192_v10 }
 0xb9e   :  { %4112 = vmatmul.mubr.msk.f32.vlgmr.msra.gmra.mrb[28].mxu0 %vm351_vm2, %v2791_v8  ;;  %v4753_v8 = vpack.c.bf16 %v3191_v61, %v3190_v12  ;;  %v3497_v61 = vld [vmem:[%s5158_s5] ss:$0 sm:$0xff]  ;;  %s4962_s5 = smov [#allocation3]  }
 0xb9f   :  { %4684 = vmatpush3.bf16.msra.mxu0 %v4681_v4  ;;  %4146 = vmatprep.mubr.f32.mxu0 %v5499_v28  ;;  %v4701_v28 = vpack.c.bf16 %v2888_v25, %v2887_v24  ;;  %v4726_v4 = vpack.c.bf16 %v3205_v51, %v3204_v1  ;;  %v3211_v24 = vld [vmem:[%s5910_s15 + $0x58] sm:$0xff]  ;;  %v4759_v25 = vpack.c.bf16 %v3195_v20, %v3194_v19  ;;  %s3399_s18 = sshll.u32 %s4962_s5, 4  ;;  %s3400_s18 = int_to_ptr.vmem [resolvable:$true] %s3399_s18 }
 0xba0   :  { %4686 = vmatprep.subr.bf16.mxu0 %v4685_v9  ;;  %s4870_s22 = scalar_lea.vmem %s3400_s18, 16  ;;  %s4874_s23 = scalar_lea.vmem %s3400_s18, 32 }
 0xba1   :  { %p4871_p0 = scmp.ne.s32.totalorder %s3400_s18, %s4870_s22  ;;  %p4875_p1 = scmp.lt.s32.totalorder %s3400_s18, %s3400_s18 }
 0xba2   :  { %p4876_p2 = scmp.lt.s32.totalorder %s4874_s23, %s4870_s22 }
 0xba3   :  { %4688 = vmatpush3.bf16.msra.mxu0 %v4685_v9  ;;  %v4729_v9 = vpack.c.bf16 %v3207_v7, %v3206_v5 }
 0xba4   :  { %4690 = vmatprep.subr.bf16.mxu0 %v4689_v63  ;;  %p4877_p3 = por %p4876_p2, %p4875_p1 }
 0xba6   :  { %p4878_p4 = pnand %p4877_p3, %p4871_p0 }
 0xba7   :  { %4692 = vmatpush3.bf16.msra.mxu0 %v4689_v63  ;;  %v3208_v63 = vld [vmem:[%s5910_s15 + $0x40] sm:$0xff] }
 0xba8   :  { %4694 = vmatprep.subr.bf16.mxu0 %v4693_v17 }
 0xbab   :  { %4696 = vmatpush3.bf16.msra.mxu0 %v4693_v17  ;;  %v4732_v17 = vpack.c.bf16 %v3209_v13, %v3208_v63 }
 0xbac   :  { %4698 = vmatprep.subr.bf16.mxu0 %v4697_v22 }
 0xbaf   :  { %4700 = vmatpush3.bf16.msra.mxu0 %v4697_v22  ;;  %v3210_v22 = vld [vmem:[%s5910_s15 + $0x50] sm:$0xff] }
 0xbb0   :  { %4702 = vmatprep.subr.bf16.mxu0 %v4701_v28 }
 0xbb3   :  { %4704 = vmatpush3.bf16.msra.mxu0 %v4701_v28  ;;  %v4735_v28 = vpack.c.bf16 %v3211_v24, %v3210_v22 }
 0xbb4   :  { %4706 = vmatprep.subr.bf16.mxu0 %v4705_v29 }
 0xbb7   :  { %4708 = vmatpush3.bf16.msra.mxu0 %v4705_v29  ;;  %v3212_v29 = vld [vmem:[%s5910_s15 + $0x60] sm:$0xff] }
 0xbb8   :  { %4710 = vmatprep.subr.bf16.mxu0 %v4709_v33 }
 0xbbb   :  { %4712 = vmatpush3.bf16.msra.mxu0 %v4709_v33  ;;  %v4738_v33 = vpack.c.bf16 %v3213_v31, %v3212_v29 }
 0xbbc   :  { %4743 = vmatprep.subr.bf16.mxu0 %v4958_v3 }
 0xbbe   :  { %4147 = vmatmul.mubr.f32.vlgmr.msra.gmra.mrb[30].mxu0 %v5511_v18 }
 0xbbf   :  { %4230 = vmatprep.mubr.msk.f32.mxu0 %vm4959_vm0, %v4960_v6  ;;  %4745 = vmatpush3.bf16.msra.mxu0 %v4744_v54 }
 0xbc0   :  { %4746 = vmatprep.subr.bf16.mxu0 %v4958_v3 }
 0xbc3   :  { %4748 = vmatpush3.bf16.msra.mxu0 %v4747_v62 }
 0xbc4   :  { %4749 = vmatprep.subr.bf16.mxu0 %v4958_v3 }
 0xbc7   :  { %4751 = vmatpush3.bf16.msra.mxu0 %v4750_v23 }
 0xbc8   :  { %4752 = vmatprep.subr.bf16.mxu0 %v4958_v3 }
 0xbcb   :  { %4754 = vmatpush3.bf16.msra.mxu0 %v4753_v8 }
 0xbcc   :  { %4755 = vmatprep.subr.bf16.mxu0 %v4958_v3 }
 0xbcf   :  { %4757 = vmatpush3.bf16.msra.mxu0 %v4756_v15 }
 0xbd0   :  { %4758 = vmatprep.subr.bf16.mxu0 %v4958_v3 }
 0xbd3   :  { %4760 = vmatpush3.bf16.msra.mxu0 %v4759_v25 }
 0xbd4   :  { %4761 = vmatprep.subr.bf16.mxu0 %v4958_v3 }
 0xbd7   :  { %4763 = vmatpush3.bf16.msra.mxu0 %v4762_v32 }
 0xbd8   :  { %4764 = vmatprep.subr.bf16.mxu0 %v4958_v3 }
 0xc71   :  { %v4113_v34 = vpop.f32.mrb[28].mxu0 }
 0xc72   :  { %v2864_v35 = vpop.f32.mrb[29].mxu0  ;;  %v2876_v36 = vmul.f32 0.25, %v4113_v34  ;;  %v3198_v34 = vld [vmem:[%s5909_s11 + $0x70] sm:$0xff] }
 0xc73   :  { %v2875_v37 = vmul.f32 0.25, %v2864_v35  ;;  %v3199_v35 = vld [vmem:[%s5909_s11 + $0x78] sm:$0xff] }
 0xc91   :  { %v4148_v38 = vpop.f32.mrb[30].mxu0 }
 0xc92   :  { %v2969_v39 = vadd.f32 %v4148_v38, %v2876_v36  ;;  %v2959_v40 = vpop.f32.mrb[31].mxu0  ;;  %v4765_v36 = vpack.c.bf16 %v3199_v35, %v3198_v34  ;;  %v3215_v38 = vld [vmem:[%s5910_s15 + $0x78] sm:$0xff] }
 0xc93   :  { %v2968_v14 = vadd.f32 %v2959_v40, %v2875_v37  ;;  %v3214_v37 = vld [vmem:[%s5910_s15 + $0x70] sm:$0xff]  ;;  %v2979_v40 = vld [vmem:[%s5911_s16] sm:$0xff] }
 0xc94   :  { %v2978_v43 = vadd.f32 %v3491_v2, %v2969_v39  ;;  %4766 = vmatpush3.bf16.msra.mxu0 %v4765_v36  ;;  %v2980_v39 = vld [vmem:[%s5911_s16 + $0x8] sm:$0xff]  ;;  %v2997_v41 = vsel %vm2996_vm12, %v2979_v40, 0.0 }
 0xc95   :  { %v2977_v44 = vadd.f32 %v3491_v2, %v2968_v14  ;;  %v4741_v2 = vpack.c.bf16 %v3215_v38, %v3214_v37  ;;  %v2998_v14 = vsel %vm2996_vm12, %v2980_v39, 0.0 }
 0xc96   :  { %v2989_v45 = vsub.f32 %v3492_v42, %v2978_v43 }
 0xc97   :  { %v4714_v18 = vpack.c.bf16 %v2978_v43, %v2977_v44  ;;  %v2988_v46 = vsub.f32 %v3492_v42, %v2977_v44  ;;  %v2999_v42 = vadd.f32 %v2998_v14, %v2997_v41 }
 0xc98   :  { %v2991_v48 = vmul.f32 %v2989_v45, %v2989_v45 }
 0xc99   :  { %4715 = vmatpush3.bf16.msra.mxu1 %v4714_v18  ;;  %v2990_v50 = vmul.f32 %v2988_v46, %v2988_v46  ;;  %v3000_v43 = vrot.slane %v2999_v42, 4 }
 0xc9a   :  { %2994 = vadd.xlane.f32.xlu0 %v2991_v48  ;;  %4716 = vmatprep.subr.bf16.mxu1 %v4958_v3 }
 0xc9b   :  { %2992 = vadd.xlane.f32.xlu1 %v2990_v50  ;;  %v3001_v44 = vadd.f32 %v3000_v43, %v2999_v42 }
 0xc9c   :  { %4154 = vmatmul.mubr.msk.f32.vlgmr.msra.gmra.mrb[36].mxu1 %vm351_vm2, %v3493_v49 }
 0xc9d   :  { %4718 = vmatpush3.bf16.msra.mxu1 %v4714_v18  ;;  %4160 = vmatprep.mubr.msk.f32.mxu1 %vm4959_vm0, %v4960_v6  ;;  %v3002_v45 = vrot.slane %v3001_v44, 2 }
 0xc9e   :  { %4719 = vmatprep.subr.bf16.mxu1 %v4958_v3 }
 0xc9f   :  { %v3003_v18 = vadd.f32 %v3002_v45, %v3001_v44 }
 0xca0   :  { %4161 = vmatmul.mubr.msk.f32.vlgmr.msra.gmra.mrb[38].mxu1 %vm351_vm2, %v3494_v53 }
 0xca1   :  { %4195 = vmatprep.mubr.msk.f32.mxu1 %vm4959_vm0, %v4960_v6  ;;  %4721 = vmatpush3.bf16.msra.mxu1 %v4720_v30  ;;  %v4723_v6 = vpack.c.bf16 %v3203_v59, %v3202_v52  ;;  %v3004_v46 = vrot.slane %v3003_v18, 1 }
 0xca2   :  { %4722 = vmatprep.subr.bf16.mxu1 %v4958_v3 }
 0xca3   :  { %v3005_v47 = vadd.f32 %v3004_v46, %v3003_v18 }
 0xca5   :  { %4724 = vmatpush3.bf16.msra.mxu1 %v4723_v6 }
 0xca6   :  { %4725 = vmatprep.subr.bf16.mxu1 %v4958_v3 }
 0xca9   :  { %4727 = vmatpush3.bf16.msra.mxu1 %v4726_v4 }
 0xcaa   :  { %4728 = vmatprep.subr.bf16.mxu1 %v4958_v3 }
 0xcad   :  { %4730 = vmatpush3.bf16.msra.mxu1 %v4729_v9 }
 0xcae   :  { %4731 = vmatprep.subr.bf16.mxu1 %v4958_v3 }
 0xcb1   :  { %4733 = vmatpush3.bf16.msra.mxu1 %v4732_v17 }
 0xcb2   :  { %4734 = vmatprep.subr.bf16.mxu1 %v4958_v3 }
 0xcb5   :  { %4736 = vmatpush3.bf16.msra.mxu1 %v4735_v28 }
 0xcb6   :  { %4737 = vmatprep.subr.bf16.mxu1 %v4958_v3 }
 0xcb9   :  { %4739 = vmatpush3.bf16.msra.mxu1 %v4738_v33 }
 0xcba   :  { %4740 = vmatprep.subr.bf16.mxu1 %v4958_v3  ;;  %v3017_v3 = vmax.f32 %v3005_v47, 1.0 }
 0xcbc   :  { %v3018_v53 = vmul.f32 128.0, %v3017_v3 }
 0xcbd   :  { %4742 = vmatpush3.bf16.msra.mxu1 %v4741_v2 }
 0xcbe   :  { %4862 = vrcp.f32 %v3018_v53 }
 0xcc8   :  { %v4863_v59 = vpop.eup %4862 }
 0xd27   :  { %v2995_v48 = vpop.xlane.xlu0 %2994 }
 0xd28   :  { %v3007_v49 = vmul.f32 %v2995_v48, %v2980_v39  ;;  %v2993_v50 = vpop.xlane.xlu1 %2992 }
 0xd29   :  { %v3006_v16 = vmul.f32 %v2993_v50, %v2979_v40 }
 0xd2a   :  { %v3009_v21 = vsel %vm2996_vm12, %v3007_v49, 0.0 }
 0xd2b   :  { %v3008_v55 = vsel %vm2996_vm12, %v3006_v16, 0.0 }
 0xd2c   :  { %v3010_v54 = vadd.f32 %v3009_v21, %v3008_v55 }
 0xd2e   :  { %v3011_v56 = vrot.slane %v3010_v54, 4 }
 0xd30   :  { %v3012_v57 = vadd.f32 %v3011_v56, %v3010_v54 }
 0xd32   :  { %v3013_v58 = vrot.slane %v3012_v57, 2 }
 0xd34   :  { %v3014_v30 = vadd.f32 %v3013_v58, %v3012_v57 }
 0xd36   :  { %v3015_v52 = vrot.slane %v3014_v30, 1 }
 0xd38   :  { %v3016_v62 = vadd.f32 %v3015_v52, %v3014_v30 }
 0xd3a   :  { %v3020_v6 = vmul.f32 %v4863_v59, %v3016_v62 }
 0xd3c   :  { %3022 = vst.msk [vmem:[#allocation3] sm:$0x1] %vm3021_vm13, %v3020_v6 }
 0xd6f   :  { %v3107_v60 = vpop.f32.mrb[36].mxu1 }
 0xd70   :  { %v4155_v0 = vpop.f32.mrb[37].mxu1  ;;  %4231 = vmatmul.mubr.f32.vlgmr.msra.gmra.mrb[32].mxu0 %v3107_v60 }
 0xd73   :  { %v3180_v1 = vpop.f32.mrb[38].mxu1 }
 0xd74   :  { %v4162_v51 = vpop.f32.mrb[39].mxu1  ;;  %4196 = vmatmul.mubr.f32.vlgmr.msra.gmra.mrb[40].mxu1 %v3180_v1 }
 0xe43   :  { %v3352_v23 = vpop.f32.mrb[32].mxu0 }
 0xe44   :  { %v4232_v4 = vpop.f32.mrb[33].mxu0 }
 0xe47   :  { %v3282_v12 = vpop.f32.mrb[40].mxu1 }
 0xe48   :  { %v3353_v5 = vadd.f32 %v3352_v23, %v3282_v12  ;;  %v4197_v7 = vpop.f32.mrb[41].mxu1 }
 0xe4a   :  { %v3363_v8 = vadd.f32 %v3497_v61, %v3353_v5 }
 0xe4c   :  { %v3498_v9 = vmul.f32 -1.442695, %v3363_v8 }
 0xe4e   :  { %4864 = vpow2.f32 %v3498_v9 }
 0xe58   :  { %v4865_v10 = vpop.eup %4864 }
 0xe59   :  { %v3367_v11 = vadd.f32 1.0, %v4865_v10 }
 0xe5b   :  { %4866 = vrcp.f32 %v3367_v11 }
 0xe65   :  { %v4867_v63 = vpop.eup %4866 }
 0xe66   :  { %v3387_v13 = vmul.f32 4.0, %v4867_v63  ;;  %v3499_v15 = vadd.f32 -1.0, %v4867_v63 }
 0xe68   :  { %v3388_v17 = vadd.f32 1.0, %v3387_v13  ;;  %v3371_v19 = vmul.f32 %v3499_v15, %v3499_v15 }
 0xe6a   :  { %3390 = vst.msk [vmem:[%s5163_s3] sm:$0xf] %vm3389_vm14, %v3388_v17  ;;  %v3373_v20 = vsel %vm3372_vm15, %v3371_v19, 0.0 }
 0xe6b   :  { %v3374_v22 = vrot.slane %v3373_v20, 4 }
 0xe6d   :  { %v3375_v24 = vadd.f32 %v3374_v22, %v3373_v20 }
 0xe6e   :  { %4881 = shalt.err (!%p4878_p4)
}
 0xe6f   :  { %s4882_s26 = scalar_lea.hbm %s5168_s13, 16 }
 0xe70   :  { %p4883_p5 = scmp.ne.s32.totalorder %s5168_s13, %s4882_s26  ;;  %p4886_p6 = scmp.lt.u32.totalorder %s4882_s26, %s5168_s13 }
 0xe72   :  { %p4888_p7 = pnand %p4886_p6, %p4883_p5 }
 0xe74   :  { %4891 = shalt.err (!%p4888_p7)
}
 0xe75   :  { %3402 = dma.vmem_to_hbm [thread:$0]  %s3400_s18, 16, %s5168_s13, [#allocation4]   ;;  %v3376_v25 = vrot.slane %v3375_v24, 2 }
 0xe76   :  { %s4963_s3 = smov 127   ;;  %s4964_s0 = smov [#allocation5]  }
 0xe77   :  { %v3377_v28 = vadd.f32 %v3376_v25, %v3375_v24  ;;  %s3409_s17 = sshll.u32 %s4964_s0, 4  ;;  %s3410_s17 = int_to_ptr.vmem [resolvable:$true] %s3409_s17 }
 0xe78   :  { %s4892_s21 = scalar_lea.vmem %s3410_s17, 16  ;;  %s4896_s25 = scalar_lea.vmem %s3410_s17, 32 }
 0xe79   :  { %v3378_v26 = vrot.slane %v3377_v28, 1  ;;  %p4893_p8 = scmp.ne.s32.totalorder %s3410_s17, %s4892_s21  ;;  %p4897_p9 = scmp.lt.s32.totalorder %s3410_s17, %s3410_s17 }
 0xe7a   :  { %p4898_p10 = scmp.lt.s32.totalorder %s4896_s25, %s4892_s21 }
 0xe7b   :  { %v3379_v27 = vadd.f32 %v3378_v26, %v3377_v28 }
 0xe7c   :  { %p4899_p11 = por %p4898_p10, %p4897_p9 }
 0xe7d   :  { %v3381_v29 = vmul.f32 0.25, %v3379_v27 }
 0xe7e   :  { %p4900_p12 = pnand %p4899_p11, %p4893_p8 }
 0xe7f   :  { %3383 = vrot.lane.b32.xlu1 %v3381_v29, %s4963_s3 }
 0xef1   :  { %v3384_v31 = vpop.permute.xlu1 %3383 }
 0xef2   :  { %3386 = vst.msk [vmem:[#allocation5] sm:$0x1] %vm3021_vm13, %v3384_v31 }
 0xef3   :  { %4903 = shalt.err (!%p4900_p12)
}
 0xef4   :  { %s4904_s13 = scalar_lea.hbm %s5173_s9, 16 }
 0xef5   :  { %p4905_p13 = scmp.ne.s32.totalorder %s5173_s9, %s4904_s13  ;;  %p4908_p0 = scmp.lt.u32.totalorder %s4904_s13, %s5173_s9 }
 0xef7   :  { %p4910_p1 = pnand %p4908_p0, %p4905_p13 }
 0xef9   :  { %4913 = shalt.err (!%p4910_p1)
}
 0xefa   :  { %3412 = dma.vmem_to_hbm [thread:$0]  %s3410_s17, 16, %s5173_s9, [#allocation6]  }
 0xefb   :  { %4914 = dma.done.wait [#allocation4], 16  }
 0xefc   :  { %4915 = vsyncadd [#allocation4], 4294967280 }
 0xefd   :  { %4916 = dma.done.wait [#allocation6], 16  }
 0xefe   :  { %4917 = vsyncadd [#allocation6], 4294967280 }
 0xeff   :  { %3421 = vsyncpa [#allocation4], 1 }
 0xf00   :  { %3422 = vsyncpa [#allocation6], 1 }

</bundles_post_ra>
